<compile_context>
chip_gen: v5e
topology: v5e:2x2
jax: 0.10.0
libtpu: 0.0.40
codegen_flags: <defaults>
</compile_context>

<pallas_src>
import functools
import math

import jax
import jax.numpy as jnp
import numpy as np
from jax.experimental import pallas as pl
from jax.experimental.pallas import tpu as pltpu

# ----------------------- small config consistent with DDiTBlock ---------------
B = 2            # batch
S = 16           # sequence length
D = 256          # hidden dim
H = 2            # attention heads
HD = D // H      # head dim (128)
COND = 128       # cond_dim
MLP = 4 * D      # mlp_ratio * dim
EPS = 1e-5
D_ROT = HD // 2  # rotary dims per head (64)
QS = D_ROT // 2  # rotate_half shift inside the rotary half (32)
BS = B * S       # flattened rows
PREC = jax.lax.Precision.HIGHEST   # used only by the pure-JAX reference


def _layer_norm(x, w):
    # Fused statistics: E[x] and E[x^2] in one pass, var = E[x^2] - E[x]^2.
    mu = jnp.mean(x, axis=-1, keepdims=True)
    m2 = jnp.mean(x * x, axis=-1, keepdims=True)
    var = m2 - mu * mu
    return (x - mu) * jax.lax.rsqrt(var + EPS) * w


def _gelu_tanh(x):
    c = 0.7978845608028654  # sqrt(2/pi)
    return 0.5 * x * (1.0 + jnp.tanh(c * (x + 0.044715 * x * x * x)))


def _bdot(a, b):
    """Single-pass bf16 MXU matmul with f32 accumulation."""
    return jnp.dot(a.astype(jnp.bfloat16), b.astype(jnp.bfloat16),
                   preferred_element_type=jnp.float32)


def ddit_block_kernel(ada_ref, x_ref, cosm_ref, sina_ref, sinb_ref,
                      ln1_w_ref, wqkv_ref, wout_ref, ln2_w_ref,
                      w1_ref, b1_ref, w2_ref, b2_ref, out_ref):
    x = x_ref[...]                 # (BS, D) f32
    ada = ada_ref[...]             # (BS, 6D) f32, per-row adaLN modulation
    shift_msa = ada[:, 0 * D:1 * D]
    scale_msa = ada[:, 1 * D:2 * D]
    gate_msa = ada[:, 2 * D:3 * D]
    shift_mlp = ada[:, 3 * D:4 * D]
    scale_mlp = ada[:, 4 * D:5 * D]
    gate_mlp = ada[:, 5 * D:6 * D]

    # per-row rotary maps (BS, HD), already tiled for the flattened layout
    cosm = cosm_ref[...]
    sina = sina_ref[...]
    sinb = sinb_ref[...]

    def rope(t):
        # rotary on one 128-lane head column over all BS rows: rolls stay inside
        # one vreg lane width, sina/sinb zero out the wrap positions.
        t_p = pltpu.roll(t, shift=HD - QS, axis=1)   # t_p[j] = t[j + QS]
        t_m = pltpu.roll(t, shift=QS, axis=1)        # t_m[j] = t[j - QS]
        return t * cosm + t_p * sina + t_m * sinb

    # ---------------- attention branch ----------------
    xm = _layer_norm(x, ln1_w_ref[...]) * (1.0 + scale_msa) + shift_msa
    qkv = _bdot(xm, wqkv_ref[...])                   # (BS, 3D) f32, M = B*S

    q_cols = [rope(qkv[:, h * HD:(h + 1) * HD]).astype(jnp.bfloat16)
              for h in range(H)]
    k_cols = [rope(qkv[:, D + h * HD:D + (h + 1) * HD]).astype(jnp.bfloat16)
              for h in range(H)]
    # NOTE: the dense (non-flash) reference rotates v as well; kept on purpose.
    v_cols = [rope(qkv[:, 2 * D + h * HD:2 * D + (h + 1) * HD]).astype(jnp.bfloat16)
              for h in range(H)]

    inv_sqrt_d = 1.0 / math.sqrt(HD)
    o_rows = []
    for b in range(B):                               # B=2, unrolled at trace time
        r0 = b * S
        head_outs = []
        for h in range(H):                           # H=2, unrolled at trace time
            qh = q_cols[h][r0:r0 + S]
            kh = k_cols[h][r0:r0 + S]
            vh = v_cols[h][r0:r0 + S]
            s = jax.lax.dot_general(
                qh, kh, dimension_numbers=(((1,), (1,)), ((), ())),
                preferred_element_type=jnp.float32) * inv_sqrt_d
            s = s - jnp.max(s, axis=-1, keepdims=True)
            p = jnp.exp(s)
            p = p * pl.reciprocal(jnp.sum(p, axis=-1, keepdims=True), approx=True)
            head_outs.append(_bdot(p, vh))           # (S, HD) f32
        # heads packed into aligned 128-lane halves of the (S, D) row block.
        o_rows.append(jnp.concatenate(head_outs, axis=1))   # (S, D)
    o = jnp.concatenate(o_rows, axis=0)              # (BS, D)
    attn = _bdot(o, wout_ref[...])                   # single K=D output projection

    # bias_dropout_add_scale, inference: residual + gate * x
    x1 = x + gate_msa * attn

    # ---------------- MLP branch ----------------
    xm2 = _layer_norm(x1, ln2_w_ref[...]) * (1.0 + scale_mlp) + shift_mlp
    h1 = _bdot(xm2, w1_ref[...]) + b1_ref[...]
    h1 = _gelu_tanh(h1)
    h2 = _bdot(h1, w2_ref[...]) + b2_ref[...]
    out_ref[...] = x1 + gate_mlp * h2


def build_rotary_maps(cos_half, sin_half):
    """(S, HD/2) cos/sin -> (B*S, HD) maps so rotary is elementwise + roll."""
    zeros_pass = jnp.zeros((S, HD - D_ROT), jnp.float32)
    cosm = jnp.concatenate(
        [cos_half, jnp.ones((S, HD - D_ROT), jnp.float32)], axis=1)
    sina = jnp.concatenate(
        [-sin_half[:, :QS], jnp.zeros((S, D_ROT - QS), jnp.float32), zeros_pass],
        axis=1)
    sinb = jnp.concatenate(
        [jnp.zeros((S, QS), jnp.float32), sin_half[:, QS:], zeros_pass], axis=1)
    tile = lambda a: jnp.tile(a, (B, 1))             # rows grouped per batch
    return {"cosm": tile(cosm), "sina": tile(sina), "sinb": tile(sinb)}


def prepare_kernel_params(p):
    """One-time weight preparation: bf16-cast the big matrices (NOT per call)."""
    kp = {k: p[k] for k in ("ln1_w", "ln2_w", "b1", "b2", "ada_w", "ada_b")}
    for name in ("wqkv", "wout", "w1", "w2"):
        kp[name] = p[name].astype(jnp.bfloat16)
    return kp


def ddit_block(x, c, rot, kp):
    # adaLN Linear hoisted out of the kernel (M=1 matmul); its per-batch row is
    # broadcast over the S-row group so the kernel works on one flattened slab.
    ada = jnp.dot(c, kp["ada_w"]) + kp["ada_b"]                          # (B, 6D)
    ada = jnp.broadcast_to(ada[:, None, :], (B, S, 6 * D)).reshape(BS, 6 * D)
    x_flat = x.reshape(BS, D)

    # No grid: a single step, everything whole-array resident in VMEM.
    vmem = pl.BlockSpec(memory_space=pltpu.MemorySpace.VMEM)
    out = pl.pallas_call(
        ddit_block_kernel,
        out_shape=jax.ShapeDtypeStruct((BS, D), jnp.float32),
        in_specs=[vmem] * 13,
        out_specs=vmem,
        compiler_params=pltpu.CompilerParams(
            vmem_limit_bytes=32 * 1024 * 1024),
    )(ada, x_flat, rot["cosm"], rot["sina"], rot["sinb"],
      kp["ln1_w"], kp["wqkv"], kp["wout"], kp["ln2_w"],
      kp["w1"], kp["b1"], kp["w2"], kp["b2"])
    return out.reshape(B, S, D)


# ----------------------------- pure-JAX reference ------------------------------
def reference_forward(x, c, cos_half, sin_half, p):
    ein = functools.partial(jnp.einsum, precision=PREC)
    ada = ein("bc,ce->be", c, p["ada_w"]) + p["ada_b"]        # (B, 6D)
    (shift_msa, scale_msa, gate_msa,
     shift_mlp, scale_mlp, gate_mlp) = [a[:, None, :] for a in
                                        jnp.split(ada, 6, axis=-1)]

    def ln(v, w):
        mu = v.mean(-1, keepdims=True)
        var = jnp.square(v - mu).mean(-1, keepdims=True)
        return (v - mu) / jnp.sqrt(var + EPS) * w

    x_skip = x
    xm = ln(x, p["ln1_w"]) * (1.0 + scale_msa) + shift_msa
    qkv = ein("bsd,de->bse", xm, p["wqkv"]).reshape(B, S, 3, H, HD)

    d_rot = HD // 2
    xr, xpass = qkv[..., :d_rot], qkv[..., d_rot:]
    cos_e = cos_half[None, :, None, None, :]
    sin_e = sin_half[None, :, None, None, :]
    a1, a2 = xr[..., :d_rot // 2], xr[..., d_rot // 2:]
    rot_half = jnp.concatenate([-a2, a1], axis=-1)
    rotated = xr * cos_e + rot_half * sin_e
    qkv = jnp.concatenate([rotated, xpass], axis=-1)

    q, k, v = qkv[:, :, 0], qkv[:, :, 1], qkv[:, :, 2]        # (B,S,H,HD)
    q, k, v = (t.transpose(0, 2, 1, 3) for t in (q, k, v))    # (B,H,S,HD)
    s = ein("bhqd,bhkd->bhqk", q, k) / math.sqrt(HD)
    pattn = jax.nn.softmax(s, axis=-1)
    o = ein("bhqk,bhkd->bhqd", pattn, v).transpose(0, 2, 1, 3).reshape(B, S, D)
    xo = x_skip + gate_msa * ein("bsd,de->bse", o, p["wout"])

    xm2 = ln(xo, p["ln2_w"]) * (1.0 + scale_mlp) + shift_mlp
    h = ein("bsd,de->bse", xm2, p["w1"]) + p["b1"]
    g = 0.5 * h * (1.0 + jnp.tanh(0.7978845608028654 * (h + 0.044715 * h ** 3)))
    return xo + gate_mlp * (ein("bse,ed->bsd", g, p["w2"]) + p["b2"])


def init_params(key):
    ks = jax.random.split(key, 8)
    n = lambda k, shape, s: jax.random.normal(k, shape, jnp.float32) * s
    return {
        "ln1_w": jnp.ones((1, D), jnp.float32),
        "ln2_w": jnp.ones((1, D), jnp.float32),
        "wqkv": n(ks[0], (D, 3 * D), 0.05),
        "wout": n(ks[1], (D, D), 0.05),
        "w1": n(ks[2], (D, MLP), 0.05),
        "b1": n(ks[3], (1, MLP), 0.05),
        "w2": n(ks[4], (MLP, D), 0.05),
        "b2": n(ks[5], (1, D), 0.05),
        # NOTE: DDiTBlock zero-inits adaLN (which would make the block the
        # identity); use small random values so the full compute path is tested.
        "ada_w": n(ks[6], (COND, 6 * D), 0.05),
        "ada_b": n(ks[7], (1, 6 * D), 0.05),
    }


if __name__ == "__main__":
    key = jax.random.PRNGKey(0)
    kx, kc, kp = jax.random.split(key, 3)
    x = jax.random.normal(kx, (B, S, D), jnp.float32)
    c = jax.random.normal(kc, (B, COND), jnp.float32)
    params = init_params(kp)
    kparams = prepare_kernel_params(params)     # one-time bf16 cast, not per call

    # rotary cos/sin as produced by the Rotary module (first d_rot columns)
    inv_freq = 1.0 / (10000.0 ** (jnp.arange(0, HD, 2, dtype=jnp.float32) / HD))
    freqs = jnp.arange(S, dtype=jnp.float32)[:, None] * inv_freq[None, :]
    cos_half, sin_half = jnp.cos(freqs), jnp.sin(freqs)        # (S, HD/2)
    rot = build_rotary_maps(cos_half, sin_half)                # built once

    fwd = jax.jit(ddit_block)
    out = jax.block_until_ready(fwd(x, c, rot, kparams))
    ref = jax.block_until_ready(reference_forward(x, c, cos_half, sin_half, params))

    # tolerance loosened vs. the f32-HIGHEST reference: kernel matmuls are bf16
    # single-pass with f32 accumulation (weights stored bf16).
    np.testing.assert_allclose(np.asarray(out), np.asarray(ref),
                               atol=5e-2, rtol=5e-2)
    print("KERNEL_OK")
</pallas_src>

<mosaic_0001>
module attributes {stable_mosaic.version = 11 : i64} {
  func.func @ddit_block_kernel(%arg0: memref<32x1536xf32, #tpu.memory_space<vmem>>, %arg1: memref<32x256xf32, #tpu.memory_space<vmem>>, %arg2: memref<32x128xf32, #tpu.memory_space<vmem>>, %arg3: memref<32x128xf32, #tpu.memory_space<vmem>>, %arg4: memref<32x128xf32, #tpu.memory_space<vmem>>, %arg5: memref<1x256xf32, #tpu.memory_space<vmem>>, %arg6: memref<256x768xbf16, #tpu.memory_space<vmem>>, %arg7: memref<256x256xbf16, #tpu.memory_space<vmem>>, %arg8: memref<1x256xf32, #tpu.memory_space<vmem>>, %arg9: memref<256x1024xbf16, #tpu.memory_space<vmem>>, %arg10: memref<1x1024xf32, #tpu.memory_space<vmem>>, %arg11: memref<1024x256xbf16, #tpu.memory_space<vmem>>, %arg12: memref<1x256xf32, #tpu.memory_space<vmem>>, %arg13: memref<32x256xf32, #tpu.memory_space<vmem>>) attributes {dimension_semantics = [], scalar_prefetch = 0 : i64, scratch_operands = 0 : i64, tpu.core_type = #tpu.core_type<tc>} {
    %c0 = arith.constant 0 : index
    %c0_0 = arith.constant 0 : index
    %0 = vector.load %arg1[%c0, %c0_0] : memref<32x256xf32, #tpu.memory_space<vmem>>, vector<32x256xf32>
    %c0_1 = arith.constant 0 : index
    %c0_2 = arith.constant 0 : index
    %1 = vector.load %arg0[%c0_1, %c0_2] : memref<32x1536xf32, #tpu.memory_space<vmem>>, vector<32x1536xf32>
    %2 = vector.extract_strided_slice %1 {offsets = [0, 0], sizes = [32, 256], strides = [1, 1]} : vector<32x1536xf32> to vector<32x256xf32>
    %3 = vector.extract_strided_slice %1 {offsets = [0, 256], sizes = [32, 256], strides = [1, 1]} : vector<32x1536xf32> to vector<32x256xf32>
    %4 = vector.extract_strided_slice %1 {offsets = [0, 512], sizes = [32, 256], strides = [1, 1]} : vector<32x1536xf32> to vector<32x256xf32>
    %5 = vector.extract_strided_slice %1 {offsets = [0, 768], sizes = [32, 256], strides = [1, 1]} : vector<32x1536xf32> to vector<32x256xf32>
    %6 = vector.extract_strided_slice %1 {offsets = [0, 1024], sizes = [32, 256], strides = [1, 1]} : vector<32x1536xf32> to vector<32x256xf32>
    %7 = vector.extract_strided_slice %1 {offsets = [0, 1280], sizes = [32, 256], strides = [1, 1]} : vector<32x1536xf32> to vector<32x256xf32>
    %c0_3 = arith.constant 0 : index
    %c0_4 = arith.constant 0 : index
    %8 = vector.load %arg2[%c0_3, %c0_4] : memref<32x128xf32, #tpu.memory_space<vmem>>, vector<32x128xf32>
    %c0_5 = arith.constant 0 : index
    %c0_6 = arith.constant 0 : index
    %9 = vector.load %arg3[%c0_5, %c0_6] : memref<32x128xf32, #tpu.memory_space<vmem>>, vector<32x128xf32>
    %c0_7 = arith.constant 0 : index
    %c0_8 = arith.constant 0 : index
    %10 = vector.load %arg4[%c0_7, %c0_8] : memref<32x128xf32, #tpu.memory_space<vmem>>, vector<32x128xf32>
    %c0_9 = arith.constant 0 : index
    %c0_10 = arith.constant 0 : index
    %11 = vector.load %arg5[%c0_9, %c0_10] : memref<1x256xf32, #tpu.memory_space<vmem>>, vector<1x256xf32>
    %cst = arith.constant dense<0.000000e+00> : vector<32xf32>
    %12 = vector.multi_reduction <add>, %0, %cst [1] : vector<32x256xf32> to vector<32xf32>
    %13 = vector.shape_cast %12 : vector<32xf32> to vector<32x1xf32>
    %cst_11 = arith.constant 2.560000e+02 : f32
    %14 = vector.broadcast %cst_11 : f32 to vector<32x1xf32>
    %15 = arith.divf %13, %14 : vector<32x1xf32>
    %16 = arith.mulf %0, %0 : vector<32x256xf32>
    %cst_12 = arith.constant dense<0.000000e+00> : vector<32xf32>
    %17 = vector.multi_reduction <add>, %16, %cst_12 [1] : vector<32x256xf32> to vector<32xf32>
    %18 = vector.shape_cast %17 : vector<32xf32> to vector<32x1xf32>
    %cst_13 = arith.constant 2.560000e+02 : f32
    %19 = vector.broadcast %cst_13 : f32 to vector<32x1xf32>
    %20 = arith.divf %18, %19 : vector<32x1xf32>
    %21 = arith.mulf %15, %15 : vector<32x1xf32>
    %22 = arith.subf %20, %21 : vector<32x1xf32>
    %23 = vector.broadcast %15 : vector<32x1xf32> to vector<32x256xf32>
    %24 = arith.subf %0, %23 : vector<32x256xf32>
    %cst_14 = arith.constant 9.99999974E-6 : f32
    %25 = vector.broadcast %cst_14 : f32 to vector<32x1xf32>
    %26 = arith.addf %22, %25 : vector<32x1xf32>
    %27 = math.rsqrt %26 : vector<32x1xf32>
    %28 = vector.broadcast %27 : vector<32x1xf32> to vector<32x256xf32>
    %29 = arith.mulf %24, %28 : vector<32x256xf32>
    %30 = vector.broadcast %11 : vector<1x256xf32> to vector<32x256xf32>
    %31 = arith.mulf %29, %30 : vector<32x256xf32>
    %cst_15 = arith.constant 1.000000e+00 : f32
    %32 = vector.broadcast %cst_15 : f32 to vector<32x256xf32>
    %33 = arith.addf %32, %3 : vector<32x256xf32>
    %34 = arith.mulf %31, %33 : vector<32x256xf32>
    %35 = arith.addf %34, %2 : vector<32x256xf32>
    %c0_16 = arith.constant 0 : index
    %c0_17 = arith.constant 0 : index
    %36 = vector.load %arg6[%c0_16, %c0_17] : memref<256x768xbf16, #tpu.memory_space<vmem>>, vector<256x768xbf16>
    %37 = arith.truncf %35 : vector<32x256xf32> to vector<32x256xbf16>
    %cst_18 = arith.constant dense<0.000000e+00> : vector<32x768xf32>
    %38 = tpu.matmul %37, %36, %cst_18 {dimension_numbers = #tpu.dot_dimension_numbers<[1], [0], [0], [1], [0, 0, 1, 1], [], []>} : vector<32x256xbf16>, vector<256x768xbf16>, vector<32x768xf32> -> vector<32x768xf32>
    %39 = vector.extract_strided_slice %38 {offsets = [0, 0], sizes = [32, 128], strides = [1, 1]} : vector<32x768xf32> to vector<32x128xf32>
    %c96_i32 = arith.constant 96 : i32
    %40 = tpu.dynamic_rotate %39 by %c96_i32 dim 1 : vector<32x128xf32>, i32 -> vector<32x128xf32>
    %c32_i32 = arith.constant 32 : i32
    %41 = tpu.dynamic_rotate %39 by %c32_i32 dim 1 : vector<32x128xf32>, i32 -> vector<32x128xf32>
    %42 = arith.mulf %39, %8 : vector<32x128xf32>
    %43 = arith.mulf %40, %9 : vector<32x128xf32>
    %44 = arith.addf %42, %43 : vector<32x128xf32>
    %45 = arith.mulf %41, %10 : vector<32x128xf32>
    %46 = arith.addf %44, %45 : vector<32x128xf32>
    %47 = arith.truncf %46 : vector<32x128xf32> to vector<32x128xbf16>
    %48 = vector.extract_strided_slice %38 {offsets = [0, 128], sizes = [32, 128], strides = [1, 1]} : vector<32x768xf32> to vector<32x128xf32>
    %c96_i32_19 = arith.constant 96 : i32
    %49 = tpu.dynamic_rotate %48 by %c96_i32_19 dim 1 : vector<32x128xf32>, i32 -> vector<32x128xf32>
    %c32_i32_20 = arith.constant 32 : i32
    %50 = tpu.dynamic_rotate %48 by %c32_i32_20 dim 1 : vector<32x128xf32>, i32 -> vector<32x128xf32>
    %51 = arith.mulf %48, %8 : vector<32x128xf32>
    %52 = arith.mulf %49, %9 : vector<32x128xf32>
    %53 = arith.addf %51, %52 : vector<32x128xf32>
    %54 = arith.mulf %50, %10 : vector<32x128xf32>
    %55 = arith.addf %53, %54 : vector<32x128xf32>
    %56 = arith.truncf %55 : vector<32x128xf32> to vector<32x128xbf16>
    %57 = vector.extract_strided_slice %38 {offsets = [0, 256], sizes = [32, 128], strides = [1, 1]} : vector<32x768xf32> to vector<32x128xf32>
    %c96_i32_21 = arith.constant 96 : i32
    %58 = tpu.dynamic_rotate %57 by %c96_i32_21 dim 1 : vector<32x128xf32>, i32 -> vector<32x128xf32>
    %c32_i32_22 = arith.constant 32 : i32
    %59 = tpu.dynamic_rotate %57 by %c32_i32_22 dim 1 : vector<32x128xf32>, i32 -> vector<32x128xf32>
    %60 = arith.mulf %57, %8 : vector<32x128xf32>
    %61 = arith.mulf %58, %9 : vector<32x128xf32>
    %62 = arith.addf %60, %61 : vector<32x128xf32>
    %63 = arith.mulf %59, %10 : vector<32x128xf32>
    %64 = arith.addf %62, %63 : vector<32x128xf32>
    %65 = arith.truncf %64 : vector<32x128xf32> to vector<32x128xbf16>
    %66 = vector.extract_strided_slice %38 {offsets = [0, 384], sizes = [32, 128], strides = [1, 1]} : vector<32x768xf32> to vector<32x128xf32>
    %c96_i32_23 = arith.constant 96 : i32
    %67 = tpu.dynamic_rotate %66 by %c96_i32_23 dim 1 : vector<32x128xf32>, i32 -> vector<32x128xf32>
    %c32_i32_24 = arith.constant 32 : i32
    %68 = tpu.dynamic_rotate %66 by %c32_i32_24 dim 1 : vector<32x128xf32>, i32 -> vector<32x128xf32>
    %69 = arith.mulf %66, %8 : vector<32x128xf32>
    %70 = arith.mulf %67, %9 : vector<32x128xf32>
    %71 = arith.addf %69, %70 : vector<32x128xf32>
    %72 = arith.mulf %68, %10 : vector<32x128xf32>
    %73 = arith.addf %71, %72 : vector<32x128xf32>
    %74 = arith.truncf %73 : vector<32x128xf32> to vector<32x128xbf16>
    %75 = vector.extract_strided_slice %38 {offsets = [0, 512], sizes = [32, 128], strides = [1, 1]} : vector<32x768xf32> to vector<32x128xf32>
    %c96_i32_25 = arith.constant 96 : i32
    %76 = tpu.dynamic_rotate %75 by %c96_i32_25 dim 1 : vector<32x128xf32>, i32 -> vector<32x128xf32>
    %c32_i32_26 = arith.constant 32 : i32
    %77 = tpu.dynamic_rotate %75 by %c32_i32_26 dim 1 : vector<32x128xf32>, i32 -> vector<32x128xf32>
    %78 = arith.mulf %75, %8 : vector<32x128xf32>
    %79 = arith.mulf %76, %9 : vector<32x128xf32>
    %80 = arith.addf %78, %79 : vector<32x128xf32>
    %81 = arith.mulf %77, %10 : vector<32x128xf32>
    %82 = arith.addf %80, %81 : vector<32x128xf32>
    %83 = arith.truncf %82 : vector<32x128xf32> to vector<32x128xbf16>
    %84 = vector.extract_strided_slice %38 {offsets = [0, 640], sizes = [32, 128], strides = [1, 1]} : vector<32x768xf32> to vector<32x128xf32>
    %c96_i32_27 = arith.constant 96 : i32
    %85 = tpu.dynamic_rotate %84 by %c96_i32_27 dim 1 : vector<32x128xf32>, i32 -> vector<32x128xf32>
    %c32_i32_28 = arith.constant 32 : i32
    %86 = tpu.dynamic_rotate %84 by %c32_i32_28 dim 1 : vector<32x128xf32>, i32 -> vector<32x128xf32>
    %87 = arith.mulf %84, %8 : vector<32x128xf32>
    %88 = arith.mulf %85, %9 : vector<32x128xf32>
    %89 = arith.addf %87, %88 : vector<32x128xf32>
    %90 = arith.mulf %86, %10 : vector<32x128xf32>
    %91 = arith.addf %89, %90 : vector<32x128xf32>
    %92 = arith.truncf %91 : vector<32x128xf32> to vector<32x128xbf16>
    %93 = vector.extract_strided_slice %47 {offsets = [0, 0], sizes = [16, 128], strides = [1, 1]} : vector<32x128xbf16> to vector<16x128xbf16>
    %94 = vector.extract_strided_slice %65 {offsets = [0, 0], sizes = [16, 128], strides = [1, 1]} : vector<32x128xbf16> to vector<16x128xbf16>
    %95 = vector.extract_strided_slice %83 {offsets = [0, 0], sizes = [16, 128], strides = [1, 1]} : vector<32x128xbf16> to vector<16x128xbf16>
    %cst_29 = arith.constant dense<0.000000e+00> : vector<16x16xf32>
    %96 = tpu.matmul %93, %94, %cst_29 {dimension_numbers = #tpu.dot_dimension_numbers<[1], [1], [0], [0], [0, 0, 1, 0], [], []>} : vector<16x128xbf16>, vector<16x128xbf16>, vector<16x16xf32> -> vector<16x16xf32>
    %cst_30 = arith.constant 0.0883883461 : f32
    %97 = vector.broadcast %cst_30 : f32 to vector<16x16xf32>
    %98 = arith.mulf %96, %97 : vector<16x16xf32>
    %cst_31 = arith.constant dense<0xFF800000> : vector<16xf32>
    %99 = vector.multi_reduction <maximumf>, %98, %cst_31 [1] : vector<16x16xf32> to vector<16xf32>
    %100 = vector.shape_cast %99 : vector<16xf32> to vector<16x1xf32>
    %101 = vector.broadcast %100 : vector<16x1xf32> to vector<16x16xf32>
    %102 = arith.subf %98, %101 : vector<16x16xf32>
    %103 = math.exp %102 : vector<16x16xf32>
    %cst_32 = arith.constant dense<0.000000e+00> : vector<16xf32>
    %104 = vector.multi_reduction <add>, %103, %cst_32 [1] : vector<16x16xf32> to vector<16xf32>
    %105 = vector.shape_cast %104 : vector<16xf32> to vector<16x1xf32>
    %106 = tpu.reciprocal %105 {approx = true} : vector<16x1xf32> -> vector<16x1xf32>
    %107 = vector.broadcast %106 : vector<16x1xf32> to vector<16x16xf32>
    %108 = arith.mulf %103, %107 : vector<16x16xf32>
    %109 = arith.truncf %108 : vector<16x16xf32> to vector<16x16xbf16>
    %cst_33 = arith.constant dense<0.000000e+00> : vector<16x128xf32>
    %110 = tpu.matmul %109, %95, %cst_33 {dimension_numbers = #tpu.dot_dimension_numbers<[1], [0], [0], [1], [0, 0, 1, 1], [], []>} : vector<16x16xbf16>, vector<16x128xbf16>, vector<16x128xf32> -> vector<16x128xf32>
    %111 = vector.extract_strided_slice %56 {offsets = [0, 0], sizes = [16, 128], strides = [1, 1]} : vector<32x128xbf16> to vector<16x128xbf16>
    %112 = vector.extract_strided_slice %74 {offsets = [0, 0], sizes = [16, 128], strides = [1, 1]} : vector<32x128xbf16> to vector<16x128xbf16>
    %113 = vector.extract_strided_slice %92 {offsets = [0, 0], sizes = [16, 128], strides = [1, 1]} : vector<32x128xbf16> to vector<16x128xbf16>
    %cst_34 = arith.constant dense<0.000000e+00> : vector<16x16xf32>
    %114 = tpu.matmul %111, %112, %cst_34 {dimension_numbers = #tpu.dot_dimension_numbers<[1], [1], [0], [0], [0, 0, 1, 0], [], []>} : vector<16x128xbf16>, vector<16x128xbf16>, vector<16x16xf32> -> vector<16x16xf32>
    %cst_35 = arith.constant 0.0883883461 : f32
    %115 = vector.broadcast %cst_35 : f32 to vector<16x16xf32>
    %116 = arith.mulf %114, %115 : vector<16x16xf32>
    %cst_36 = arith.constant dense<0xFF800000> : vector<16xf32>
    %117 = vector.multi_reduction <maximumf>, %116, %cst_36 [1] : vector<16x16xf32> to vector<16xf32>
    %118 = vector.shape_cast %117 : vector<16xf32> to vector<16x1xf32>
    %119 = vector.broadcast %118 : vector<16x1xf32> to vector<16x16xf32>
    %120 = arith.subf %116, %119 : vector<16x16xf32>
    %121 = math.exp %120 : vector<16x16xf32>
    %cst_37 = arith.constant dense<0.000000e+00> : vector<16xf32>
    %122 = vector.multi_reduction <add>, %121, %cst_37 [1] : vector<16x16xf32> to vector<16xf32>
    %123 = vector.shape_cast %122 : vector<16xf32> to vector<16x1xf32>
    %124 = tpu.reciprocal %123 {approx = true} : vector<16x1xf32> -> vector<16x1xf32>
    %125 = vector.broadcast %124 : vector<16x1xf32> to vector<16x16xf32>
    %126 = arith.mulf %121, %125 : vector<16x16xf32>
    %127 = arith.truncf %126 : vector<16x16xf32> to vector<16x16xbf16>
    %cst_38 = arith.constant dense<0.000000e+00> : vector<16x128xf32>
    %128 = tpu.matmul %127, %113, %cst_38 {dimension_numbers = #tpu.dot_dimension_numbers<[1], [0], [0], [1], [0, 0, 1, 1], [], []>} : vector<16x16xbf16>, vector<16x128xbf16>, vector<16x128xf32> -> vector<16x128xf32>
    %129 = tpu.concatenate %110, %128 in 1 : vector<16x128xf32>, vector<16x128xf32> -> vector<16x256xf32>
    %130 = vector.extract_strided_slice %47 {offsets = [16, 0], sizes = [16, 128], strides = [1, 1]} : vector<32x128xbf16> to vector<16x128xbf16>
    %131 = vector.extract_strided_slice %65 {offsets = [16, 0], sizes = [16, 128], strides = [1, 1]} : vector<32x128xbf16> to vector<16x128xbf16>
    %132 = vector.extract_strided_slice %83 {offsets = [16, 0], sizes = [16, 128], strides = [1, 1]} : vector<32x128xbf16> to vector<16x128xbf16>
    %cst_39 = arith.constant dense<0.000000e+00> : vector<16x16xf32>
    %133 = tpu.matmul %130, %131, %cst_39 {dimension_numbers = #tpu.dot_dimension_numbers<[1], [1], [0], [0], [0, 0, 1, 0], [], []>} : vector<16x128xbf16>, vector<16x128xbf16>, vector<16x16xf32> -> vector<16x16xf32>
    %cst_40 = arith.constant 0.0883883461 : f32
    %134 = vector.broadcast %cst_40 : f32 to vector<16x16xf32>
    %135 = arith.mulf %133, %134 : vector<16x16xf32>
    %cst_41 = arith.constant dense<0xFF800000> : vector<16xf32>
    %136 = vector.multi_reduction <maximumf>, %135, %cst_41 [1] : vector<16x16xf32> to vector<16xf32>
    %137 = vector.shape_cast %136 : vector<16xf32> to vector<16x1xf32>
    %138 = vector.broadcast %137 : vector<16x1xf32> to vector<16x16xf32>
    %139 = arith.subf %135, %138 : vector<16x16xf32>
    %140 = math.exp %139 : vector<16x16xf32>
    %cst_42 = arith.constant dense<0.000000e+00> : vector<16xf32>
    %141 = vector.multi_reduction <add>, %140, %cst_42 [1] : vector<16x16xf32> to vector<16xf32>
    %142 = vector.shape_cast %141 : vector<16xf32> to vector<16x1xf32>
    %143 = tpu.reciprocal %142 {approx = true} : vector<16x1xf32> -> vector<16x1xf32>
    %144 = vector.broadcast %143 : vector<16x1xf32> to vector<16x16xf32>
    %145 = arith.mulf %140, %144 : vector<16x16xf32>
    %146 = arith.truncf %145 : vector<16x16xf32> to vector<16x16xbf16>
    %cst_43 = arith.constant dense<0.000000e+00> : vector<16x128xf32>
    %147 = tpu.matmul %146, %132, %cst_43 {dimension_numbers = #tpu.dot_dimension_numbers<[1], [0], [0], [1], [0, 0, 1, 1], [], []>} : vector<16x16xbf16>, vector<16x128xbf16>, vector<16x128xf32> -> vector<16x128xf32>
    %148 = vector.extract_strided_slice %56 {offsets = [16, 0], sizes = [16, 128], strides = [1, 1]} : vector<32x128xbf16> to vector<16x128xbf16>
    %149 = vector.extract_strided_slice %74 {offsets = [16, 0], sizes = [16, 128], strides = [1, 1]} : vector<32x128xbf16> to vector<16x128xbf16>
    %150 = vector.extract_strided_slice %92 {offsets = [16, 0], sizes = [16, 128], strides = [1, 1]} : vector<32x128xbf16> to vector<16x128xbf16>
    %cst_44 = arith.constant dense<0.000000e+00> : vector<16x16xf32>
    %151 = tpu.matmul %148, %149, %cst_44 {dimension_numbers = #tpu.dot_dimension_numbers<[1], [1], [0], [0], [0, 0, 1, 0], [], []>} : vector<16x128xbf16>, vector<16x128xbf16>, vector<16x16xf32> -> vector<16x16xf32>
    %cst_45 = arith.constant 0.0883883461 : f32
    %152 = vector.broadcast %cst_45 : f32 to vector<16x16xf32>
    %153 = arith.mulf %151, %152 : vector<16x16xf32>
    %cst_46 = arith.constant dense<0xFF800000> : vector<16xf32>
    %154 = vector.multi_reduction <maximumf>, %153, %cst_46 [1] : vector<16x16xf32> to vector<16xf32>
    %155 = vector.shape_cast %154 : vector<16xf32> to vector<16x1xf32>
    %156 = vector.broadcast %155 : vector<16x1xf32> to vector<16x16xf32>
    %157 = arith.subf %153, %156 : vector<16x16xf32>
    %158 = math.exp %157 : vector<16x16xf32>
    %cst_47 = arith.constant dense<0.000000e+00> : vector<16xf32>
    %159 = vector.multi_reduction <add>, %158, %cst_47 [1] : vector<16x16xf32> to vector<16xf32>
    %160 = vector.shape_cast %159 : vector<16xf32> to vector<16x1xf32>
    %161 = tpu.reciprocal %160 {approx = true} : vector<16x1xf32> -> vector<16x1xf32>
    %162 = vector.broadcast %161 : vector<16x1xf32> to vector<16x16xf32>
    %163 = arith.mulf %158, %162 : vector<16x16xf32>
    %164 = arith.truncf %163 : vector<16x16xf32> to vector<16x16xbf16>
    %cst_48 = arith.constant dense<0.000000e+00> : vector<16x128xf32>
    %165 = tpu.matmul %164, %150, %cst_48 {dimension_numbers = #tpu.dot_dimension_numbers<[1], [0], [0], [1], [0, 0, 1, 1], [], []>} : vector<16x16xbf16>, vector<16x128xbf16>, vector<16x128xf32> -> vector<16x128xf32>
    %166 = tpu.concatenate %147, %165 in 1 : vector<16x128xf32>, vector<16x128xf32> -> vector<16x256xf32>
    %167 = tpu.concatenate %129, %166 in 0 : vector<16x256xf32>, vector<16x256xf32> -> vector<32x256xf32>
    %c0_49 = arith.constant 0 : index
    %c0_50 = arith.constant 0 : index
    %168 = vector.load %arg7[%c0_49, %c0_50] : memref<256x256xbf16, #tpu.memory_space<vmem>>, vector<256x256xbf16>
    %169 = arith.truncf %167 : vector<32x256xf32> to vector<32x256xbf16>
    %cst_51 = arith.constant dense<0.000000e+00> : vector<32x256xf32>
    %170 = tpu.matmul %169, %168, %cst_51 {dimension_numbers = #tpu.dot_dimension_numbers<[1], [0], [0], [1], [0, 0, 1, 1], [], []>} : vector<32x256xbf16>, vector<256x256xbf16>, vector<32x256xf32> -> vector<32x256xf32>
    %171 = arith.mulf %4, %170 : vector<32x256xf32>
    %172 = arith.addf %0, %171 : vector<32x256xf32>
    %c0_52 = arith.constant 0 : index
    %c0_53 = arith.constant 0 : index
    %173 = vector.load %arg8[%c0_52, %c0_53] : memref<1x256xf32, #tpu.memory_space<vmem>>, vector<1x256xf32>
    %cst_54 = arith.constant dense<0.000000e+00> : vector<32xf32>
    %174 = vector.multi_reduction <add>, %172, %cst_54 [1] : vector<32x256xf32> to vector<32xf32>
    %175 = vector.shape_cast %174 : vector<32xf32> to vector<32x1xf32>
    %cst_55 = arith.constant 2.560000e+02 : f32
    %176 = vector.broadcast %cst_55 : f32 to vector<32x1xf32>
    %177 = arith.divf %175, %176 : vector<32x1xf32>
    %178 = arith.mulf %172, %172 : vector<32x256xf32>
    %cst_56 = arith.constant dense<0.000000e+00> : vector<32xf32>
    %179 = vector.multi_reduction <add>, %178, %cst_56 [1] : vector<32x256xf32> to vector<32xf32>
    %180 = vector.shape_cast %179 : vector<32xf32> to vector<32x1xf32>
    %cst_57 = arith.constant 2.560000e+02 : f32
    %181 = vector.broadcast %cst_57 : f32 to vector<32x1xf32>
    %182 = arith.divf %180, %181 : vector<32x1xf32>
    %183 = arith.mulf %177, %177 : vector<32x1xf32>
    %184 = arith.subf %182, %183 : vector<32x1xf32>
    %185 = vector.broadcast %177 : vector<32x1xf32> to vector<32x256xf32>
    %186 = arith.subf %172, %185 : vector<32x256xf32>
    %cst_58 = arith.constant 9.99999974E-6 : f32
    %187 = vector.broadcast %cst_58 : f32 to vector<32x1xf32>
    %188 = arith.addf %184, %187 : vector<32x1xf32>
    %189 = math.rsqrt %188 : vector<32x1xf32>
    %190 = vector.broadcast %189 : vector<32x1xf32> to vector<32x256xf32>
    %191 = arith.mulf %186, %190 : vector<32x256xf32>
    %192 = vector.broadcast %173 : vector<1x256xf32> to vector<32x256xf32>
    %193 = arith.mulf %191, %192 : vector<32x256xf32>
    %cst_59 = arith.constant 1.000000e+00 : f32
    %194 = vector.broadcast %cst_59 : f32 to vector<32x256xf32>
    %195 = arith.addf %194, %6 : vector<32x256xf32>
    %196 = arith.mulf %193, %195 : vector<32x256xf32>
    %197 = arith.addf %196, %5 : vector<32x256xf32>
    %c0_60 = arith.constant 0 : index
    %c0_61 = arith.constant 0 : index
    %198 = vector.load %arg9[%c0_60, %c0_61] : memref<256x1024xbf16, #tpu.memory_space<vmem>>, vector<256x1024xbf16>
    %199 = arith.truncf %197 : vector<32x256xf32> to vector<32x256xbf16>
    %cst_62 = arith.constant dense<0.000000e+00> : vector<32x1024xf32>
    %200 = tpu.matmul %199, %198, %cst_62 {dimension_numbers = #tpu.dot_dimension_numbers<[1], [0], [0], [1], [0, 0, 1, 1], [], []>} : vector<32x256xbf16>, vector<256x1024xbf16>, vector<32x1024xf32> -> vector<32x1024xf32>
    %c0_63 = arith.constant 0 : index
    %c0_64 = arith.constant 0 : index
    %201 = vector.load %arg10[%c0_63, %c0_64] : memref<1x1024xf32, #tpu.memory_space<vmem>>, vector<1x1024xf32>
    %202 = vector.broadcast %201 : vector<1x1024xf32> to vector<32x1024xf32>
    %203 = arith.addf %200, %202 : vector<32x1024xf32>
    %cst_65 = arith.constant 5.000000e-01 : f32
    %204 = vector.broadcast %cst_65 : f32 to vector<32x1024xf32>
    %205 = arith.mulf %204, %203 : vector<32x1024xf32>
    %cst_66 = arith.constant 4.471500e-02 : f32
    %206 = vector.broadcast %cst_66 : f32 to vector<32x1024xf32>
    %207 = arith.mulf %206, %203 : vector<32x1024xf32>
    %208 = arith.mulf %207, %203 : vector<32x1024xf32>
    %209 = arith.mulf %208, %203 : vector<32x1024xf32>
    %210 = arith.addf %203, %209 : vector<32x1024xf32>
    %cst_67 = arith.constant 0.797884583 : f32
    %211 = vector.broadcast %cst_67 : f32 to vector<32x1024xf32>
    %212 = arith.mulf %211, %210 : vector<32x1024xf32>
    %213 = math.tanh %212 : vector<32x1024xf32>
    %cst_68 = arith.constant 1.000000e+00 : f32
    %214 = vector.broadcast %cst_68 : f32 to vector<32x1024xf32>
    %215 = arith.addf %214, %213 : vector<32x1024xf32>
    %216 = arith.mulf %205, %215 : vector<32x1024xf32>
    %c0_69 = arith.constant 0 : index
    %c0_70 = arith.constant 0 : index
    %217 = vector.load %arg11[%c0_69, %c0_70] : memref<1024x256xbf16, #tpu.memory_space<vmem>>, vector<1024x256xbf16>
    %218 = arith.truncf %216 : vector<32x1024xf32> to vector<32x1024xbf16>
    %cst_71 = arith.constant dense<0.000000e+00> : vector<32x256xf32>
    %219 = tpu.matmul %218, %217, %cst_71 {dimension_numbers = #tpu.dot_dimension_numbers<[1], [0], [0], [1], [0, 0, 1, 1], [], []>} : vector<32x1024xbf16>, vector<1024x256xbf16>, vector<32x256xf32> -> vector<32x256xf32>
    %c0_72 = arith.constant 0 : index
    %c0_73 = arith.constant 0 : index
    %220 = vector.load %arg12[%c0_72, %c0_73] : memref<1x256xf32, #tpu.memory_space<vmem>>, vector<1x256xf32>
    %221 = vector.broadcast %220 : vector<1x256xf32> to vector<32x256xf32>
    %222 = arith.addf %219, %221 : vector<32x256xf32>
    %223 = arith.mulf %7, %222 : vector<32x256xf32>
    %224 = arith.addf %172, %223 : vector<32x256xf32>
    %c0_74 = arith.constant 0 : index
    %c0_75 = arith.constant 0 : index
    %225 = vector.load %arg13[%c0_74, %c0_75] : memref<32x256xf32, #tpu.memory_space<vmem>>, vector<32x256xf32>
    tpu.vector_store %arg13[%c0_74, %c0_75], %224 {strides = array<i32>} : memref<32x256xf32, #tpu.memory_space<vmem>>, vector<32x256xf32>,
    return
  }
}

</mosaic_0001>

<bundles_post_ra>
// kernel: ddit_block.1
= control target key start
LH: loop header
LB: loop body
LE: loop exit
PB: predicated region body
PF: predicated region fallthrough
CT: control target
= control target key end

     0   :  { %18 = vsyncpa [#allocation3], 0  ;;  %s9521_s0 = inlined_call_operand.vmem [shape: f32[32,1536], index: 0, kind: input, shape index: {}]   ;;  %s9522_s1 = inlined_call_operand.vmem [shape: f32[32,256], index: 1, kind: input, shape index: {}]   ;;  %s9523_s2 = inlined_call_operand.vmem [shape: f32[32,128], index: 2, kind: input, shape index: {}]   ;;  %s9524_s3 = inlined_call_operand.vmem [shape: f32[32,128], index: 3, kind: input, shape index: {}]   ;;  %s9525_s4 = inlined_call_operand.vmem [shape: f32[32,128], index: 4, kind: input, shape index: {}]   ;;  %s9526_s5 = inlined_call_operand.vmem [shape: f32[1,256], index: 5, kind: input, shape index: {}]   ;;  %s9527_s6 = inlined_call_operand.vmem [shape: bf16[256,768], index: 6, kind: input, shape index: {}]   ;;  %s9528_s7 = inlined_call_operand.hbm [shape: bf16[256,256], index: 7, kind: input, shape index: {}]   ;;  %s9529_s8 = inlined_call_operand.vmem [shape: f32[1,256], index: 8, kind: input, shape index: {}]   ;;  %s9530_s9 = inlined_call_operand.vmem [shape: bf16[256,1024], index: 9, kind: input, shape index: {}]   ;;  %s9531_s10 = inlined_call_operand.vmem [shape: f32[1,1024], index: 10, kind: input, shape index: {}]   ;;  %s9532_s11 = inlined_call_operand.hbm [shape: bf16[1024,256], index: 11, kind: input, shape index: {}]   ;;  %s9533_s12 = inlined_call_operand.vmem [shape: f32[1,256], index: 12, kind: input, shape index: {}]   ;;  %s9534_s13 = inlined_call_operand.hbm [shape: f32[32,256], index: 13, kind: output, shape index: {}]  }
   0x1   :  { %19 = vsyncpa [#allocation6], 0 }
   0x2   :  { %20 = vsyncpa [#allocation4], 0  ;;  %s39_s27 = sshll.u32 %s9528_s7, 4  ;;  %s6733_s28 = smov [#allocation2]   ;;  %s40_s27 = int_to_ptr.hbm [resolvable:$true] %s39_s27 }
   0x3   :  { %s41_s29 = sshll.u32 %s6733_s28, 4  ;;  %s58_s15 = sshll.u32 %s9532_s11, 4  ;;  %s42_s29 = int_to_ptr.vmem [resolvable:$true] %s41_s29  ;;  %s59_s15 = int_to_ptr.hbm [resolvable:$true] %s58_s15 }
   0x4   :  { %s6734_s16 = smov 128   ;;  %s6735_s17 = smov 8  }
   0x5   :  { %47 = dma.hbm_to_vmem [thread:$0]  %s40_s27, 4096, %s42_s29, [#allocation3], %s6734_s16, %s6734_s16, %s6735_s17  }
   0x6   :  { %s6736_s18 = smov [#allocation5]  }
   0x7   :  { %s60_s19 = sshll.u32 %s6736_s18, 4  ;;  %s61_s19 = int_to_ptr.vmem [resolvable:$true] %s60_s19 }
   0x8   :  { %66 = dma.hbm_to_vmem [thread:$0]  %s59_s15, 16384, %s61_s19, [#allocation6], %s6734_s16, %s6734_s16, %s6735_s17  }
   0x9   :  { %6727 = dma.done.wait [#allocation3], 4096  }
   0xa   :  { %6728 = vsyncadd [#allocation3], 4294963200 }
   0xb   :  { %6729 = dma.done.wait [#allocation6], 16384  }
   0xc   :  { %6730 = vsyncadd [#allocation6], 4294950912  ;;  %v6822_v0 = vld [vmem:[%s9522_s1] sm:$0xff]  ;;  %v6827_v1 = vld [vmem:[%s9522_s1 + $0x8] sm:$0xff]  ;;  %v6737_v24 = vmov 256.0   ;;  %s6739_s21 = smov 96  }
   0xd   :  { %v6832_v2 = vld [vmem:[%s9522_s1 + $0x20] sm:$0xff]  ;;  %v147_v3 = vadd.f32 %v6827_v1, %v6822_v0  ;;  %v170_v4 = vmul.f32 %v6822_v0, %v6822_v0  ;;  %v171_v5 = vmul.f32 %v6827_v1, %v6827_v1  ;;  %v6843_v6 = vld [vmem:[%s9522_s1 + $0x28] sm:$0xff]  ;;  %v6850_v8 = vld [vmem:[%s9522_s1 + $0x10] sm:$0xff]  ;;  %6532 = vrcp.f32 %v6737_v24  ;;  %s6740_s27 = smov [#allocation7]   ;;  %s4584_s14 = sshll.u32 %s9534_s13, 4  ;;  %s4585_s14 = int_to_ptr.hbm [resolvable:$true] %s4584_s14 }
   0xe   :  { %v153_v7 = vadd.f32 %v6843_v6, %v6832_v2  ;;  %v6855_v9 = vld [vmem:[%s9522_s1 + $0x18] sm:$0xff]  ;;  %v172_v11 = vmul.f32 %v6850_v8, %v6850_v8  ;;  %v6864_v13 = vld [vmem:[%s9522_s1 + $0x30] sm:$0xff]  ;;  %v174_v18 = vmul.f32 %v6832_v2, %v6832_v2  ;;  %v175_v19 = vmul.f32 %v6843_v6, %v6843_v6  ;;  %v6183_v27 = vld [vmem:[%s9527_s6 + $0x164] sm:$0xf0]  ;;  %s4582_s28 = sshll.u32 %s6740_s27, 4  ;;  %s4583_s28 = int_to_ptr.vmem [resolvable:$true] %s4582_s28 }
   0xf   :  { %148 = vadd.xlane.f32.xlu0 %v147_v3  ;;  %v178_v10 = vadd.f32 %v171_v5, %v170_v4  ;;  %v173_v12 = vmul.f32 %v6855_v9, %v6855_v9  ;;  %v6869_v14 = vld [vmem:[%s9522_s1 + $0x38] sm:$0xff]  ;;  %v150_v15 = vadd.f32 %v6855_v9, %v6850_v8  ;;  %v176_v20 = vmul.f32 %v6864_v13, %v6864_v13  ;;  %v4768_v26 = vld [vmem:[%s9527_s6 + $0x150] sm:$0xf]  ;;  %v6231_v30 = vld [vmem:[%s9527_s6 + $0x2e4] sm:$0xf0] }
  0x10   :  { %154 = vadd.xlane.f32.xlu2 %v153_v7  ;;  %v156_v16 = vadd.f32 %v6869_v14, %v6864_v13  ;;  %v177_v21 = vmul.f32 %v6869_v14, %v6869_v14  ;;  %v184_v22 = vadd.f32 %v175_v19, %v174_v18  ;;  %v4960_v28 = vld [vmem:[%s9527_s6 + $0x2d0] sm:$0xf]  ;;  %v4769_v29 = vor.u32 %v6183_v27, %v4768_v26  ;;  %v6180_v31 = vld [vmem:[%s9527_s6 + $0x154] sm:$0xf]  ;;  %v4770_v32 = vld [vmem:[%s9527_s6 + $0x168] sm:$0xf0] }
  0x11   :  { %179 = vadd.xlane.f32.xlu1 %v178_v10  ;;  %v181_v17 = vadd.f32 %v173_v12, %v172_v11  ;;  %v4961_v33 = vor.u32 %v6231_v30, %v4960_v28  ;;  %v4773_v34 = vor.u32 %v6180_v31, %v4770_v32  ;;  %v6228_v35 = vld [vmem:[%s9527_s6 + $0x2d4] sm:$0xf]  ;;  %v4962_v36 = vld [vmem:[%s9527_s6 + $0x2e8] sm:$0xf0]  ;;  %v4744_v39 = vld [vmem:[%s9527_s6 + $0x120] sm:$0xf] }
  0x12   :  { %v187_v23 = vadd.f32 %v177_v21, %v176_v20  ;;  %879 = vmatpush.bf16.msra.mxu0 %v4769_v29  ;;  %v4965_v38 = vor.u32 %v6228_v35, %v4962_v36  ;;  %v6177_v40 = vld [vmem:[%s9527_s6 + $0x134] sm:$0xf0]  ;;  %v4936_v41 = vld [vmem:[%s9527_s6 + $0x2a0] sm:$0xf]  ;;  %v6174_v44 = vld [vmem:[%s9527_s6 + $0x124] sm:$0xf] }
  0x13   :  { %v6883_v25 = vpop.eup %6532  ;;  %898 = vmatpush.bf16.msra.mxu1 %v4961_v33  ;;  %917 = vmatpush.bf16.msra.mxu2 %v4773_v34  ;;  %v4745_v42 = vor.u32 %v6177_v40, %v4744_v39  ;;  %v6225_v43 = vld [vmem:[%s9527_s6 + $0x2b4] sm:$0xf0]  ;;  %v4746_v45 = vld [vmem:[%s9527_s6 + $0x138] sm:$0xf0]  ;;  %v6222_v48 = vld [vmem:[%s9527_s6 + $0x2a4] sm:$0xf] }
  0x14   :  { %v160_v37 = vmul.f32 256.0, %v6883_v25  ;;  %936 = vmatpush.bf16.msra.mxu3 %v4965_v38  ;;  %v4937_v46 = vor.u32 %v6225_v43, %v4936_v41  ;;  %v4749_v47 = vor.u32 %v6174_v44, %v4746_v45  ;;  %v4938_v49 = vld [vmem:[%s9527_s6 + $0x2b8] sm:$0xf0]  ;;  %v4720_v52 = vld [vmem:[%s9527_s6 + $0xf0] sm:$0xf]  ;;  %vm164_vm0 = vweird.f32 %v6883_v25 }
  0x15   :  { %v4941_v51 = vor.u32 %v6222_v48, %v4938_v49  ;;  %v6171_v53 = vld [vmem:[%s9527_s6 + $0x104] sm:$0xf0]  ;;  %v4912_v54 = vld [vmem:[%s9527_s6 + $0x270] sm:$0xf]  ;;  %v6168_v57 = vld [vmem:[%s9527_s6 + $0xf4] sm:$0xf] }
  0x16   :  { %v161_v50 = vsub.f32 1.0, %v160_v37  ;;  %880 = vmatpush.bf16.msra.mxu0 %v4745_v42  ;;  %v4721_v55 = vor.u32 %v6171_v53, %v4720_v52  ;;  %v6219_v56 = vld [vmem:[%s9527_s6 + $0x284] sm:$0xf0]  ;;  %v4722_v58 = vld [vmem:[%s9527_s6 + $0x108] sm:$0xf0]  ;;  %vm1375_vm13 = vcmask 130048  }
  0x17   :  { %151 = vadd.xlane.f32.xlu0 %v150_v15  ;;  %899 = vmatpush.bf16.msra.mxu1 %v4937_v46  ;;  %v4913_v59 = vor.u32 %v6219_v56, %v4912_v54  ;;  %v4725_v60 = vor.u32 %v6168_v57, %v4722_v58  ;;  %v6216_v61 = vld [vmem:[%s9527_s6 + $0x274] sm:$0xf]  ;;  %v4914_v62 = vld [vmem:[%s9527_s6 + $0x288] sm:$0xf0]  ;;  %v4696_v4 = vld [vmem:[%s9527_s6 + $0xc0] sm:$0xf] }
  0x18   :  { %157 = vadd.xlane.f32.xlu2 %v156_v16  ;;  %918 = vmatpush.bf16.msra.mxu2 %v4749_v47  ;;  %v162_v63 = vmul.f32 %v6883_v25, %v161_v50  ;;  %v4917_v3 = vor.u32 %v6216_v61, %v4914_v62  ;;  %v6165_v5 = vld [vmem:[%s9527_s6 + $0xd4] sm:$0xf0]  ;;  %v4888_v7 = vld [vmem:[%s9527_s6 + $0x240] sm:$0xf]  ;;  %v6162_v12 = vld [vmem:[%s9527_s6 + $0xc4] sm:$0xf] }
  0x19   :  { %182 = vadd.xlane.f32.xlu1 %v181_v17  ;;  %937 = vmatpush.bf16.msra.mxu3 %v4941_v51  ;;  %v4697_v10 = vor.u32 %v6165_v5, %v4696_v4  ;;  %v6213_v11 = vld [vmem:[%s9527_s6 + $0x254] sm:$0xf0]  ;;  %v4698_v15 = vld [vmem:[%s9527_s6 + $0xd8] sm:$0xf0]  ;;  %v6210_v18 = vld [vmem:[%s9527_s6 + $0x244] sm:$0xf] }
  0x1a   :  { %881 = vmatpush.bf16.msra.mxu0 %v4721_v55  ;;  %v4889_v16 = vor.u32 %v6213_v11, %v4888_v7  ;;  %v4701_v17 = vor.u32 %v6162_v12, %v4698_v15  ;;  %v4890_v19 = vld [vmem:[%s9527_s6 + $0x258] sm:$0xf0]  ;;  %v163_v20 = vadd.f32 %v6883_v25, %v162_v63  ;;  %v4864_v24 = vld [vmem:[%s9527_s6 + $0x210] sm:$0xf]  ;;  %v6207_v27 = vld [vmem:[%s9527_s6 + $0x224] sm:$0xf0] }
  0x1b   :  { %900 = vmatpush.bf16.msra.mxu1 %v4913_v59  ;;  %v4893_v21 = vor.u32 %v6210_v18, %v4890_v19  ;;  %v6156_v28 = vld [vmem:[%s9527_s6 + $0x94] sm:$0xf]  ;;  %v4674_v29 = vld [vmem:[%s9527_s6 + $0xa8] sm:$0xf0]  ;;  %v4865_v30 = vor.u32 %v6207_v27, %v4864_v24  ;;  %v4648_v36 = vld [vmem:[%s9527_s6 + $0x60] sm:$0xf] }
  0x1c   :  { %919 = vmatpush.bf16.msra.mxu2 %v4725_v60  ;;  %v4677_v31 = vor.u32 %v6156_v28, %v4674_v29  ;;  %v6204_v32 = vld [vmem:[%s9527_s6 + $0x214] sm:$0xf]  ;;  %v4866_v33 = vld [vmem:[%s9527_s6 + $0x228] sm:$0xf0]  ;;  %v7010_v34 = vsel %vm164_vm0, %v6883_v25, %v163_v20  ;;  %v6153_v37 = vld [vmem:[%s9527_s6 + $0x74] sm:$0xf0] }
  0x1d   :  { %938 = vmatpush.bf16.msra.mxu3 %v4917_v3  ;;  %v4869_v35 = vor.u32 %v6204_v32, %v4866_v33  ;;  %v4840_v38 = vld [vmem:[%s9527_s6 + $0x1e0] sm:$0xf]  ;;  %v4649_v25 = vor.u32 %v6153_v37, %v4648_v36  ;;  %v6201_v40 = vld [vmem:[%s9527_s6 + $0x1f4] sm:$0xf0]  ;;  %v6150_v41 = vld [vmem:[%s9527_s6 + $0x64] sm:$0xf] }
  0x1e   :  { %882 = vmatpush.bf16.msra.mxu0 %v4697_v10  ;;  %v4650_v42 = vld [vmem:[%s9527_s6 + $0x78] sm:$0xf0]  ;;  %v4841_v45 = vor.u32 %v6201_v40, %v4840_v38  ;;  %v6198_v48 = vld [vmem:[%s9527_s6 + $0x1e4] sm:$0xf]  ;;  %v4624_v52 = vld [vmem:[%s9527_s6 + $0x30] sm:$0xf] }
  0x1f   :  { %185 = vadd.xlane.f32.xlu0 %v184_v22  ;;  %901 = vmatpush.bf16.msra.mxu1 %v4889_v16  ;;  %v4672_v22 = vld [vmem:[%s9527_s6 + $0x90] sm:$0xf]  ;;  %v4653_v46 = vor.u32 %v6150_v41, %v4650_v42  ;;  %v4842_v49 = vld [vmem:[%s9527_s6 + $0x1f8] sm:$0xf0]  ;;  %v6147_v53 = vld [vmem:[%s9527_s6 + $0x44] sm:$0xf0] }
  0x20   :  { %920 = vmatpush.bf16.msra.mxu2 %v4701_v17  ;;  %v4816_v54 = vld [vmem:[%s9527_s6 + $0x1b0] sm:$0xf]  ;;  %v6195_v55 = vld [vmem:[%s9527_s6 + $0x1c4] sm:$0xf0]  ;;  %v6144_v56 = vld [vmem:[%s9527_s6 + $0x34] sm:$0xf]  ;;  %v4845_v58 = vor.u32 %v6198_v48, %v4842_v49  ;;  %v4625_v59 = vor.u32 %v6147_v53, %v4624_v52 }
  0x21   :  { %188 = vadd.xlane.f32.xlu1 %v187_v23  ;;  %v6159_v23 = vld [vmem:[%s9527_s6 + $0xa4] sm:$0xf0]  ;;  %939 = vmatpush.bf16.msra.mxu3 %v4893_v21  ;;  %v4817_v60 = vor.u32 %v6195_v55, %v4816_v54  ;;  %v4626_v61 = vld [vmem:[%s9527_s6 + $0x48] sm:$0xf0]  ;;  %v6192_v62 = vld [vmem:[%s9527_s6 + $0x1b4] sm:$0xf] }
  0x22   :  { %v4673_v26 = vor.u32 %v6159_v23, %v4672_v22  ;;  %v4818_v63 = vld [vmem:[%s9527_s6 + $0x1c8] sm:$0xf0]  ;;  %v4629_v3 = vor.u32 %v6144_v56, %v4626_v61  ;;  %v4600_v7 = vld [vmem:[%s9527_s6] sm:$0xf]  ;;  %v6141_v10 = vld [vmem:[%s9527_s6 + $0x14] sm:$0xf0] }
  0x23   :  { %902 = vmatpush.bf16.msra.mxu1 %v4865_v30  ;;  %v4821_v5 = vor.u32 %v6192_v62, %v4818_v63  ;;  %v4601_v12 = vor.u32 %v6141_v10, %v4600_v7  ;;  %v4792_v15 = vld [vmem:[%s9527_s6 + $0x180] sm:$0xf]  ;;  %v6189_v16 = vld [vmem:[%s9527_s6 + $0x194] sm:$0xf0]  ;;  %v6138_v21 = vld [vmem:[%s9527_s6 + $0x4] sm:$0xf] }
  0x24   :  { %883 = vmatpush.bf16.msra.mxu0 %v4673_v26  ;;  %921 = vmatpush.bf16.msra.mxu2 %v4677_v31  ;;  %v4793_v18 = vor.u32 %v6189_v16, %v4792_v15  ;;  %v4602_v22 = vld [vmem:[%s9527_s6 + $0x18] sm:$0xf0]  ;;  %v6186_v27 = vld [vmem:[%s9527_s6 + $0x184] sm:$0xf]  ;;  %v88_v29 = vld [vmem:[%s9521_s0 + $0x10] sm:$0xff] }
  0x25   :  { %940 = vmatpush.bf16.msra.mxu3 %v4869_v35  ;;  %v4794_v28 = vld [vmem:[%s9527_s6 + $0x198] sm:$0xf0]  ;;  %v4605_v32 = vor.u32 %v6138_v21, %v4602_v22  ;;  %v4776_v35 = vld [vmem:[%s9527_s6 + $0x158] sm:$0xf]  ;;  %v6184_v36 = vld [vmem:[%s9527_s6 + $0x16c] sm:$0xf0] }
  0x26   :  { %v4797_v33 = vor.u32 %v6186_v27, %v4794_v28  ;;  %v4968_v37 = vld [vmem:[%s9527_s6 + $0x2d8] sm:$0xf]  ;;  %v4777_v41 = vor.u32 %v6184_v36, %v4776_v35  ;;  %v6232_v42 = vld [vmem:[%s9527_s6 + $0x2ec] sm:$0xf0]  ;;  %v4778_v48 = vld [vmem:[%s9527_s6 + $0x170] sm:$0xf0] }
  0x27   :  { %903 = vmatpush.bf16.msra.mxu1 %v4841_v45  ;;  %v6229_v49 = vld [vmem:[%s9527_s6 + $0x2dc] sm:$0xf]  ;;  %v4970_v54 = vld [vmem:[%s9527_s6 + $0x2f0] sm:$0xf0]  ;;  %v4752_v55 = vld [vmem:[%s9527_s6 + $0x128] sm:$0xf] }
  0x28   :  { %884 = vmatpush.bf16.msra.mxu0 %v4649_v25  ;;  %922 = vmatpush.bf16.msra.mxu2 %v4653_v46  ;;  %v4969_v46 = vor.u32 %v6232_v42, %v4968_v37  ;;  %v6226_v61 = vld [vmem:[%s9527_s6 + $0x2bc] sm:$0xf0]  ;;  %v6175_v7 = vld [vmem:[%s9527_s6 + $0x12c] sm:$0xf]  ;;  %v4754_v10 = vld [vmem:[%s9527_s6 + $0x140] sm:$0xf0] }
  0x29   :  { %941 = vmatpush.bf16.msra.mxu3 %v4845_v58  ;;  %v4973_v58 = vor.u32 %v6229_v49, %v4970_v54  ;;  %v4757_v16 = vor.u32 %v6175_v7, %v4754_v10  ;;  %v89_v27 = vld [vmem:[%s9521_s0 + $0x18] sm:$0xff]  ;;  %v100_v36 = vld [vmem:[%s9521_s0 + $0x70] sm:$0xff]  ;;  %v4704_v49 = vld [vmem:[%s9527_s6 + $0xc8] sm:$0xf] }
  0x2a   :  { %v6217_v42 = vld [vmem:[%s9527_s6 + $0x27c] sm:$0xf]  ;;  %v6214_v54 = vld [vmem:[%s9527_s6 + $0x25c] sm:$0xf0] }
  0x2b   :  { %904 = vmatpush.bf16.msra.mxu1 %v4817_v60  ;;  %v4944_v60 = vld [vmem:[%s9527_s6 + $0x2a8] sm:$0xf] }
  0x2c   :  { %885 = vmatpush.bf16.msra.mxu0 %v4625_v59  ;;  %923 = vmatpush.bf16.msra.mxu2 %v4629_v3  ;;  %v6178_v59 = vld [vmem:[%s9527_s6 + $0x13c] sm:$0xf0] }
  0x2d   :  { %942 = vmatpush.bf16.msra.mxu3 %v4821_v5  ;;  %v4753_v3 = vor.u32 %v6178_v59, %v4752_v55  ;;  %v4945_v5 = vor.u32 %v6226_v61, %v4944_v60  ;;  %v6211_v59 = vld [vmem:[%s9527_s6 + $0x24c] sm:$0xf] }
  0x2f   :  { %905 = vmatpush.bf16.msra.mxu1 %v4793_v18  ;;  %v4946_v18 = vld [vmem:[%s9527_s6 + $0x2c0] sm:$0xf0] }
  0x30   :  { %886 = vmatpush.bf16.msra.mxu0 %v4601_v12  ;;  %924 = vmatpush.bf16.msra.mxu2 %v4605_v32  ;;  %v6220_v32 = vld [vmem:[%s9527_s6 + $0x28c] sm:$0xf0] }
  0x31   :  { %943 = vmatpush.bf16.msra.mxu3 %v4797_v33  ;;  %v6169_v33 = vld [vmem:[%s9527_s6 + $0xfc] sm:$0xf] }
  0x33   :  { %974 = vmatpush.bf16.msrb.mxu1 %v4969_v46 }
  0x34   :  { %955 = vmatpush.bf16.msrb.mxu0 %v4777_v41  ;;  %v4730_v41 = vld [vmem:[%s9527_s6 + $0x110] sm:$0xf0] }
  0x35   :  { %1012 = vmatpush.bf16.msrb.mxu3 %v4973_v58  ;;  %v4706_v58 = vld [vmem:[%s9527_s6 + $0xe0] sm:$0xf0] }
  0x37   :  { %975 = vmatpush.bf16.msrb.mxu1 %v4945_v5  ;;  %v7261_v5 = vadd.f32 1.0, %v100_v36  ;;  %v4682_v36 = vld [vmem:[%s9527_s6 + $0xb0] sm:$0xf0] }
  0x38   :  { %956 = vmatpush.bf16.msrb.mxu0 %v4753_v3 }
  0x82   :  { %v149_v39 = vpop.xlane.xlu0 %148 }
  0x83   :  { %v7031_v43 = vmul.f32 %v7010_v34, %v149_v39  ;;  %v155_v44 = vpop.xlane.xlu2 %154  ;;  %v7119_v39 = vadd.f32 1.0, %v88_v29 }
  0x84   :  { %v180_v47 = vpop.xlane.xlu1 %179  ;;  %v7091_v23 = vmul.f32 %v7010_v34, %v155_v44 }
  0x85   :  { %v190_v50 = vmul.f32 %v180_v47, %v7010_v34  ;;  %v194_v51 = vmul.f32 %v7031_v43, %v7031_v43  ;;  %v6181_v47 = vld [vmem:[%s9527_s6 + $0x15c] sm:$0xf]  ;;  %v203_v60 = vsub.f32 %v6827_v1, %v7031_v43 }
  0x86   :  { %v196_v40 = vmul.f32 %v7091_v23, %v7091_v23  ;;  %v4781_v53 = vor.u32 %v6181_v47, %v4778_v48  ;;  %v4733_v47 = vor.u32 %v6169_v33, %v4730_v41  ;;  %v4922_v48 = vld [vmem:[%s9527_s6 + $0x290] sm:$0xf0]  ;;  %v206_v3 = vsub.f32 %v6832_v2, %v7091_v23  ;;  %v6185_v2 = vld [vmem:[%s9527_s6 + $0x174] sm:$0xf0] }
  0x87   :  { %v198_v57 = vsub.f32 %v190_v50, %v194_v51  ;;  %v146_v50 = vld [vmem:[%s9526_s5] sm:$0x3]  ;;  %s6742_s5 = smov 16  }
  0x88   :  { %993 = vmatpush.bf16.msrb.mxu2 %v4781_v53  ;;  %v7172_v12 = vperm.slane %v146_v50, 0  ;;  %v7191_v28 = vperm.slane %v146_v50, 1  ;;  %v202_v50 = vsub.f32 %v6822_v0, %v7031_v43  ;;  %v4896_v53 = vld [vmem:[%s9527_s6 + $0x248] sm:$0xf] }
  0x89   :  { %v7066_v4 = vadd.f32 1e-05, %v198_v57 }
  0x8a   :  { %v152_v11 = vpop.xlane.xlu0 %151 }
  0x8b   :  { %6534 = vrsqrt.f32 %v7066_v4  ;;  %v7082_v17 = vmul.f32 %v7010_v34, %v152_v11  ;;  %v158_v20 = vpop.xlane.xlu2 %157  ;;  %v6223_v11 = vld [vmem:[%s9527_s6 + $0x2ac] sm:$0xf]  ;;  %vm220_vm2 = vweird.f32 %v7066_v4 }
  0x8c   :  { %v183_v19 = vpop.xlane.xlu1 %182  ;;  %v7106_v31 = vmul.f32 %v7010_v34, %v158_v20  ;;  %v4949_v22 = vor.u32 %v6223_v11, %v4946_v18  ;;  %994 = vmatpush.bf16.msrb.mxu2 %v4757_v16 }
  0x8d   :  { %v191_v24 = vmul.f32 %v183_v19, %v7010_v34  ;;  %v195_v26 = vmul.f32 %v7082_v17, %v7082_v17  ;;  %v4728_v19 = vld [vmem:[%s9527_s6 + $0xf8] sm:$0xf]  ;;  %v204_v18 = vsub.f32 %v6850_v8, %v7082_v17  ;;  %v205_v8 = vsub.f32 %v6855_v9, %v7082_v17  ;;  %v6157_v17 = vld [vmem:[%s9527_s6 + $0x9c] sm:$0xf] }
  0x8e   :  { %v197_v52 = vmul.f32 %v7106_v31, %v7106_v31  ;;  %1013 = vmatpush.bf16.msrb.mxu3 %v4949_v22  ;;  %v4680_v22 = vld [vmem:[%s9527_s6 + $0x98] sm:$0xf] }
  0x8f   :  { %v199_v30 = vsub.f32 %v191_v24, %v195_v26  ;;  %v6172_v24 = vld [vmem:[%s9527_s6 + $0x10c] sm:$0xf0]  ;;  %v4920_v26 = vld [vmem:[%s9527_s6 + $0x278] sm:$0xf] }
  0x90   :  { %995 = vmatpush.bf16.msrb.mxu2 %v4733_v47  ;;  %v4656_v47 = vld [vmem:[%s9527_s6 + $0x68] sm:$0xf] }
  0x91   :  { %v7117_v38 = vpop.eup %6534  ;;  %v7121_v25 = vadd.f32 1e-05, %v199_v30  ;;  %v4729_v30 = vor.u32 %v6172_v24, %v4728_v19  ;;  %v6160_v24 = vld [vmem:[%s9527_s6 + $0xac] sm:$0xf0] }
  0x92   :  { %v215_v44 = vmul.f32 %v7117_v38, %v7066_v4  ;;  %v186_v45 = vpop.xlane.xlu0 %185  ;;  %vm221_vm1 = vweird.f32 %v7117_v38  ;;  %v6166_v4 = vld [vmem:[%s9527_s6 + $0xdc] sm:$0xf0] }
  0x93   :  { %6536 = vrsqrt.f32 %v7121_v25  ;;  %v192_v51 = vmul.f32 %v186_v45, %v7010_v34  ;;  %v101_v45 = vld [vmem:[%s9521_s0 + $0x78] sm:$0xff]  ;;  %vm222_vm3 = vmor %vm220_vm2, %vm221_vm1  ;;  %957 = vmatpush.bf16.msrb.mxu0 %v4729_v30  ;;  %vm230_vm5 = vweird.f32 %v7121_v25  ;;  %v6208_v30 = vld [vmem:[%s9527_s6 + $0x22c] sm:$0xf0] }
  0x94   :  { %v216_v56 = vmul.f32 %v7117_v38, %v215_v44  ;;  %v189_v57 = vpop.xlane.xlu1 %188  ;;  %v7268_v16 = vadd.f32 1.0, %v101_v45  ;;  %v4685_v45 = vor.u32 %v6157_v17, %v4682_v36 }
  0x95   :  { %v200_v62 = vsub.f32 %v192_v51, %v196_v40  ;;  %v193_v63 = vmul.f32 %v189_v57, %v7010_v34  ;;  %v4921_v40 = vor.u32 %v6220_v32, %v4920_v26  ;;  %v4925_v51 = vor.u32 %v6217_v42, %v4922_v48  ;;  %v6163_v57 = vld [vmem:[%s9527_s6 + $0xcc] sm:$0xf] }
  0x96   :  { %v217_v15 = vmul.f32 0.5, %v216_v56  ;;  %v4897_v56 = vor.u32 %v6214_v54, %v4896_v53  ;;  %v6151_v54 = vld [vmem:[%s9527_s6 + $0x6c] sm:$0xf] }
  0x97   :  { %v7180_v20 = vadd.f32 1e-05, %v200_v62  ;;  %v201_v21 = vsub.f32 %v193_v63, %v197_v52  ;;  %v4705_v52 = vor.u32 %v6166_v4, %v4704_v49  ;;  %976 = vmatpush.bf16.msrb.mxu1 %v4921_v40  ;;  %v4709_v62 = vor.u32 %v6163_v57, %v4706_v58  ;;  %v4898_v63 = vld [vmem:[%s9527_s6 + $0x260] sm:$0xf0]  ;;  %1014 = vmatpush.bf16.msrb.mxu3 %v4925_v51  ;;  %v6205_v40 = vld [vmem:[%s9527_s6 + $0x21c] sm:$0xf] }
  0x98   :  { %v218_v29 = vsub.f32 1.5, %v217_v15  ;;  %v4901_v10 = vor.u32 %v6211_v59, %v4898_v63  ;;  %v207_v15 = vsub.f32 %v6843_v6, %v7091_v23  ;;  %v99_v57 = vld [vmem:[%s9521_s0 + $0x68] sm:$0xff]  ;;  %v4850_v63 = vld [vmem:[%s9527_s6 + $0x200] sm:$0xf0]  ;;  %v6233_v23 = vld [vmem:[%s9527_s6 + $0x2f4] sm:$0xf0] }
  0x99   :  { %v7200_v35 = vpop.eup %6536  ;;  %6538 = vrsqrt.f32 %v7180_v20  ;;  %v7206_v37 = vadd.f32 1e-05, %v201_v21  ;;  %958 = vmatpush.bf16.msrb.mxu0 %v4705_v52  ;;  %vm240_vm6 = vweird.f32 %v7180_v20  ;;  %996 = vmatpush.bf16.msrb.mxu2 %v4709_v62  ;;  %v6199_v62 = vld [vmem:[%s9527_s6 + $0x1ec] sm:$0xf] }
  0x9a   :  { %v219_v44 = vmul.f32 %v7117_v38, %v218_v29  ;;  %v225_v46 = vmul.f32 %v7200_v35, %v7121_v25  ;;  %vm231_vm4 = vweird.f32 %v7200_v35  ;;  %v4872_v29 = vld [vmem:[%s9527_s6 + $0x218] sm:$0xf]  ;;  %v6154_v25 = vld [vmem:[%s9527_s6 + $0x7c] sm:$0xf0] }
  0x9b   :  { %6540 = vrsqrt.f32 %v7206_v37  ;;  %977 = vmatpush.bf16.msrb.mxu1 %v4897_v56  ;;  %vm250_vm7 = vweird.f32 %v7206_v37  ;;  %1015 = vmatpush.bf16.msrb.mxu3 %v4901_v10  ;;  %vm232_vm8 = vmor %vm230_vm5, %vm231_vm4  ;;  %v4657_v53 = vor.u32 %v6154_v25, %v4656_v47  ;;  %v98_v56 = vld [vmem:[%s9521_s0 + $0x60] sm:$0xff] }
  0x9c   :  { %v223_v55 = vsel %vm222_vm3, %v7117_v38, %v219_v44  ;;  %v226_v0 = vmul.f32 %v7200_v35, %v225_v46  ;;  %v7254_v38 = vadd.f32 1.0, %v89_v27  ;;  %v4681_v27 = vor.u32 %v6160_v24, %v4680_v22  ;;  %v4874_v46 = vld [vmem:[%s9527_s6 + $0x230] sm:$0xf0] }
  0x9d   :  { %v254_v61 = vmul.f32 %v223_v55, %v202_v50  ;;  %v255_v1 = vmul.f32 %v223_v55, %v203_v60  ;;  %v4873_v44 = vor.u32 %v6208_v30, %v4872_v29  ;;  %v4877_v4 = vor.u32 %v6205_v40, %v4874_v46  ;;  %v4848_v50 = vld [vmem:[%s9527_s6 + $0x1e8] sm:$0xf]  ;;  %997 = vmatpush.bf16.msrb.mxu2 %v4685_v45  ;;  %v4658_v55 = vld [vmem:[%s9527_s6 + $0x80] sm:$0xf0]  ;;  %v112_v24 = vld [vmem:[%s9521_s0 + $0xd0] sm:$0xff] }
  0x9e   :  { %v227_v7 = vmul.f32 0.5, %v226_v0  ;;  %959 = vmatpush.bf16.msrb.mxu0 %v4681_v27  ;;  %v86_v0 = vld [vmem:[%s9521_s0] sm:$0xff]  ;;  %v4634_v40 = vld [vmem:[%s9527_s6 + $0x50] sm:$0xf0] }
  0x9f   :  { %v7263_v11 = vpop.eup %6538  ;;  %v267_v43 = vmul.f32 %v7172_v12, %v254_v61  ;;  %v268_v41 = vmul.f32 %v7191_v28, %v255_v1  ;;  %978 = vmatpush.bf16.msrb.mxu1 %v4873_v44  ;;  %1016 = vmatpush.bf16.msrb.mxu3 %v4877_v4  ;;  %v4661_v61 = vor.u32 %v6151_v54, %v4658_v55  ;;  %v125_v44 = vld [vmem:[%s9521_s0 + $0x138] sm:$0xff]  ;;  %v6187_v54 = vld [vmem:[%s9527_s6 + $0x18c] sm:$0xf]  ;;  %v4802_v55 = vld [vmem:[%s9527_s6 + $0x1a0] sm:$0xf0] }
  0xa0   :  { %v228_v19 = vsub.f32 1.5, %v227_v7  ;;  %v235_v21 = vmul.f32 %v7263_v11, %v7180_v20  ;;  %vm241_vm9 = vweird.f32 %v7263_v11  ;;  %v87_v7 = vld [vmem:[%s9521_s0 + $0x8] sm:$0xff]  ;;  %v124_v20 = vld [vmem:[%s9521_s0 + $0x130] sm:$0xff] }
  0xa1   :  { %v7281_v26 = vpop.eup %6540  ;;  %v7309_v42 = vmul.f32 %v7119_v39, %v267_v43  ;;  %v4853_v43 = vor.u32 %v6199_v62, %v4850_v63  ;;  %v284_v22 = vmul.f32 %v7254_v38, %v268_v41  ;;  %vm7381_vm11 = vmor %vm240_vm6, %vm241_vm9  ;;  %998 = vmatpush.bf16.msrb.mxu2 %v4661_v61  ;;  %v6193_v41 = vld [vmem:[%s9527_s6 + $0x1bc] sm:$0xf]  ;;  %v282_v62 = vadd.f32 1.0, %v125_v44  ;;  %v4736_v44 = vld [vmem:[%s9527_s6 + $0x100] sm:$0xf] }
  0xa2   :  { %v229_v32 = vmul.f32 %v7200_v35, %v228_v19  ;;  %v236_v33 = vmul.f32 %v7263_v11, %v235_v21  ;;  %v245_v9 = vmul.f32 %v7281_v26, %v7206_v37  ;;  %vm251_vm10 = vweird.f32 %v7281_v26  ;;  %960 = vmatpush.bf16.msrb.mxu0 %v4657_v53  ;;  %v6148_v19 = vld [vmem:[%s9527_s6 + $0x4c] sm:$0xf0]  ;;  %v4824_v21 = vld [vmem:[%s9527_s6 + $0x1b8] sm:$0xf] }
  0xa3   :  { %vm7415_vm12 = vmor %vm250_vm7, %vm251_vm10  ;;  %1017 = vmatpush.bf16.msrb.mxu3 %v4853_v43  ;;  %v209_v37 = vsub.f32 %v6869_v14, %v7106_v31  ;;  %v292_v53 = vadd.f32 %v284_v22, %v87_v7  ;;  %v4805_v7 = vor.u32 %v6187_v54, %v4802_v55 }
  0xa4   :  { %v233_v48 = vsel %vm232_vm8, %v7200_v35, %v229_v32  ;;  %v237_v39 = vmul.f32 0.5, %v236_v33  ;;  %v246_v49 = vmul.f32 %v7281_v26, %v245_v9  ;;  %v6202_v35 = vld [vmem:[%s9527_s6 + $0x1fc] sm:$0xf0]  ;;  %v6196_v32 = vld [vmem:[%s9527_s6 + $0x1cc] sm:$0xf0] }
  0xa5   :  { %v256_v51 = vmul.f32 %v233_v48, %v204_v18  ;;  %v257_v52 = vmul.f32 %v233_v48, %v205_v8  ;;  %v4849_v60 = vor.u32 %v6202_v35, %v4848_v50  ;;  %v4632_v18 = vld [vmem:[%s9527_s6 + $0x38] sm:$0xf]  ;;  %v6145_v33 = vld [vmem:[%s9527_s6 + $0x3c] sm:$0xf]  ;;  %v4825_v36 = vor.u32 %v6196_v32, %v4824_v21  ;;  %v4800_v50 = vld [vmem:[%s9527_s6 + $0x188] sm:$0xf] }
  0xa6   :  { %v238_v58 = vsub.f32 1.5, %v237_v39  ;;  %v247_v59 = vmul.f32 0.5, %v246_v49  ;;  %v113_v8 = vld [vmem:[%s9521_s0 + $0xd8] sm:$0xff]  ;;  %v4633_v38 = vor.u32 %v6148_v19, %v4632_v18  ;;  %v4637_v47 = vor.u32 %v6145_v33, %v4634_v40  ;;  %v6142_v39 = vld [vmem:[%s9527_s6 + $0x1c] sm:$0xf0] }
  0xa7   :  { %v269_v10 = vmul.f32 %v7172_v12, %v256_v51  ;;  %v270_v1 = vmul.f32 %v7191_v28, %v257_v52  ;;  %979 = vmatpush.bf16.msrb.mxu1 %v4849_v60  ;;  %v291_v49 = vadd.f32 %v7309_v42, %v86_v0  ;;  %v6190_v51 = vld [vmem:[%s9527_s6 + $0x19c] sm:$0xf0]  ;;  %v6139_v52 = vld [vmem:[%s9527_s6 + $0xc] sm:$0xf]  ;;  %v4610_v35 = vld [vmem:[%s9527_s6 + $0x20] sm:$0xf0] }
  0xa8   :  { %v239_v27 = vmul.f32 %v7263_v11, %v238_v58  ;;  %v248_v30 = vsub.f32 1.5, %v247_v59  ;;  %961 = vmatpush.bf16.msrb.mxu0 %v4633_v38  ;;  %v7452_v0 = vadd.f32 1.0, %v112_v24  ;;  %999 = vmatpush.bf16.msrb.mxu2 %v4637_v47  ;;  %v4801_v60 = vor.u32 %v6190_v51, %v4800_v50  ;;  %v4786_v18 = vld [vmem:[%s9527_s6 + $0x178] sm:$0xf0]  ;;  %v6230_v24 = vld [vmem:[%s9527_s6 + $0x2e4] sm:$0xf] }
  0xa9   :  { %v285_v9 = vmul.f32 %v7261_v5, %v269_v10  ;;  %v286_v17 = vmul.f32 %v7268_v16, %v270_v1  ;;  %v4826_v5 = vld [vmem:[%s9527_s6 + $0x1d0] sm:$0xf0]  ;;  %v208_v16 = vsub.f32 %v6864_v13, %v7106_v31  ;;  %v4608_v13 = vld [vmem:[%s9527_s6 + $0x8] sm:$0xf]  ;;  %v4613_v63 = vor.u32 %v6139_v52, %v4610_v35  ;;  %v4784_v1 = vld [vmem:[%s9527_s6 + $0x160] sm:$0xf] }
  0xaa   :  { %v249_v45 = vmul.f32 %v7281_v26, %v248_v30  ;;  %v4829_v48 = vor.u32 %v6193_v41, %v4826_v5  ;;  %v243_v42 = vsel %vm7381_vm11, %v7263_v11, %v239_v27  ;;  %v4609_v31 = vor.u32 %v6142_v39, %v4608_v13  ;;  %v4760_v27 = vld [vmem:[%s9527_s6 + $0x130] sm:$0xf]  ;;  %v6179_v38 = vld [vmem:[%s9527_s6 + $0x144] sm:$0xf0]  ;;  %v6224_v40 = vld [vmem:[%s9527_s6 + $0x2b4] sm:$0xf] }
  0xab   :  { %v293_v4 = vadd.f32 %v285_v9, %v98_v56  ;;  %v294_v25 = vadd.f32 %v286_v17, %v99_v57  ;;  %v7454_v11 = vadd.f32 1.0, %v113_v8  ;;  %980 = vmatpush.bf16.msrb.mxu1 %v4825_v36  ;;  %v258_v61 = vmul.f32 %v243_v42, %v206_v3  ;;  %v4976_v3 = vld [vmem:[%s9527_s6 + $0x2e0] sm:$0xf]  ;;  %v4978_v8 = vld [vmem:[%s9527_s6 + $0x2f8] sm:$0xf0]  ;;  %v123_v41 = vld [vmem:[%s9521_s0 + $0x128] sm:$0xff] }
  0xac   :  { %v253_v14 = vsel %vm7415_vm12, %v7281_v26, %v249_v45  ;;  %v281_v26 = vadd.f32 1.0, %v124_v20  ;;  %1018 = vmatpush.bf16.msrb.mxu3 %v4829_v48  ;;  %962 = vmatpush.bf16.msrb.mxu0 %v4609_v31  ;;  %v259_v10 = vmul.f32 %v243_v42, %v207_v15  ;;  %v6182_v15 = vld [vmem:[%s9527_s6 + $0x164] sm:$0xf]  ;;  %v4785_v19 = vor.u32 %v6185_v2, %v4784_v1  ;;  %v4952_v32 = vld [vmem:[%s9527_s6 + $0x2b0] sm:$0xf] }
  0xad   :  { %v260_v56 = vmul.f32 %v253_v14, %v208_v16  ;;  %v261_v57 = vmul.f32 %v253_v14, %v209_v37  ;;  %v7456_v58 = vpack.c.bf16 %v293_v4, %v291_v49  ;;  %v7458_v59 = vpack.c.bf16 %v294_v25, %v292_v53  ;;  %1000 = vmatpush.bf16.msrb.mxu2 %v4613_v63  ;;  %v6227_v33 = vld [vmem:[%s9527_s6 + $0x2c4] sm:$0xf0]  ;;  %v6176_v20 = vld [vmem:[%s9527_s6 + $0x134] sm:$0xf]  ;;  %v4762_v36 = vld [vmem:[%s9527_s6 + $0x148] sm:$0xf0] }
  0xae   :  { %v4977_v21 = vor.u32 %v6233_v23, %v4976_v3  ;;  %v4789_v22 = vor.u32 %v6182_v15, %v4786_v18  ;;  %v271_v29 = vmul.f32 %v7172_v12, %v258_v61  ;;  %v4981_v30 = vor.u32 %v6230_v24, %v4978_v8  ;;  %v4954_v16 = vld [vmem:[%s9527_s6 + $0x2c8] sm:$0xf0]  ;;  %v6173_v45 = vld [vmem:[%s9527_s6 + $0x114] sm:$0xf0]  ;;  %v4928_v13 = vld [vmem:[%s9527_s6 + $0x280] sm:$0xf] }
  0xaf   :  { %887 = vmatmul.bf16.vlgmr.msra.gmra.mxu0 %v7456_v58  ;;  %906 = vmatmul.bf16.vlgmr.msra.gmra.mxu1 %v7458_v59  ;;  %v273_v43 = vmul.f32 %v7172_v12, %v260_v56  ;;  %v274_v6 = vmul.f32 %v7191_v28, %v261_v57  ;;  %v272_v9 = vmul.f32 %v7191_v28, %v259_v10  ;;  %v122_v28 = vld [vmem:[%s9521_s0 + $0x120] sm:$0xff]  ;;  %v6221_v39 = vld [vmem:[%s9527_s6 + $0x294] sm:$0xf0]  ;;  %v4738_v25 = vld [vmem:[%s9527_s6 + $0x118] sm:$0xf0] }
  0xb0   :  { %925 = vmatmul.bf16.vlgmr.msra.gmra.mxu2 %v7456_v58  ;;  %944 = vmatmul.bf16.vlgmr.msra.gmra.mxu3 %v7458_v59  ;;  %v4761_v12 = vor.u32 %v6179_v38, %v4760_v27  ;;  %v4953_v17 = vor.u32 %v6227_v33, %v4952_v32  ;;  %v4765_v5 = vor.u32 %v6176_v20, %v4762_v36  ;;  %v6170_v49 = vld [vmem:[%s9527_s6 + $0x104] sm:$0xf]  ;;  %v4930_v50 = vld [vmem:[%s9527_s6 + $0x298] sm:$0xf0]  ;;  %v111_v14 = vld [vmem:[%s9521_s0 + $0xc8] sm:$0xff] }
  0xb1   :  { %981 = vmatpush.bf16.msrb.mxu1 %v4801_v60  ;;  %1019 = vmatpush.bf16.msrb.mxu3 %v4805_v7  ;;  %v289_v46 = vmul.f32 %v281_v26, %v273_v43  ;;  %v290_v47 = vmul.f32 %v282_v62, %v274_v6  ;;  %v4957_v48 = vor.u32 %v6224_v40, %v4954_v16  ;;  %v6218_v37 = vld [vmem:[%s9527_s6 + $0x284] sm:$0xf]  ;;  %v4904_v56 = vld [vmem:[%s9527_s6 + $0x250] sm:$0xf]  ;;  %v6215_v57 = vld [vmem:[%s9527_s6 + $0x264] sm:$0xf0] }
  0xb2   :  { %1031 = vmatpush.bf16.msra.mxu0 %v4785_v19  ;;  %1069 = vmatpush.bf16.msra.mxu2 %v4789_v22  ;;  %v287_v4 = vmul.f32 %v7452_v0, %v271_v29  ;;  %v288_v51 = vmul.f32 %v7454_v11, %v272_v9  ;;  %v4737_v52 = vor.u32 %v6173_v45, %v4736_v44  ;;  %v110_v42 = vld [vmem:[%s9521_s0 + $0xc0] sm:$0xff]  ;;  %v4712_v0 = vld [vmem:[%s9527_s6 + $0xd0] sm:$0xf]  ;;  %v6167_v11 = vld [vmem:[%s9527_s6 + $0xe4] sm:$0xf0] }
  0xb3   :  { %v4929_v53 = vor.u32 %v6221_v39, %v4928_v13  ;;  %v4741_v31 = vor.u32 %v6170_v49, %v4738_v25  ;;  %v4933_v35 = vor.u32 %v6218_v37, %v4930_v50  ;;  %v297_v54 = vadd.f32 %v289_v46, %v122_v28  ;;  %v6164_v26 = vld [vmem:[%s9527_s6 + $0xd4] sm:$0xf]  ;;  %v4714_v62 = vld [vmem:[%s9527_s6 + $0xe8] sm:$0xf0]  ;;  %v4688_v23 = vld [vmem:[%s9527_s6 + $0xa0] sm:$0xf] }
  0xb4   :  { %v298_v55 = vadd.f32 %v290_v47, %v123_v41  ;;  %v295_v60 = vadd.f32 %v287_v4, %v110_v42  ;;  %v296_v61 = vadd.f32 %v288_v51, %v111_v14  ;;  %v6212_v63 = vld [vmem:[%s9527_s6 + $0x254] sm:$0xf]  ;;  %v4906_v7 = vld [vmem:[%s9527_s6 + $0x268] sm:$0xf0]  ;;  %v4713_v10 = vor.u32 %v6167_v11, %v4712_v0  ;;  %v6161_v15 = vld [vmem:[%s9527_s6 + $0xb4] sm:$0xf0] }
  0xb5   :  { %1050 = vmatpush.bf16.msra.mxu1 %v4977_v21  ;;  %1088 = vmatpush.bf16.msra.mxu3 %v4981_v30  ;;  %v4905_v3 = vor.u32 %v6215_v57, %v4904_v56  ;;  %v4717_v43 = vor.u32 %v6164_v26, %v4714_v62  ;;  %v4909_v6 = vor.u32 %v6212_v63, %v4906_v7  ;;  %v4880_v18 = vld [vmem:[%s9527_s6 + $0x220] sm:$0xf]  ;;  %v6209_v21 = vld [vmem:[%s9527_s6 + $0x234] sm:$0xf0]  ;;  %v6158_v22 = vld [vmem:[%s9527_s6 + $0xa4] sm:$0xf] }
  0xb6   :  { %1032 = vmatpush.bf16.msra.mxu0 %v4761_v12  ;;  %1070 = vmatpush.bf16.msra.mxu2 %v4765_v5  ;;  %v7584_v1 = vpack.c.bf16 %v297_v54, %v295_v60  ;;  %v7586_v2 = vpack.c.bf16 %v298_v55, %v296_v61  ;;  %v4689_v19 = vor.u32 %v6161_v15, %v4688_v23  ;;  %v4690_v24 = vld [vmem:[%s9527_s6 + $0xb8] sm:$0xf0]  ;;  %v6206_v27 = vld [vmem:[%s9527_s6 + $0x224] sm:$0xf]  ;;  %v4664_v30 = vld [vmem:[%s9527_s6 + $0x70] sm:$0xf] }
  0xb7   :  { %v4881_v8 = vor.u32 %v6209_v21, %v4880_v18  ;;  %v4882_v29 = vld [vmem:[%s9527_s6 + $0x238] sm:$0xf0]  ;;  %v4693_v38 = vor.u32 %v6158_v22, %v4690_v24  ;;  %v6155_v33 = vld [vmem:[%s9527_s6 + $0x84] sm:$0xf0]  ;;  %v4856_v9 = vld [vmem:[%s9527_s6 + $0x1f0] sm:$0xf] }
  0xb8   :  { %v4885_v32 = vor.u32 %v6206_v27, %v4882_v29  ;;  %v6203_v12 = vld [vmem:[%s9527_s6 + $0x204] sm:$0xf0]  ;;  %v4666_v20 = vld [vmem:[%s9527_s6 + $0x88] sm:$0xf0]  ;;  %v6200_v36 = vld [vmem:[%s9527_s6 + $0x1f4] sm:$0xf]  ;;  %v4665_v40 = vor.u32 %v6155_v33, %v4664_v30 }
  0xb9   :  { %1051 = vmatpush.bf16.msra.mxu1 %v4953_v17  ;;  %1089 = vmatpush.bf16.msra.mxu3 %v4957_v48  ;;  %v6152_v17 = vld [vmem:[%s9527_s6 + $0x74] sm:$0xf]  ;;  %v4858_v28 = vld [vmem:[%s9527_s6 + $0x208] sm:$0xf0]  ;;  %v4857_v41 = vor.u32 %v6203_v12, %v4856_v9  ;;  %v4640_v5 = vld [vmem:[%s9527_s6 + $0x40] sm:$0xf] }
  0xba   :  { %1033 = vmatpush.bf16.msra.mxu0 %v4737_v52  ;;  %1071 = vmatpush.bf16.msra.mxu2 %v4741_v31  ;;  %v6149_v16 = vld [vmem:[%s9527_s6 + $0x54] sm:$0xf0]  ;;  %v4669_v44 = vor.u32 %v6152_v17, %v4666_v20  ;;  %v4861_v45 = vor.u32 %v6200_v36, %v4858_v28  ;;  %v4832_v46 = vld [vmem:[%s9527_s6 + $0x1c0] sm:$0xf]  ;;  %v6146_v48 = vld [vmem:[%s9527_s6 + $0x44] sm:$0xf] }
  0xbb   :  { %v6197_v47 = vld [vmem:[%s9527_s6 + $0x1d4] sm:$0xf0]  ;;  %v4642_v13 = vld [vmem:[%s9527_s6 + $0x58] sm:$0xf0]  ;;  %v6194_v39 = vld [vmem:[%s9527_s6 + $0x1c4] sm:$0xf]  ;;  %v4641_v4 = vor.u32 %v6149_v16, %v4640_v5 }
  0xbc   :  { %v4834_v49 = vld [vmem:[%s9527_s6 + $0x1d8] sm:$0xf0]  ;;  %v4833_v25 = vor.u32 %v6197_v47, %v4832_v46  ;;  %v4616_v37 = vld [vmem:[%s9527_s6 + $0x10] sm:$0xf]  ;;  %v6143_v50 = vld [vmem:[%s9527_s6 + $0x24] sm:$0xf0]  ;;  %v4645_v51 = vor.u32 %v6146_v48, %v4642_v13 }
  0xbd   :  { %1052 = vmatpush.bf16.msra.mxu1 %v4929_v53  ;;  %1090 = vmatpush.bf16.msra.mxu3 %v4933_v35  ;;  %v4837_v52 = vor.u32 %v6194_v39, %v4834_v49  ;;  %v4808_v53 = vld [vmem:[%s9527_s6 + $0x190] sm:$0xf]  ;;  %v6191_v42 = vld [vmem:[%s9527_s6 + $0x1a4] sm:$0xf0]  ;;  %v6140_v14 = vld [vmem:[%s9527_s6 + $0x14] sm:$0xf]  ;;  %v4617_v55 = vor.u32 %v6143_v50, %v4616_v37 }
  0xbe   :  { %1034 = vmatpush.bf16.msra.mxu0 %v4713_v10  ;;  %1072 = vmatpush.bf16.msra.mxu2 %v4717_v43  ;;  %v4618_v31 = vld [vmem:[%s9527_s6 + $0x28] sm:$0xf0]  ;;  %v6188_v35 = vld [vmem:[%s9527_s6 + $0x194] sm:$0xf]  ;;  %v4809_v0 = vor.u32 %v6191_v42, %v4808_v53 }
  0xbf   :  { %892 = vmatmul.bf16.gmra.mxu0 %v7584_v1  ;;  %911 = vmatmul.bf16.gmra.mxu1 %v7586_v2  ;;  %v4810_v54 = vld [vmem:[%s9527_s6 + $0x1a8] sm:$0xf0]  ;;  %v4621_v11 = vor.u32 %v6140_v14, %v4618_v31  ;;  %s6738_s6 = smov 32  }
  0xc0   :  { %930 = vmatmul.bf16.gmra.mxu2 %v7584_v1  ;;  %949 = vmatmul.bf16.gmra.mxu3 %v7586_v2  ;;  %v4813_v56 = vor.u32 %v6188_v35, %v4810_v54 }
  0xc1   :  { %1053 = vmatpush.bf16.msra.mxu1 %v4905_v3  ;;  %1091 = vmatpush.bf16.msra.mxu3 %v4909_v6 }
  0xc2   :  { %1035 = vmatpush.bf16.msra.mxu0 %v4689_v19  ;;  %1073 = vmatpush.bf16.msra.mxu2 %v4693_v38 }
  0xc5   :  { %1054 = vmatpush.bf16.msra.mxu1 %v4881_v8  ;;  %1092 = vmatpush.bf16.msra.mxu3 %v4885_v32 }
  0xc6   :  { %1036 = vmatpush.bf16.msra.mxu0 %v4665_v40  ;;  %1074 = vmatpush.bf16.msra.mxu2 %v4669_v44 }
  0xc9   :  { %1055 = vmatpush.bf16.msra.mxu1 %v4857_v41  ;;  %1093 = vmatpush.bf16.msra.mxu3 %v4861_v45 }
  0xca   :  { %1037 = vmatpush.bf16.msra.mxu0 %v4641_v4  ;;  %1075 = vmatpush.bf16.msra.mxu2 %v4645_v51 }
  0xcd   :  { %1056 = vmatpush.bf16.msra.mxu1 %v4833_v25  ;;  %1094 = vmatpush.bf16.msra.mxu3 %v4837_v52 }
  0xce   :  { %1038 = vmatpush.bf16.msra.mxu0 %v4617_v55  ;;  %1076 = vmatpush.bf16.msra.mxu2 %v4621_v11 }
  0xcf   :  { %963 = vmatmul.bf16.vlgmr.msrb.gmra.mxu0 %v7456_v58  ;;  %982 = vmatmul.bf16.vlgmr.msrb.gmra.mxu1 %v7458_v59 }
  0xd0   :  { %1001 = vmatmul.bf16.vlgmr.msrb.gmra.mxu2 %v7456_v58  ;;  %1020 = vmatmul.bf16.vlgmr.msrb.gmra.mxu3 %v7458_v59 }
  0xd1   :  { %1057 = vmatpush.bf16.msra.mxu1 %v4809_v0  ;;  %1095 = vmatpush.bf16.msra.mxu3 %v4813_v56 }
  0xdf   :  { %968 = vmatmul.bf16.gmra.mxu0 %v7584_v1  ;;  %987 = vmatmul.bf16.gmra.mxu1 %v7586_v2 }
  0xe0   :  { %1006 = vmatmul.bf16.gmra.mxu2 %v7584_v1  ;;  %1025 = vmatmul.bf16.gmra.mxu3 %v7586_v2 }
  0xef   :  { %1039 = vmatmul.bf16.vlgmr.msra.gmra.mxu0 %v7456_v58  ;;  %1058 = vmatmul.bf16.vlgmr.msra.gmra.mxu1 %v7458_v59 }
  0xf0   :  { %1077 = vmatmul.bf16.vlgmr.msra.gmra.mxu2 %v7456_v58  ;;  %1096 = vmatmul.bf16.vlgmr.msra.gmra.mxu3 %v7458_v59 }
  0xff   :  { %1044 = vmatmul.bf16.gmra.mxu0 %v7584_v1  ;;  %1063 = vmatmul.bf16.gmra.mxu1 %v7586_v2 }
 0x100   :  { %1082 = vmatmul.bf16.gmra.mxu2 %v7584_v1  ;;  %1101 = vmatmul.bf16.gmra.mxu3 %v7586_v2 }
 0x12c   :  { %v888_v57 = vpop.f32.mrf.mxu0  ;;  %v907_v26 = vpop.f32.mrf.mxu1 }
 0x12d   :  { %v7704_v60 = vadd.f32 %v907_v26, %v888_v57  ;;  %v7823_v57 = vld [vmem:[%s9524_s3] sm:$0xff] }
 0x12e   :  { %v7828_v26 = vld [vmem:[%s9523_s2] sm:$0xff] }
 0x12f   :  { %1115 = vrot.lane.b32.xlu1 %v7704_v60, %s6738_s6  ;;  %1107 = vrot.lane.b32.xlu0 %v7704_v60, %s6739_s21 }
 0x133   :  { %v926_v58 = vpop.f32.mrf.mxu2  ;;  %v945_v59 = vpop.f32.mrf.mxu3 }
 0x134   :  { %v890_v61 = vpop.f32.mrf.mxu0  ;;  %v7710_v62 = vadd.f32 %v945_v59, %v926_v58  ;;  %v909_v63 = vpop.f32.mrf.mxu1 }
 0x135   :  { %v7712_v7 = vadd.f32 %v909_v63, %v890_v61 }
 0x137   :  { %1155 = vrot.lane.b32.xlu1 %v7710_v62, %s6738_s6  ;;  %1147 = vrot.lane.b32.xlu0 %v7710_v62, %s6739_s21 }
 0x138   :  { %1109 = vrot.lane.b32.xlu2 %v7712_v7, %s6739_s21 }
 0x13b   :  { %v928_v10 = vpop.f32.mrf.mxu2  ;;  %v947_v1 = vpop.f32.mrf.mxu3 }
 0x13c   :  { %v893_v2 = vpop.f32.mrf.mxu0  ;;  %v912_v3 = vpop.f32.mrf.mxu1  ;;  %v7720_v43 = vadd.f32 %v947_v1, %v928_v10  ;;  %v1123_v1 = vmul.f32 %v7704_v60, %v7828_v26 }
 0x13d   :  { %v7778_v39 = vadd.f32 %v912_v3, %v893_v2  ;;  %v7838_v3 = vld [vmem:[%s9524_s3 + $0x8] sm:$0xff] }
 0x13f   :  { %1117 = vrot.lane.b32.xlu0 %v7712_v7, %s6738_s6 }
 0x140   :  { %1149 = vrot.lane.b32.xlu2 %v7720_v43, %s6739_s21 }
 0x143   :  { %v931_v6 = vpop.f32.mrf.mxu2  ;;  %v950_v23 = vpop.f32.mrf.mxu3 }
 0x144   :  { %v895_v15 = vpop.f32.mrf.mxu0  ;;  %v914_v18 = vpop.f32.mrf.mxu1  ;;  %v7750_v40 = vadd.f32 %v950_v23, %v931_v6  ;;  %v7843_v6 = vld [vmem:[%s9525_s4] sm:$0xff] }
 0x145   :  { %v7788_v4 = vadd.f32 %v914_v18, %v895_v15  ;;  %v7850_v18 = vld [vmem:[%s9523_s2 + $0x8] sm:$0xff] }
 0x147   :  { %1157 = vrot.lane.b32.xlu0 %v7720_v43, %s6738_s6 }
 0x14b   :  { %v933_v19 = vpop.f32.mrf.mxu2  ;;  %v952_v21 = vpop.f32.mrf.mxu3 }
 0x14c   :  { %v964_v22 = vpop.f32.mrf.mxu0  ;;  %v983_v24 = vpop.f32.mrf.mxu1  ;;  %v7752_v28 = vadd.f32 %v952_v21, %v933_v19  ;;  %v7859_v21 = vld [vmem:[%s9525_s4 + $0x8] sm:$0xff] }
 0x14d   :  { %v7728_v8 = vadd.f32 %v983_v24, %v964_v22  ;;  %v1124_v22 = vmul.f32 %v7712_v7, %v7850_v18 }
 0x14f   :  { %1195 = vrot.lane.b32.xlu0 %v7728_v8, %s6738_s6  ;;  %1187 = vrot.lane.b32.xlu2 %v7728_v8, %s6739_s21 }
 0x153   :  { %v1002_v27 = vpop.f32.mrf.mxu2  ;;  %v1021_v29 = vpop.f32.mrf.mxu3 }
 0x154   :  { %v7734_v30 = vadd.f32 %v1021_v29, %v1002_v27  ;;  %v966_v38 = vpop.f32.mrf.mxu0  ;;  %v985_v32 = vpop.f32.mrf.mxu1 }
 0x155   :  { %v7740_v12 = vadd.f32 %v985_v32, %v966_v38  ;;  %v1163_v32 = vmul.f32 %v7710_v62, %v7828_v26 }
 0x156   :  { %1235 = vrot.lane.b32.xlu1 %v7734_v30, %s6738_s6 }
 0x157   :  { %1227 = vrot.lane.b32.xlu2 %v7734_v30, %s6739_s21 }
 0x15b   :  { %v1004_v33 = vpop.f32.mrf.mxu2  ;;  %v1023_v9 = vpop.f32.mrf.mxu3 }
 0x15c   :  { %v7742_v17 = vadd.f32 %v1023_v9, %v1004_v33  ;;  %v969_v41 = vpop.f32.mrf.mxu0  ;;  %v988_v5 = vpop.f32.mrf.mxu1 }
 0x15d   :  { %v7780_v49 = vadd.f32 %v988_v5, %v969_v41 }
 0x15e   :  { %1229 = vrot.lane.b32.xlu0 %v7742_v17, %s6739_s21  ;;  %1189 = vrot.lane.b32.xlu1 %v7740_v12, %s6739_s21 }
 0x15f   :  { %1197 = vrot.lane.b32.xlu2 %v7740_v12, %s6738_s6 }
 0x163   :  { %v1007_v20 = vpop.f32.mrf.mxu2  ;;  %v1026_v36 = vpop.f32.mrf.mxu3 }
 0x164   :  { %v7760_v45 = vadd.f32 %v1026_v36, %v1007_v20  ;;  %v971_v47 = vpop.f32.mrf.mxu0  ;;  %v990_v48 = vpop.f32.mrf.mxu1 }
 0x165   :  { %v7770_v13 = vadd.f32 %v990_v48, %v971_v47  ;;  %v1164_v47 = vmul.f32 %v7720_v43, %v7850_v18 }
 0x166   :  { %1159 = vrot.lane.b32.xlu0 %v7750_v40, %s6738_s6  ;;  %1153 = vrot.lane.b32.xlu1 %v7752_v28, %s6739_s21 }
 0x167   :  { %1237 = vrot.lane.b32.xlu2 %v7742_v17, %s6738_s6 }
 0x16b   :  { %v1009_v16 = vpop.f32.mrf.mxu2  ;;  %v1028_v44 = vpop.f32.mrf.mxu3 }
 0x16c   :  { %v7762_v46 = vadd.f32 %v1028_v44, %v1009_v16  ;;  %v1040_v53 = vpop.f32.mrf.mxu0  ;;  %v1059_v42 = vpop.f32.mrf.mxu1 }
 0x16d   :  { %v7804_v14 = vadd.f32 %v1059_v42, %v1040_v53 }
 0x16e   :  { %1233 = vrot.lane.b32.xlu0 %v7762_v46, %s6739_s21  ;;  %1231 = vrot.lane.b32.xlu1 %v7760_v45, %s6739_s21 }
 0x16f   :  { %1151 = vrot.lane.b32.xlu2 %v7750_v40, %s6739_s21 }
 0x173   :  { %v1078_v25 = vpop.f32.mrf.mxu2  ;;  %v1097_v37 = vpop.f32.mrf.mxu3 }
 0x174   :  { %v7796_v50 = vadd.f32 %v1097_v37, %v1078_v25  ;;  %v1042_v58 = vpop.f32.mrf.mxu0  ;;  %v1061_v10 = vpop.f32.mrf.mxu1 }
 0x175   :  { %v7845_v15 = vadd.f32 %v1061_v10, %v1042_v58 }
 0x176   :  { %1241 = vrot.lane.b32.xlu1 %v7762_v46, %s6738_s6  ;;  %1193 = vrot.lane.b32.xlu0 %v7770_v13, %s6739_s21 }
 0x177   :  { %1239 = vrot.lane.b32.xlu2 %v7760_v45, %s6738_s6 }
 0x17b   :  { %v1080_v51 = vpop.f32.mrf.mxu2  ;;  %v1099_v52 = vpop.f32.mrf.mxu3 }
 0x17c   :  { %v7806_v31 = vadd.f32 %v1099_v52, %v1080_v51 }
 0x17e   :  { %1191 = vrot.lane.b32.xlu1 %v7780_v49, %s6739_s21  ;;  %1111 = vrot.lane.b32.xlu0 %v7778_v39, %s6739_s21 }
 0x17f   :  { %1161 = vrot.lane.b32.xlu2 %v7752_v28, %s6738_s6 }
 0x183   :  { %v1083_v54 = vpop.f32.mrf.mxu2  ;;  %v1102_v55 = vpop.f32.mrf.mxu3 }
 0x184   :  { %v7814_v0 = vadd.f32 %v1102_v55, %v1083_v54 }
 0x186   :  { %1201 = vrot.lane.b32.xlu1 %v7770_v13, %s6738_s6  ;;  %1121 = vrot.lane.b32.xlu0 %v7788_v4, %s6738_s6 }
 0x187   :  { %1199 = vrot.lane.b32.xlu2 %v7780_v49, %s6738_s6 }
 0x18e   :  { %1119 = vrot.lane.b32.xlu1 %v7778_v39, %s6738_s6  ;;  %1307 = vrot.lane.b32.xlu0 %v7796_v50, %s6739_s21 }
 0x18f   :  { %1113 = vrot.lane.b32.xlu2 %v7788_v4, %s6739_s21 }
 0x192   :  { %v1110_v35 = vpop.permute.xlu2 %1109 }
 0x193   :  { %v1128_v60 = vmul.f32 %v1110_v35, %v7838_v3 }
 0x195   :  { %v1132_v38 = vadd.f32 %v1128_v60, %v1124_v22  ;;  %v1243_v60 = vmul.f32 %v7734_v30, %v7828_v26 }
 0x196   :  { %1267 = vrot.lane.b32.xlu1 %v7804_v14, %s6739_s21  ;;  %1317 = vrot.lane.b32.xlu0 %v7806_v31, %s6738_s6 }
 0x197   :  { %1309 = vrot.lane.b32.xlu2 %v7806_v31, %s6739_s21 }
 0x19a   :  { %v1150_v56 = vpop.permute.xlu2 %1149 }
 0x19b   :  { %v1168_v16 = vmul.f32 %v1150_v56, %v7838_v3 }
 0x19d   :  { %v1172_v51 = vadd.f32 %v1168_v16, %v1164_v47 }
 0x19e   :  { %1275 = vrot.lane.b32.xlu1 %v7804_v14, %s6738_s6  ;;  %1311 = vrot.lane.b32.xlu0 %v7814_v0, %s6739_s21 }
 0x1a1   :  { %v1108_v11 = vpop.permute.xlu0 %1107  ;;  %v1116_v61 = vpop.permute.xlu1 %1115 }
 0x1a2   :  { %v1127_v59 = vmul.f32 %v1108_v11, %v7823_v57  ;;  %v1135_v19 = vmul.f32 %v1116_v61, %v7843_v6 }
 0x1a4   :  { %v1131_v23 = vadd.f32 %v1127_v59, %v1123_v1 }
 0x1a6   :  { %1315 = vrot.lane.b32.xlu1 %v7796_v50, %s6738_s6  ;;  %v1139_v24 = vadd.f32 %v1135_v19, %v1131_v23  ;;  %v1203_v23 = vmul.f32 %v7728_v8, %v7828_v26  ;;  %v1204_v8 = vmul.f32 %v7740_v12, %v7850_v18  ;;  %v7911_v12 = vld [vmem:[%s9523_s2 + $0x10] sm:$0xff] }
 0x1a8   :  { %v1143_v36 = vpack.c.bf16 %v1139_v24, %v1139_v24 }
 0x1a9   :  { %v1148_v63 = vpop.permute.xlu0 %1147  ;;  %v1188_v2 = vpop.permute.xlu2 %1187 }
 0x1aa   :  { %v1167_v27 = vmul.f32 %v1148_v63, %v7823_v57  ;;  %v1156_v20 = vpop.permute.xlu1 %1155  ;;  %v7873_v48 = vunpack.c.l.b16 %v1143_v36  ;;  %v1207_v10 = vmul.f32 %v1188_v2, %v7823_v57  ;;  %v7897_v2 = vld [vmem:[%s9524_s3 + $0x10] sm:$0xff] }
 0x1ab   :  { %v1175_v44 = vmul.f32 %v1156_v20, %v7843_v6 }
 0x1ac   :  { %v1171_v41 = vadd.f32 %v1167_v27, %v1163_v32  ;;  %v1211_v24 = vadd.f32 %v1207_v10, %v1203_v23 }
 0x1ae   :  { %1269 = vrot.lane.b32.xlu1 %v7845_v15, %s6739_s21  ;;  %v1179_v62 = vadd.f32 %v1175_v44, %v1171_v41 }
 0x1b0   :  { %v1183_v35 = vpack.c.bf16 %v1179_v62, %v1179_v62 }
 0x1b1   :  { %v1118_v29 = vpop.permute.xlu0 %1117  ;;  %v1228_v33 = vpop.permute.xlu2 %1227 }
 0x1b2   :  { %v1136_v9 = vmul.f32 %v1118_v29, %v7859_v21  ;;  %v7880_v11 = vunpack.c.l.b16 %v1183_v35  ;;  %v1247_v1 = vmul.f32 %v1228_v33, %v7823_v57  ;;  %v1244_v33 = vmul.f32 %v7742_v17, %v7850_v18 }
 0x1b4   :  { %v1140_v5 = vadd.f32 %v1136_v9, %v1132_v38  ;;  %v1251_v27 = vadd.f32 %v1247_v1, %v1243_v60 }
 0x1b6   :  { %v1144_v7 = vpack.c.bf16 %v1140_v5, %v1140_v5  ;;  %1277 = vrot.lane.b32.xlu1 %v7845_v15, %s6738_s6 }
 0x1b8   :  { %v7875_v25 = vunpack.c.l.b16 %v1144_v7 }
 0x1b9   :  { %v1158_v37 = vpop.permute.xlu0 %1157  ;;  %v1198_v53 = vpop.permute.xlu2 %1197 }
 0x1ba   :  { %v1351_v52 = vpack.c.b16 %v7875_v25, %v7873_v48  ;;  %v1176_v42 = vmul.f32 %v1158_v37, %v7859_v21  ;;  %v1216_v41 = vmul.f32 %v1198_v53, %v7859_v21  ;;  %v7918_v53 = vld [vmem:[%s9524_s3 + $0x18] sm:$0xff] }
 0x1bc   :  { %v1180_v54 = vadd.f32 %v1176_v42, %v1172_v51  ;;  %v1165_v51 = vmul.f32 %v7750_v40, %v7911_v12 }
 0x1be   :  { %v1184_v55 = vpack.c.bf16 %v1180_v54, %v1180_v54  ;;  %v7923_v54 = vld [vmem:[%s9523_s2 + $0x18] sm:$0xff] }
 0x1c0   :  { %v7882_v56 = vunpack.c.l.b16 %v1184_v55  ;;  %v7928_v55 = vld [vmem:[%s9525_s4 + $0x18] sm:$0xff] }
 0x1c1   :  { %v1238_v58 = vpop.permute.xlu2 %1237  ;;  %v1196_v59 = vpop.permute.xlu0 %1195 }
 0x1c2   :  { %v1426_v43 = vpack.c.b16 %v7882_v56, %v7880_v11  ;;  %v1215_v19 = vmul.f32 %v1196_v59, %v7843_v6  ;;  %v1256_v5 = vmul.f32 %v1238_v58, %v7859_v21 }
 0x1c4   :  { %v1219_v29 = vadd.f32 %v1215_v19, %v1211_v24 }
 0x1c6   :  { %v1223_v7 = vpack.c.bf16 %v1219_v29, %v1219_v29 }
 0x1c8   :  { %v1236_v61 = vpop.permute.xlu1 %1235  ;;  %v1355_v58 = vunpack.c.l.b16 %v1223_v7 }
 0x1c9   :  { %v1152_v63 = vpop.permute.xlu2 %1151  ;;  %v1255_v22 = vmul.f32 %v1236_v61, %v7843_v6  ;;  %v7933_v61 = vld [vmem:[%s9525_s4 + $0x10] sm:$0xff] }
 0x1ca   :  { %v1169_v62 = vmul.f32 %v1152_v63, %v7897_v2  ;;  %v1166_v63 = vmul.f32 %v7752_v28, %v7923_v54 }
 0x1cb   :  { %v1259_v38 = vadd.f32 %v1255_v22, %v1251_v27 }
 0x1cc   :  { %v1173_v40 = vadd.f32 %v1169_v62, %v1165_v51 }
 0x1cd   :  { %v1263_v47 = vpack.c.bf16 %v1259_v38, %v1259_v38 }
 0x1cf   :  { %v1430_v59 = vunpack.c.l.b16 %v1263_v47 }
 0x1d0   :  { %v1190_v32 = vpop.permute.xlu1 %1189  ;;  %v1230_v9 = vpop.permute.xlu0 %1229 }
 0x1d1   :  { %v1208_v30 = vmul.f32 %v1190_v32, %v7838_v3  ;;  %v1248_v20 = vmul.f32 %v1230_v9, %v7838_v3  ;;  %v1240_v36 = vpop.permute.xlu2 %1239 }
 0x1d2   :  { %v1257_v62 = vmul.f32 %v1240_v36, %v7933_v61 }
 0x1d3   :  { %v1212_v16 = vadd.f32 %v1208_v30, %v1204_v8  ;;  %v1252_v44 = vadd.f32 %v1248_v20, %v1244_v33 }
 0x1d5   :  { %v1220_v37 = vadd.f32 %v1216_v41, %v1212_v16  ;;  %v1260_v17 = vadd.f32 %v1256_v5, %v1252_v44  ;;  %v1245_v16 = vmul.f32 %v7760_v45, %v7911_v12  ;;  %v1246_v45 = vmul.f32 %v7762_v46, %v7923_v54 }
 0x1d7   :  { %v1224_v42 = vpack.c.bf16 %v1220_v37, %v1220_v37  ;;  %v1264_v35 = vpack.c.bf16 %v1260_v17, %v1260_v17 }
 0x1d8   :  { %v1154_v10 = vpop.permute.xlu1 %1153  ;;  %v1160_v1 = vpop.permute.xlu0 %1159 }
 0x1d9   :  { %v1356_v23 = vunpack.c.l.b16 %v1224_v42  ;;  %v1431_v60 = vunpack.c.l.b16 %v1264_v35  ;;  %v1170_v19 = vmul.f32 %v1154_v10, %v7918_v53  ;;  %v1177_v22 = vmul.f32 %v1160_v1, %v7933_v61  ;;  %v1162_v24 = vpop.permute.xlu2 %1161 }
 0x1da   :  { %v1178_v27 = vmul.f32 %v1162_v24, %v7928_v55 }
 0x1db   :  { %v1174_v29 = vadd.f32 %v1170_v19, %v1166_v63  ;;  %v1181_v38 = vadd.f32 %v1177_v22, %v1173_v40  ;;  %v1357_v32 = vpack.c.b16 %v1356_v23, %v1355_v58  ;;  %v1432_v9 = vpack.c.b16 %v1431_v60, %v1430_v59 }
 0x1dc   :  { %v1205_v63 = vmul.f32 %v7780_v49, %v7911_v12  ;;  %v1206_v19 = vmul.f32 %v7770_v13, %v7923_v54 }
 0x1dd   :  { %v1185_v8 = vpack.c.bf16 %v1181_v38, %v1181_v38  ;;  %v1182_v30 = vadd.f32 %v1178_v27, %v1174_v29  ;;  %1366 = vmatpush.bf16.xpose.msrb.mxu0 %v1357_v32  ;;  %1441 = vmatpush.bf16.xpose.msrb.mxu2 %v1432_v9  ;;  %v1126_v32 = vmul.f32 %v7788_v4, %v7923_v54 }
 0x1df   :  { %v1186_v28 = vpack.c.bf16 %v1182_v30, %v1182_v30  ;;  %v1572_v41 = vunpack.c.l.b16 %v1185_v8 }
 0x1e0   :  { %v1232_v33 = vpop.permute.xlu1 %1231  ;;  %v1234_v20 = vpop.permute.xlu0 %1233 }
 0x1e1   :  { %v1573_v5 = vunpack.c.l.b16 %v1186_v28  ;;  %v1249_v44 = vmul.f32 %v1232_v33, %v7897_v2  ;;  %v1250_v37 = vmul.f32 %v1234_v20, %v7918_v53  ;;  %v1200_v25 = vpop.permute.xlu2 %1199 }
 0x1e2   :  { %v1217_v1 = vmul.f32 %v1200_v25, %v7933_v61 }
 0x1e3   :  { %v1574_v7 = vpack.c.b16 %v1573_v5, %v1572_v41  ;;  %v1253_v47 = vadd.f32 %v1249_v44, %v1245_v16  ;;  %v1254_v35 = vadd.f32 %v1250_v37, %v1246_v45  ;;  %v1125_v41 = vmul.f32 %v7778_v39, %v7911_v12 }
 0x1e4   :  { %1367 = vmatmul.bf16.vlgmr.msrb.gmra.mxu0 %v1351_v52  ;;  %1442 = vmatmul.bf16.vlgmr.msrb.gmra.mxu2 %v1426_v43 }
 0x1e5   :  { %v1261_v17 = vadd.f32 %v1257_v62, %v1253_v47 }
 0x1e7   :  { %v1265_v59 = vpack.c.bf16 %v1261_v17, %v1261_v17 }
 0x1e8   :  { %v1242_v51 = vpop.permute.xlu1 %1241  ;;  %v1194_v42 = vpop.permute.xlu0 %1193 }
 0x1e9   :  { %v1258_v58 = vmul.f32 %v1242_v51, %v7928_v55  ;;  %v1578_v40 = vunpack.c.l.b16 %v1265_v59  ;;  %v1210_v23 = vmul.f32 %v1194_v42, %v7918_v53  ;;  %v1114_v60 = vpop.permute.xlu2 %1113 }
 0x1ea   :  { %v1130_v38 = vmul.f32 %v1114_v60, %v7918_v53 }
 0x1eb   :  { %v1262_v48 = vadd.f32 %v1258_v58, %v1254_v35  ;;  %v1214_v29 = vadd.f32 %v1210_v23, %v1206_v19 }
 0x1ec   :  { %v1134_v28 = vadd.f32 %v1130_v38, %v1126_v32 }
 0x1ed   :  { %v1266_v52 = vpack.c.bf16 %v1262_v48, %v1262_v48 }
 0x1ef   :  { %v1579_v11 = vunpack.c.l.b16 %v1266_v52  ;;  %v1324_v52 = vmul.f32 %v7806_v31, %v7850_v18 }
 0x1f0   :  { %v1192_v56 = vpop.permute.xlu1 %1191  ;;  %v1112_v43 = vpop.permute.xlu0 %1111 }
 0x1f1   :  { %v1580_v36 = vpack.c.b16 %v1579_v11, %v1578_v40  ;;  %v1209_v10 = vmul.f32 %v1192_v56, %v7897_v2  ;;  %v1129_v33 = vmul.f32 %v1112_v43, %v7897_v2  ;;  %v1310_v59 = vpop.permute.xlu2 %1309  ;;  %v1323_v43 = vmul.f32 %v7796_v50, %v7828_v26 }
 0x1f2   :  { %v1328_v25 = vmul.f32 %v1310_v59, %v7838_v3 }
 0x1f3   :  { %v1213_v46 = vadd.f32 %v1209_v10, %v1205_v63  ;;  %1589 = vmatpush.bf16.xpose.msra.mxu2 %v1580_v36  ;;  %v1133_v47 = vadd.f32 %v1129_v33, %v1125_v41 }
 0x1f4   :  { %v1332_v11 = vadd.f32 %v1328_v25, %v1324_v52 }
 0x1f5   :  { %v1221_v22 = vadd.f32 %v1217_v1, %v1213_v46 }
 0x1f7   :  { %v1225_v9 = vpack.c.bf16 %v1221_v22, %v1221_v22 }
 0x1f8   :  { %v1202_v24 = vpop.permute.xlu1 %1201  ;;  %v1122_v27 = vpop.permute.xlu0 %1121 }
 0x1f9   :  { %v1218_v49 = vmul.f32 %v1202_v24, %v7928_v55  ;;  %v1138_v30 = vmul.f32 %v1122_v27, %v7928_v55  ;;  %v1504_v20 = vunpack.c.l.b16 %v1225_v9  ;;  %v1284_v9 = vmul.f32 %v7845_v15, %v7850_v18 }
 0x1fa   :  { %1590 = vmatmul.bf16.vlgmr.msra.gmra.mxu2 %v1574_v7 }
 0x1fb   :  { %v1222_v8 = vadd.f32 %v1218_v49, %v1214_v29  ;;  %v1142_v16 = vadd.f32 %v1138_v30, %v1134_v28  ;;  %v1283_v29 = vmul.f32 %v7804_v14, %v7828_v26  ;;  %v7986_v26 = vpop.f32.mrf.mxu0 }
 0x1fd   :  { %v1226_v13 = vpack.c.bf16 %v1222_v8, %v1222_v8  ;;  %v1146_v4 = vpack.c.bf16 %v1142_v16, %v1142_v16 }
 0x1ff   :  { %v1505_v5 = vunpack.c.l.b16 %v1226_v13  ;;  %v1499_v51 = vunpack.c.l.b16 %v1146_v4 }
 0x200   :  { %v1120_v44 = vpop.permute.xlu1 %1119  ;;  %v1308_v45 = vpop.permute.xlu0 %1307 }
 0x201   :  { %v1506_v7 = vpack.c.b16 %v1505_v5, %v1504_v20  ;;  %v1137_v62 = vmul.f32 %v1120_v44, %v7933_v61  ;;  %v1327_v56 = vmul.f32 %v1308_v45, %v7823_v57 }
 0x203   :  { %v1141_v37 = vadd.f32 %v1137_v62, %v1133_v47  ;;  %1515 = vmatpush.bf16.xpose.msra.mxu0 %v1506_v7  ;;  %v1331_v10 = vadd.f32 %v1327_v56, %v1323_v43  ;;  %v1104_v56 = vpop.f32.mrf.mxu3 }
 0x205   :  { %v1145_v17 = vpack.c.bf16 %v1141_v37, %v1141_v37 }
 0x207   :  { %v1498_v42 = vunpack.c.l.b16 %v1145_v17 }
 0x208   :  { %v1268_v35 = vpop.permute.xlu1 %1267  ;;  %v1318_v48 = vpop.permute.xlu0 %1317 }
 0x209   :  { %v1500_v58 = vpack.c.b16 %v1499_v51, %v1498_v42  ;;  %v1336_v40 = vmul.f32 %v1318_v48, %v7859_v21  ;;  %v1287_v31 = vmul.f32 %v1268_v35, %v7823_v57 }
 0x20b   :  { %1516 = vmatmul.bf16.vlgmr.msra.gmra.mxu0 %v1500_v58  ;;  %v1340_v36 = vadd.f32 %v1336_v40, %v1332_v11  ;;  %v1291_v50 = vadd.f32 %v1287_v31, %v1283_v29 }
 0x20d   :  { %v1344_v1 = vpack.c.bf16 %v1340_v36, %v1340_v36 }
 0x20f   :  { %v1476_v19 = vunpack.c.l.b16 %v1344_v1 }
 0x210   :  { %v1276_v39 = vpop.permute.xlu1 %1275  ;;  %v8007_v36 = vpop.permute.xlu0 %1311 }
 0x211   :  { %v1295_v38 = vmul.f32 %v1276_v39, %v7843_v6 }
 0x213   :  { %v1299_v32 = vadd.f32 %v1295_v38, %v1291_v50 }
 0x215   :  { %v1303_v33 = vpack.c.bf16 %v1299_v32, %v1299_v32 }
 0x217   :  { %v1401_v20 = vunpack.c.l.b16 %v1303_v33 }
 0x218   :  { %v1316_v63 = vpop.permute.xlu1 %1315 }
 0x219   :  { %v1335_v46 = vmul.f32 %v1316_v63, %v7843_v6  ;;  %v7988_v6 = vpop.f32.mrf.mxu0 }
 0x21b   :  { %v1339_v23 = vadd.f32 %v1335_v46, %v1331_v10 }
 0x21d   :  { %v1343_v60 = vpack.c.bf16 %v1339_v23, %v1339_v23 }
 0x21f   :  { %v1475_v22 = vunpack.c.l.b16 %v1343_v60 }
 0x220   :  { %v1270_v24 = vpop.permute.xlu1 %1269 }
 0x221   :  { %v1477_v27 = vpack.c.b16 %v1476_v19, %v1475_v22  ;;  %v1288_v49 = vmul.f32 %v1270_v24, %v7838_v3  ;;  %v1085_v3 = vpop.f32.mrf.mxu2 }
 0x222   :  { %v8003_v43 = vadd.f32 %v1104_v56, %v1085_v3 }
 0x223   :  { %1489 = vmatpush.bf16.msrb.mxu3 %v1477_v27  ;;  %v1292_v30 = vadd.f32 %v1288_v49, %v1284_v9  ;;  %v1064_v9 = vpop.f32.mrf.mxu1 }
 0x228   :  { %v1278_v8 = vpop.permute.xlu1 %1277 }
 0x229   :  { %v1296_v28 = vmul.f32 %v1278_v8, %v7859_v21 }
 0x22b   :  { %v1300_v57 = vadd.f32 %v1296_v28, %v1292_v30 }
 0x22d   :  { %v1304_v13 = vpack.c.bf16 %v1300_v57, %v1300_v57  ;;  %v1066_v57 = vpop.f32.mrf.mxu1 }
 0x22f   :  { %v1402_v41 = vunpack.c.l.b16 %v1304_v13  ;;  %v8023_v13 = vadd.f32 %v1066_v57, %v7988_v6 }
 0x231   :  { %v1403_v14 = vpack.c.b16 %v1402_v41, %v1401_v20  ;;  %v8028_v20 = vadd.f32 %v1064_v9, %v7986_v26 }
 0x233   :  { %1415 = vmatpush.bf16.msrb.mxu1 %v1403_v14 }
 0x261   :  { %v1368_v5 = vpop.f32.mrf.mxu0 }
 0x262   :  { %v1373_v16 = vmul.f32 0.088388346, %v1368_v5 }
 0x264   :  { %v1376_v15 = vsel %vm1375_vm13, %v1373_v16, -inf }
 0x265   :  { %1377 = vmax.xlane.f32.xlu0 %v1376_v15 }
 0x267   :  { %v1443_v18 = vpop.f32.mrf.mxu2 }
 0x268   :  { %v1448_v62 = vmul.f32 0.088388346, %v1443_v18 }
 0x269   :  { %v1370_v21 = vpop.f32.mrf.mxu0 }
 0x26a   :  { %v1374_v44 = vmul.f32 0.088388346, %v1370_v21  ;;  %v1450_v17 = vsel %vm1375_vm13, %v1448_v62, -inf }
 0x26c   :  { %v1379_v47 = vsel %vm1375_vm13, %v1374_v44, -inf }
 0x26d   :  { %1380 = vmax.xlane.f32.xlu2 %v1379_v47 }
 0x26f   :  { %v1445_v7 = vpop.f32.mrf.mxu2 }
 0x270   :  { %v1449_v4 = vmul.f32 0.088388346, %v1445_v7 }
 0x272   :  { %v1453_v37 = vsel %vm1375_vm13, %v1449_v4, -inf }
 0x273   :  { %1454 = vmax.xlane.f32.xlu1 %v1453_v37 }
 0x275   :  { %1451 = vmax.xlane.f32.xlu2 %v1450_v17 }
 0x27d   :  { %v1591_v45 = vpop.f32.mrf.mxu2 }
 0x27e   :  { %v1596_v40 = vmul.f32 0.088388346, %v1591_v45 }
 0x280   :  { %v1598_v11 = vsel %vm1375_vm13, %v1596_v40, -inf }
 0x285   :  { %v1593_v51 = vpop.f32.mrf.mxu2 }
 0x286   :  { %v1597_v42 = vmul.f32 0.088388346, %v1593_v51 }
 0x288   :  { %v1517_v35 = vpop.f32.mrf.mxu0  ;;  %v1601_v58 = vsel %vm1375_vm13, %v1597_v42, -inf }
 0x289   :  { %v7995_v59 = vmul.f32 0.088388346, %v1517_v35  ;;  %1602 = vmax.xlane.f32.xlu0 %v1601_v58 }
 0x28b   :  { %v1524_v48 = vsel %vm1375_vm13, %v7995_v59, -inf }
 0x28c   :  { %1525 = vmax.xlane.f32.xlu2 %v1524_v48 }
 0x290   :  { %v1519_v39 = vpop.f32.mrf.mxu0 }
 0x291   :  { %v1523_v25 = vmul.f32 0.088388346, %v1519_v39 }
 0x293   :  { %v1527_v52 = vsel %vm1375_vm13, %v1523_v25, -inf }
 0x294   :  { %1528 = vmax.xlane.f32.xlu1 %v1527_v52 }
 0x29c   :  { %1599 = vmax.xlane.f32.xlu1 %v1598_v11 }
 0x29d   :  { %1319 = vrot.lane.b32.xlu0 %v7814_v0, %s6738_s6 }
 0x2a5   :  { %1321 = vrot.lane.b32.xlu0 %v8003_v43, %s6738_s6 }
 0x2d8   :  { %v1378_v63 = vpop.xlane.xlu0 %1377 }
 0x2d9   :  { %v1382_v10 = vsub.f32 %v1373_v16, %v1378_v63 }
 0x2db   :  { %v1384_v46 = vmul.f32 1.442695, %v1382_v10  ;;  %v1329_v10 = vmul.f32 %v8007_v36, %v7897_v2 }
 0x2dd   :  { %6542 = vpow2.f32 %v1384_v46 }
 0x2e0   :  { %v1381_v1 = vpop.xlane.xlu2 %1380 }
 0x2e1   :  { %v1383_v23 = vsub.f32 %v1374_v44, %v1381_v1  ;;  %v1325_v1 = vmul.f32 %v7814_v0, %v7911_v12 }
 0x2e3   :  { %v8009_v60 = vpop.eup %6542  ;;  %v1386_v19 = vmul.f32 1.442695, %v1383_v23 }
 0x2e4   :  { %v1388_v22 = vsel %vm1375_vm13, %v8009_v60, 0.0 }
 0x2e5   :  { %6544 = vpow2.f32 %v1386_v19  ;;  %1389 = vadd.xlane.f32.xlu1 %v1388_v22  ;;  %v1333_v22 = vadd.f32 %v1329_v10, %v1325_v1  ;;  %v5110_v1 = vld [vmem:[#allocation2 + $0xf8] sm:$0xf0] }
 0x2e6   :  { %v1455_v24 = vpop.xlane.xlu1 %1454 }
 0x2e7   :  { %v1457_v31 = vsub.f32 %v1449_v4, %v1455_v24 }
 0x2e8   :  { %v1452_v27 = vpop.xlane.xlu2 %1451 }
 0x2e9   :  { %v1460_v29 = vmul.f32 1.442695, %v1457_v31  ;;  %v1456_v38 = vsub.f32 %v1448_v62, %v1452_v27 }
 0x2eb   :  { %v6545_v50 = vpop.eup %6544  ;;  %6546 = vpow2.f32 %v1460_v29  ;;  %v1458_v49 = vmul.f32 1.442695, %v1456_v38  ;;  %v1326_v29 = vmul.f32 %v8003_v43, %v7923_v54 }
 0x2ec   :  { %v1391_v32 = vsel %vm1375_vm13, %v6545_v50, 0.0 }
 0x2ed   :  { %6548 = vpow2.f32 %v1458_v49  ;;  %1392 = vadd.xlane.f32.xlu2 %v1391_v32 }
 0x2f1   :  { %v8014_v8 = vpop.eup %6546 }
 0x2f2   :  { %v1465_v30 = vsel %vm1375_vm13, %v8014_v8, 0.0 }
 0x2f3   :  { %v8018_v28 = vpop.eup %6548  ;;  %1466 = vadd.xlane.f32.xlu0 %v1465_v30 }
 0x2f4   :  { %v1462_v33 = vsel %vm1375_vm13, %v8018_v28, 0.0 }
 0x2f5   :  { %1463 = vadd.xlane.f32.xlu2 %v1462_v33 }
 0x2fc   :  { %v1603_v41 = vpop.xlane.xlu0 %1602 }
 0x2fd   :  { %v1605_v14 = vsub.f32 %v1597_v42, %v1603_v41 }
 0x2fe   :  { %1273 = vrot.lane.b32.xlu1 %v8023_v13, %s6739_s21 }
 0x2ff   :  { %v1608_v6 = vmul.f32 1.442695, %v1605_v14  ;;  %v1526_v7 = vpop.xlane.xlu2 %1525  ;;  %v1285_v14 = vmul.f32 %v8028_v20, %v7911_v12  ;;  %v5044_v12 = vld [vmem:[#allocation2 + $0x70] sm:$0xf] }
 0x300   :  { %v1530_v62 = vsub.f32 %v7995_v59, %v1526_v7 }
 0x301   :  { %6550 = vpow2.f32 %v1608_v6 }
 0x302   :  { %v1532_v17 = vmul.f32 1.442695, %v1530_v62 }
 0x307   :  { %1271 = vrot.lane.b32.xlu0 %v8028_v20, %s6739_s21  ;;  %v1529_v3 = vpop.xlane.xlu1 %1528  ;;  %v8038_v15 = vpop.eup %6550 }
 0x308   :  { %v1531_v5 = vsub.f32 %v1523_v25, %v1529_v3  ;;  %v1613_v21 = vsel %vm1375_vm13, %v8038_v15, 0.0 }
 0x30a   :  { %v1534_v16 = vmul.f32 1.442695, %v1531_v5 }
 0x30c   :  { %6552 = vpow2.f32 %v1534_v16 }
 0x30d   :  { %1313 = vrot.lane.b32.xlu2 %v8003_v43, %s6739_s21 }
 0x30f   :  { %1279 = vrot.lane.b32.xlu0 %v8028_v20, %s6738_s6  ;;  %v1600_v26 = vpop.xlane.xlu1 %1599  ;;  %v1320_v35 = vpop.permute.xlu0 %1319  ;;  %v6248_v20 = vld [vmem:[#allocation2 + $0x74] sm:$0xf] }
 0x310   :  { %v1604_v18 = vsub.f32 %v1596_v40, %v1600_v26  ;;  %v1337_v23 = vmul.f32 %v1320_v35, %v7933_v61  ;;  %v1286_v26 = vmul.f32 %v8023_v13, %v7923_v54  ;;  %v5036_v35 = vld [vmem:[#allocation2 + $0x60] sm:$0xf] }
 0x312   :  { %v1606_v44 = vmul.f32 1.442695, %v1604_v18  ;;  %v8042_v47 = vpop.eup %6552  ;;  %v1341_v27 = vadd.f32 %v1337_v23, %v1333_v22  ;;  %v6243_v22 = vld [vmem:[#allocation2 + $0x44] sm:$0xf0] }
 0x313   :  { %v1539_v4 = vsel %vm1375_vm13, %v8042_v47, 0.0 }
 0x314   :  { %6554 = vpow2.f32 %v1606_v44  ;;  %v1345_v0 = vpack.c.bf16 %v1341_v27, %v1341_v27  ;;  %v6263_v27 = vld [vmem:[#allocation2 + $0xe4] sm:$0xf0] }
 0x315   :  { %6556 = vpow2.f32 %v1532_v17 }
 0x316   :  { %v1623_v30 = vunpack.c.l.b16 %v1345_v0  ;;  %v5102_v0 = vld [vmem:[#allocation2 + $0xe8] sm:$0xf0] }
 0x317   :  { %1281 = vrot.lane.b32.xlu0 %v8023_v13, %s6738_s6  ;;  %v1322_v59 = vpop.permute.xlu0 %1321  ;;  %v6246_v13 = vld [vmem:[#allocation2 + $0x64] sm:$0xf] }
 0x31a   :  { %v8047_v37 = vpop.eup %6554 }
 0x31b   :  { %v1610_v45 = vsel %vm1375_vm13, %v8047_v37, 0.0  ;;  %v8051_v51 = vpop.eup %6556 }
 0x31c   :  { %v1536_v42 = vsel %vm1375_vm13, %v8051_v51, 0.0 }
 0x328   :  { %1614 = vadd.xlane.f32.xlu1 %v1613_v21 }
 0x330   :  { %1540 = vadd.xlane.f32.xlu1 %v1539_v4 }
 0x336   :  { %1611 = vadd.xlane.f32.xlu2 %v1610_v45 }
 0x341   :  { %1537 = vadd.xlane.f32.xlu0 %v1536_v42  ;;  %v5046_v42 = vld [vmem:[#allocation2 + $0x78] sm:$0xf0] }
 0x342   :  { %v5049_v54 = vor.u32 %v6248_v20, %v5046_v42  ;;  %v6261_v20 = vld [vmem:[#allocation2 + $0xd4] sm:$0xf0] }
 0x344   :  { %1878 = vmatpush.bf16.msrb.mxu2 %v5049_v54  ;;  %v6237_v54 = vld [vmem:[#allocation2 + $0x14] sm:$0xf0] }
 0x358   :  { %v1390_v58 = vpop.xlane.xlu1 %1389 }
 0x359   :  { %6558 = vrcp.f32 %v1390_v58  ;;  %v6247_v58 = vld [vmem:[#allocation2 + $0x64] sm:$0xf0] }
 0x35f   :  { %v6559_v39 = vpop.eup %6558 }
 0x360   :  { %v1393_v48 = vpop.xlane.xlu2 %1392  ;;  %v1396_v40 = vmul.f32 %v6559_v39, %v8009_v60  ;;  %v5028_v39 = vld [vmem:[#allocation2 + $0x50] sm:$0xf] }
 0x361   :  { %6560 = vrcp.f32 %v1393_v48  ;;  %v5037_v48 = vor.u32 %v6247_v58, %v5036_v35  ;;  %v5094_v35 = vld [vmem:[#allocation2 + $0xd8] sm:$0xf0]  ;;  %v4996_v58 = vld [vmem:[#allocation2 + $0x10] sm:$0xf] }
 0x366   :  { %v1467_v25 = vpop.xlane.xlu0 %1466 }
 0x367   :  { %v6561_v52 = vpop.eup %6560  ;;  %6562 = vrcp.f32 %v1467_v25  ;;  %v6245_v25 = vld [vmem:[#allocation2 + $0x54] sm:$0xf0] }
 0x368   :  { %v1397_v11 = vmul.f32 %v6561_v52, %v6545_v50  ;;  %v1464_v56 = vpop.xlane.xlu2 %1463  ;;  %v1338_v50 = vmul.f32 %v1322_v59, %v7928_v55  ;;  %v5038_v59 = vld [vmem:[#allocation2 + $0x68] sm:$0xf0]  ;;  %v6244_v52 = vld [vmem:[#allocation2 + $0x54] sm:$0xf]  ;;  %v5029_v23 = vor.u32 %v6245_v25, %v5028_v39  ;;  %v6259_v39 = vld [vmem:[#allocation2 + $0xc4] sm:$0xf0] }
 0x369   :  { %6564 = vrcp.f32 %v1464_v56  ;;  %v5108_v56 = vld [vmem:[#allocation2 + $0xf0] sm:$0xf]  ;;  %v6258_v25 = vld [vmem:[#allocation2 + $0xc4] sm:$0xf] }
 0x36a   :  { %v1398_v63 = vpack.c.bf16 %v1397_v11, %v1396_v40  ;;  %v5030_v11 = vld [vmem:[#allocation2 + $0x58] sm:$0xf0] }
 0x36c   :  { %4982 = vmatmul.msk.bf16.vlgmr.msrb.gmra.mxu1 %vm1375_vm13, %v1398_v63  ;;  %v6265_v63 = vld [vmem:[#allocation2 + $0xf4] sm:$0xf0] }
 0x36d   :  { %v6563_v46 = vpop.eup %6562  ;;  %v5109_v10 = vor.u32 %v6265_v63, %v5108_v56  ;;  %v4988_v56 = vld [vmem:[#allocation2] sm:$0xf]  ;;  %v6235_v63 = vld [vmem:[#allocation2 + $0x4] sm:$0xf0] }
 0x36e   :  { %v1471_v24 = vmul.f32 %v6563_v46, %v8014_v8  ;;  %v6264_v46 = vld [vmem:[#allocation2 + $0xf4] sm:$0xf] }
 0x36f   :  { %v6565_v19 = vpop.eup %6564 }
 0x370   :  { %v1470_v60 = vmul.f32 %v6565_v19, %v8018_v28  ;;  %v1314_v31 = vpop.permute.xlu2 %1313  ;;  %v1274_v43 = vpop.permute.xlu1 %1273  ;;  %v5020_v19 = vld [vmem:[#allocation2 + $0x40] sm:$0xf] }
 0x371   :  { %v1330_v36 = vmul.f32 %v1314_v31, %v7918_v53  ;;  %v1290_v6 = vmul.f32 %v1274_v43, %v7918_v53  ;;  %v5100_v31 = vld [vmem:[#allocation2 + $0xe0] sm:$0xf] }
 0x372   :  { %v1472_v38 = vpack.c.bf16 %v1471_v24, %v1470_v60  ;;  %v5113_v24 = vor.u32 %v6264_v46, %v5110_v1  ;;  %v5033_v60 = vor.u32 %v6244_v52, %v5030_v11  ;;  %v5086_v52 = vld [vmem:[#allocation2 + $0xc8] sm:$0xf0]  ;;  %v4989_v46 = vor.u32 %v6235_v63, %v4988_v56 }
 0x373   :  { %v1334_v49 = vadd.f32 %v1330_v36, %v1326_v29  ;;  %v1294_v21 = vadd.f32 %v1290_v6, %v1286_v26  ;;  %v6262_v29 = vld [vmem:[#allocation2 + $0xe4] sm:$0xf]  ;;  %v5089_v11 = vor.u32 %v6258_v25, %v5086_v52  ;;  %v4990_v1 = vld [vmem:[#allocation2 + $0x8] sm:$0xf0] }
 0x374   :  { %4983 = vmatmul.msk.bf16.vlgmr.msrb.gmra.mxu3 %vm1375_vm13, %v1472_v38  ;;  %v6242_v38 = vld [vmem:[#allocation2 + $0x44] sm:$0xf]  ;;  %v103_v56 = vld [vmem:[%s9521_s0 + $0x88] sm:$0xff] }
 0x375   :  { %v1342_v32 = vadd.f32 %v1338_v50, %v1334_v49  ;;  %v5022_v50 = vld [vmem:[#allocation2 + $0x48] sm:$0xf0]  ;;  %v5101_v49 = vor.u32 %v6263_v27, %v5100_v31  ;;  %v5078_v31 = vld [vmem:[#allocation2 + $0xb8] sm:$0xf0] }
 0x377   :  { %v1346_v9 = vpack.c.bf16 %v1342_v32, %v1342_v32  ;;  %v5105_v32 = vor.u32 %v6262_v29, %v5102_v0  ;;  %v5068_v29 = vld [vmem:[#allocation2 + $0xa0] sm:$0xf] }
 0x379   :  { %v1624_v8 = vunpack.c.l.b16 %v1346_v9  ;;  %v1272_v33 = vpop.permute.xlu0 %1271  ;;  %v5021_v9 = vor.u32 %v6243_v22, %v5020_v19  ;;  %v5076_v19 = vld [vmem:[#allocation2 + $0xb0] sm:$0xf]  ;;  %v6257_v22 = vld [vmem:[#allocation2 + $0xb4] sm:$0xf0] }
 0x37a   :  { %v1289_v41 = vmul.f32 %v1272_v33, %v7897_v2  ;;  %v6241_v33 = vld [vmem:[#allocation2 + $0x34] sm:$0xf0] }
 0x37b   :  { %v1625_v28 = vpack.c.b16 %v1624_v8, %v1623_v30  ;;  %v5025_v30 = vor.u32 %v6242_v38, %v5022_v50  ;;  %v5012_v8 = vld [vmem:[#allocation2 + $0x30] sm:$0xf]  ;;  %v6254_v38 = vld [vmem:[#allocation2 + $0xa4] sm:$0xf] }
 0x37c   :  { %v1293_v5 = vadd.f32 %v1289_v41, %v1285_v14  ;;  %v5013_v43 = vor.u32 %v6241_v33, %v5012_v8  ;;  %v5062_v33 = vld [vmem:[#allocation2 + $0x98] sm:$0xf0] }
 0x37d   :  { %1637 = vmatpush.bf16.msra.mxu3 %v1625_v28  ;;  %v6240_v28 = vld [vmem:[#allocation2 + $0x34] sm:$0xf] }
 0x381   :  { %v1280_v57 = vpop.permute.xlu0 %1279  ;;  %1897 = vmatpush.bf16.msrb.mxu3 %v5113_v24  ;;  %v6256_v24 = vld [vmem:[#allocation2 + $0xb4] sm:$0xf] }
 0x382   :  { %v1297_v3 = vmul.f32 %v1280_v57, %v7933_v61  ;;  %v6249_v61 = vld [vmem:[#allocation2 + $0x74] sm:$0xf0]  ;;  %v5014_v57 = vld [vmem:[#allocation2 + $0x38] sm:$0xf0]  ;;  %v5081_v27 = vor.u32 %v6256_v24, %v5078_v31 }
 0x383   :  { %v5045_v53 = vor.u32 %v6249_v61, %v5044_v12  ;;  %v5017_v6 = vor.u32 %v6240_v28, %v5014_v57  ;;  %v5092_v61 = vld [vmem:[#allocation2 + $0xd0] sm:$0xf]  ;;  %v5052_v57 = vld [vmem:[#allocation2 + $0x80] sm:$0xf] }
 0x384   :  { %v1301_v16 = vadd.f32 %v1297_v3, %v1293_v5  ;;  %v5093_v42 = vor.u32 %v6261_v20, %v5092_v61  ;;  %v90_v61 = vld [vmem:[%s9521_s0 + $0x20] sm:$0xff] }
 0x385   :  { %1840 = vmatpush.bf16.msrb.mxu0 %v5045_v53  ;;  %1898 = vmatpush.bf16.msrb.mxu3 %v5105_v32  ;;  %v6260_v53 = vld [vmem:[#allocation2 + $0xd4] sm:$0xf]  ;;  %v5060_v32 = vld [vmem:[#allocation2 + $0x90] sm:$0xf] }
 0x386   :  { %v1305_v7 = vpack.c.bf16 %v1301_v16, %v1301_v16 }
 0x388   :  { %v1549_v4 = vunpack.c.l.b16 %v1305_v7 }
 0x389   :  { %v1282_v18 = vpop.permute.xlu0 %1281  ;;  %1841 = vmatpush.bf16.msrb.mxu0 %v5037_v48  ;;  %v5084_v48 = vld [vmem:[#allocation2 + $0xc0] sm:$0xf] }
 0x38a   :  { %v1298_v44 = vmul.f32 %v1282_v18, %v7928_v55  ;;  %v5041_v55 = vor.u32 %v6246_v13, %v5038_v59  ;;  %v6236_v13 = vld [vmem:[#allocation2 + $0x14] sm:$0xf]  ;;  %v4998_v59 = vld [vmem:[#allocation2 + $0x18] sm:$0xf0] }
 0x38c   :  { %v1302_v62 = vadd.f32 %v1298_v44, %v1294_v21  ;;  %1879 = vmatpush.bf16.msrb.mxu2 %v5041_v55  ;;  %v5001_v55 = vor.u32 %v6236_v13, %v4998_v59  ;;  %v6647_v13 = vld [vmem:[%s9522_s1 + $0x8] sm:$0xff] }
 0x38d   :  { %1842 = vmatpush.bf16.msrb.mxu0 %v5029_v23 }
 0x38e   :  { %v1306_v2 = vpack.c.bf16 %v1302_v62, %v1302_v62 }
 0x390   :  { %v1550_v17 = vunpack.c.l.b16 %v1306_v2  ;;  %1880 = vmatpush.bf16.msrb.mxu2 %v5033_v60  ;;  %v5077_v60 = vor.u32 %v6257_v22, %v5076_v19  ;;  %v6648_v22 = vld [vmem:[%s9522_s1 + $0x18] sm:$0xff] }
 0x391   :  { %1843 = vmatpush.bf16.msrb.mxu0 %v5021_v9  ;;  %v6253_v9 = vld [vmem:[#allocation2 + $0x94] sm:$0xf0] }
 0x392   :  { %v1551_v45 = vpack.c.b16 %v1550_v17, %v1549_v4  ;;  %v6239_v4 = vld [vmem:[#allocation2 + $0x24] sm:$0xf0]  ;;  %v5061_v8 = vor.u32 %v6253_v9, %v5060_v32  ;;  %v114_v32 = vld [vmem:[%s9521_s0 + $0xe0] sm:$0xff] }
 0x394   :  { %1563 = vmatpush.bf16.msra.mxu1 %v1551_v45  ;;  %1881 = vmatpush.bf16.msrb.mxu2 %v5025_v30  ;;  %v5006_v45 = vld [vmem:[#allocation2 + $0x28] sm:$0xf0]  ;;  %v6252_v30 = vld [vmem:[#allocation2 + $0x94] sm:$0xf] }
 0x395   :  { %1844 = vmatpush.bf16.msrb.mxu0 %v5013_v43  ;;  %v5065_v28 = vor.u32 %v6252_v30, %v5062_v33  ;;  %v6250_v43 = vld [vmem:[#allocation2 + $0x84] sm:$0xf] }
 0x398   :  { %1859 = vmatpush.bf16.msrb.mxu1 %v5109_v10  ;;  %1882 = vmatpush.bf16.msrb.mxu2 %v5017_v6  ;;  %v6234_v10 = vld [vmem:[#allocation2 + $0x4] sm:$0xf] }
 0x399   :  { %v4993_v23 = vor.u32 %v6234_v10, %v4990_v1 }
 0x39b   :  { %v1615_v40 = vpop.xlane.xlu1 %1614 }
 0x39c   :  { %6566 = vrcp.f32 %v1615_v40  ;;  %1860 = vmatpush.bf16.msrb.mxu1 %v5101_v49  ;;  %v5085_v40 = vor.u32 %v6259_v39, %v5084_v48  ;;  %v5070_v49 = vld [vmem:[#allocation2 + $0xa8] sm:$0xf0] }
 0x39d   :  { %v5073_v0 = vor.u32 %v6254_v38, %v5070_v49 }
 0x3a0   :  { %1861 = vmatpush.bf16.msrb.mxu1 %v5093_v42 }
 0x3a2   :  { %v6567_v41 = vpop.eup %6566 }
 0x3a3   :  { %v1541_v3 = vpop.xlane.xlu1 %1540  ;;  %v1619_v5 = vmul.f32 %v6567_v41, %v8038_v15  ;;  %v5004_v15 = vld [vmem:[#allocation2 + $0x20] sm:$0xf]  ;;  %v6251_v41 = vld [vmem:[#allocation2 + $0x84] sm:$0xf0] }
 0x3a4   :  { %v5005_v17 = vor.u32 %v6239_v4, %v5004_v15  ;;  %1862 = vmatpush.bf16.msrb.mxu1 %v5085_v40 }
 0x3a6   :  { %1845 = vmatpush.bf16.msrb.mxu0 %v5005_v17 }
 0x3a8   :  { %1863 = vmatpush.bf16.msrb.mxu1 %v5077_v60  ;;  %v6649_v60 = vld [vmem:[%s9522_s1 + $0x10] sm:$0xff] }
 0x3a9   :  { %v1612_v36 = vpop.xlane.xlu2 %1611 }
 0x3aa   :  { %6568 = vrcp.f32 %v1612_v36  ;;  %v6255_v36 = vld [vmem:[#allocation2 + $0xa4] sm:$0xf0] }
 0x3ab   :  { %6570 = vrcp.f32 %v1541_v3  ;;  %v5069_v50 = vor.u32 %v6255_v36, %v5068_v29  ;;  %v5054_v3 = vld [vmem:[#allocation2 + $0x88] sm:$0xf0] }
 0x3ac   :  { %v5057_v6 = vor.u32 %v6250_v43, %v5054_v3  ;;  %v6650_v43 = vld [vmem:[%s9522_s1 + $0x20] sm:$0xff] }
 0x3ad   :  { %1864 = vmatpush.bf16.msrb.mxu1 %v5069_v50 }
 0x3b0   :  { %v6569_v14 = vpop.eup %6568 }
 0x3b1   :  { %v1618_v26 = vmul.f32 %v6569_v14, %v8047_v37  ;;  %v6571_v21 = vpop.eup %6570  ;;  %v6238_v37 = vld [vmem:[#allocation2 + $0x24] sm:$0xf]  ;;  %1865 = vmatpush.bf16.msrb.mxu1 %v5061_v8  ;;  %v5053_v14 = vor.u32 %v6251_v41, %v5052_v57  ;;  %v115_v8 = vld [vmem:[%s9521_s0 + $0xe8] sm:$0xff] }
 0x3b2   :  { %v1545_v7 = vmul.f32 %v6571_v21, %v8042_v47  ;;  %v5009_v12 = vor.u32 %v6238_v37, %v5006_v45  ;;  %v5097_v47 = vor.u32 %v6260_v53, %v5094_v35  ;;  %v91_v53 = vld [vmem:[%s9521_s0 + $0x28] sm:$0xff] }
 0x3b3   :  { %v1620_v16 = vpack.c.bf16 %v1619_v5, %v1618_v26 }
 0x3b4   :  { %v1538_v18 = vpop.xlane.xlu0 %1537  ;;  %1883 = vmatpush.bf16.msrb.mxu2 %v5009_v12  ;;  %1899 = vmatpush.bf16.msrb.mxu3 %v5097_v47  ;;  %v6646_v47 = vld [vmem:[%s9522_s1] sm:$0xff] }
 0x3b5   :  { %6572 = vrcp.f32 %v1538_v18  ;;  %4985 = vmatmul.msk.bf16.vlgmr.msra.gmra.mxu3 %vm1375_vm13, %v1620_v16  ;;  %1866 = vmatpush.bf16.msrb.mxu1 %v5053_v14 }
 0x3b8   :  { %1884 = vmatpush.bf16.msrb.mxu2 %v5001_v55  ;;  %1900 = vmatpush.bf16.msrb.mxu3 %v5089_v11 }
 0x3bb   :  { %v6573_v44 = vpop.eup %6572 }
 0x3bc   :  { %v1544_v62 = vmul.f32 %v6573_v44, %v8051_v51  ;;  %v4997_v51 = vor.u32 %v6237_v54, %v4996_v58  ;;  %1885 = vmatpush.bf16.msrb.mxu2 %v4993_v23  ;;  %1901 = vmatpush.bf16.msrb.mxu3 %v5081_v27 }
 0x3be   :  { %v1546_v2 = vpack.c.bf16 %v1545_v7, %v1544_v62  ;;  %1846 = vmatpush.bf16.msrb.mxu0 %v4997_v51 }
 0x3c0   :  { %4984 = vmatmul.msk.bf16.vlgmr.msra.gmra.mxu1 %vm1375_vm13, %v1546_v2  ;;  %1902 = vmatpush.bf16.msrb.mxu3 %v5073_v0 }
 0x3c2   :  { %1847 = vmatpush.bf16.msrb.mxu0 %v4989_v46  ;;  %v102_v46 = vld [vmem:[%s9521_s0 + $0x80] sm:$0xff] }
 0x3c4   :  { %1903 = vmatpush.bf16.msrb.mxu3 %v5065_v28 }
 0x3c8   :  { %1904 = vmatpush.bf16.msrb.mxu3 %v5057_v6 }
 0x3e9   :  { %v1417_v5 = vpop.f32.mrf.mxu1 }
 0x3f1   :  { %v1419_v26 = vpop.f32.mrf.mxu1 }
 0x3f2   :  { %v1676_v16 = vpack.c.bf16 %v1419_v26, %v1417_v5  ;;  %v126_v5 = vld [vmem:[%s9521_s0 + $0x140] sm:$0xff]  ;;  %v6651_v26 = vld [vmem:[%s9522_s1 + $0x28] sm:$0xff] }
 0x3f4   :  { %1848 = vmatmul.bf16.vlgmr.msrb.gmra.mxu0 %v1676_v16  ;;  %1886 = vmatmul.bf16.vlgmr.msrb.gmra.mxu2 %v1676_v16 }
 0x3f7   :  { %v1491_v18 = vpop.f32.mrf.mxu3 }
 0x3ff   :  { %v1493_v21 = vpop.f32.mrf.mxu3 }
 0x400   :  { %v1677_v44 = vpack.c.bf16 %v1493_v21, %v1491_v18 }
 0x402   :  { %1867 = vmatmul.bf16.vlgmr.msrb.gmra.mxu1 %v1677_v44  ;;  %1905 = vmatmul.bf16.vlgmr.msrb.gmra.mxu3 %v1677_v44 }
 0x438   :  { %v1639_v7 = vpop.f32.mrf.mxu3 }
 0x43d   :  { %v1565_v62 = vpop.f32.mrf.mxu1 }
 0x440   :  { %v1641_v2 = vpop.f32.mrf.mxu3 }
 0x441   :  { %v1679_v15 = vpack.c.bf16 %v1641_v2, %v1639_v7  ;;  %v127_v2 = vld [vmem:[%s9521_s0 + $0x148] sm:$0xff] }
 0x443   :  { %1872 = vmatmul.bf16.gmra.mxu1 %v1679_v15  ;;  %1910 = vmatmul.bf16.gmra.mxu3 %v1679_v15 }
 0x445   :  { %v1567_v4 = vpop.f32.mrf.mxu1 }
 0x446   :  { %v1678_v37 = vpack.c.bf16 %v1567_v4, %v1565_v62 }
 0x448   :  { %1853 = vmatmul.bf16.gmra.mxu0 %v1678_v37  ;;  %1891 = vmatmul.bf16.gmra.mxu2 %v1678_v37 }
 0x471   :  { %v1849_v45 = vpop.f32.mrf.mxu0 }
 0x477   :  { %v1887_v20 = vpop.f32.mrf.mxu2 }
 0x479   :  { %v1851_v11 = vpop.f32.mrf.mxu0 }
 0x47f   :  { %v1868_v17 = vpop.f32.mrf.mxu1  ;;  %v1889_v39 = vpop.f32.mrf.mxu2 }
 0x480   :  { %v1869_v12 = vadd.f32 %v1868_v17, %v1849_v45  ;;  %v6652_v17 = vld [vmem:[%s9522_s1 + $0x30] sm:$0xff] }
 0x482   :  { %v1916_v35 = vmul.f32 %v1869_v12, %v90_v61  ;;  %v6653_v61 = vld [vmem:[%s9522_s1 + $0x38] sm:$0xff]  ;;  %s6741_s1 = smov 256  }
 0x484   :  { %v8092_v51 = vadd.f32 %v6646_v47, %v1916_v35  ;;  %v6326_v47 = vld [vmem:[%s9530_s9 + $0x1dc] sm:$0xf0] }
 0x485   :  { %v1906_v42 = vpop.f32.mrf.mxu3 }
 0x486   :  { %v1907_v58 = vadd.f32 %v1906_v42, %v1887_v20  ;;  %v1949_v10 = vmul.f32 %v8092_v51, %v8092_v51 }
 0x487   :  { %v1870_v25 = vpop.f32.mrf.mxu1 }
 0x488   :  { %v1917_v54 = vmul.f32 %v1907_v58, %v91_v53  ;;  %v1871_v63 = vadd.f32 %v1870_v25, %v1851_v11  ;;  %v5342_v25 = vld [vmem:[%s9530_s9 + $0x1e0] sm:$0xf0] }
 0x489   :  { %v6386_v11 = vld [vmem:[%s9530_s9 + $0x3c4] sm:$0xf] }
 0x48a   :  { %v8097_v59 = vadd.f32 %v6647_v13, %v1917_v54  ;;  %v1918_v19 = vmul.f32 %v1871_v63, %v102_v46  ;;  %v5340_v54 = vld [vmem:[%s9530_s9 + $0x1c0] sm:$0xf] }
 0x48b   :  { %v5596_v13 = vld [vmem:[%s9530_s9 + $0x3c0] sm:$0xf] }
 0x48c   :  { %v1933_v48 = vadd.f32 %v8097_v59, %v8092_v51  ;;  %v1950_v40 = vmul.f32 %v8097_v59, %v8097_v59  ;;  %v8119_v31 = vadd.f32 %v6649_v60, %v1918_v19  ;;  %v6318_v46 = vld [vmem:[%s9530_s9 + $0x19c] sm:$0xf0]  ;;  %v5310_v60 = vld [vmem:[%s9530_s9 + $0x1a0] sm:$0xf0] }
 0x48d   :  { %v1908_v55 = vpop.f32.mrf.mxu3  ;;  %v6382_v19 = vld [vmem:[%s9530_s9 + $0x39c] sm:$0xf0] }
 0x48e   :  { %1934 = vadd.xlane.f32.xlu2 %v1933_v48  ;;  %v1909_v52 = vadd.f32 %v1908_v55, %v1889_v39  ;;  %v1957_v23 = vadd.f32 %v1950_v40, %v1949_v10  ;;  %v1951_v36 = vmul.f32 %v8119_v31, %v8119_v31  ;;  %v5341_v48 = vor.u32 %v6326_v47, %v5340_v54  ;;  %v6390_v55 = vld [vmem:[%s9530_s9 + $0x3dc] sm:$0xf0]  ;;  %v6322_v39 = vld [vmem:[%s9530_s9 + $0x1c4] sm:$0xf] }
 0x48f   :  { %v5345_v40 = vor.u32 %v6322_v39, %v5342_v25  ;;  %v5308_v10 = vld [vmem:[%s9530_s9 + $0x180] sm:$0xf]  ;;  %v5214_v25 = vld [vmem:[%s9530_s9 + $0xe0] sm:$0xf0] }
 0x490   :  { %v1919_v1 = vmul.f32 %v1909_v52, %v103_v56  ;;  %v5597_v52 = vor.u32 %v6390_v55, %v5596_v13  ;;  %v5598_v56 = vld [vmem:[%s9530_s9 + $0x3e0] sm:$0xf0]  ;;  %2868 = vmatpush.bf16.msra.mxu0 %v5341_v48  ;;  %v5468_v47 = vld [vmem:[%s9530_s9 + $0x2c0] sm:$0xf] }
 0x491   :  { %v5601_v63 = vor.u32 %v6386_v11, %v5598_v56  ;;  %2906 = vmatpush.bf16.msra.mxu2 %v5345_v40  ;;  %v6358_v13 = vld [vmem:[%s9530_s9 + $0x2dc] sm:$0xf0]  ;;  %v6290_v48 = vld [vmem:[%s9530_s9 + $0xc4] sm:$0xf] }
 0x492   :  { %v8114_v24 = vadd.f32 %v6648_v22, %v1919_v1  ;;  %2887 = vmatpush.bf16.msra.mxu1 %v5597_v52  ;;  %v5564_v1 = vld [vmem:[%s9530_s9 + $0x380] sm:$0xf]  ;;  %v6314_v22 = vld [vmem:[%s9530_s9 + $0x184] sm:$0xf]  ;;  %v5469_v39 = vor.u32 %v6358_v13, %v5468_v47  ;;  %v5217_v11 = vor.u32 %v6290_v48, %v5214_v25 }
 0x493   :  { %2925 = vmatpush.bf16.msra.mxu3 %v5601_v63  ;;  %v6354_v52 = vld [vmem:[%s9530_s9 + $0x2c4] sm:$0xf] }
 0x494   :  { %v1936_v27 = vadd.f32 %v8114_v24, %v8119_v31  ;;  %v1952_v29 = vmul.f32 %v8114_v24, %v8114_v24  ;;  %v5470_v40 = vld [vmem:[%s9530_s9 + $0x2e0] sm:$0xf0] }
 0x495   :  { %v5473_v56 = vor.u32 %v6354_v52, %v5470_v40 }
 0x496   :  { %1958 = vadd.xlane.f32.xlu2 %v1957_v23  ;;  %v1960_v38 = vadd.f32 %v1952_v29, %v1951_v36  ;;  %v5309_v23 = vor.u32 %v6318_v46, %v5308_v10  ;;  %v5313_v29 = vor.u32 %v6314_v22, %v5310_v60  ;;  %v6378_v36 = vld [vmem:[%s9530_s9 + $0x384] sm:$0xf]  ;;  %v5180_v10 = vld [vmem:[%s9530_s9 + $0x80] sm:$0xf] }
 0x497   :  { %v6286_v46 = vld [vmem:[%s9530_s9 + $0x9c] sm:$0xf0]  ;;  %v6282_v22 = vld [vmem:[%s9530_s9 + $0x84] sm:$0xf] }
 0x498   :  { %2869 = vmatpush.bf16.msra.mxu0 %v5309_v23  ;;  %2907 = vmatpush.bf16.msra.mxu2 %v5313_v29  ;;  %v5436_v23 = vld [vmem:[%s9530_s9 + $0x280] sm:$0xf]  ;;  %v6346_v29 = vld [vmem:[%s9530_s9 + $0x284] sm:$0xf] }
 0x49e   :  { %1937 = vadd.xlane.f32.xlu2 %v1936_v27  ;;  %v5565_v27 = vor.u32 %v6382_v19, %v5564_v1  ;;  %v5181_v1 = vor.u32 %v6286_v46, %v5180_v10  ;;  %v6350_v19 = vld [vmem:[%s9530_s9 + $0x29c] sm:$0xf0] }
 0x49f   :  { %v5437_v60 = vor.u32 %v6350_v19, %v5436_v23  ;;  %v94_v19 = vld [vmem:[%s9521_s0 + $0x40] sm:$0xff] }
 0x4a0   :  { %2888 = vmatpush.bf16.msra.mxu1 %v5565_v27  ;;  %v5182_v27 = vld [vmem:[%s9530_s9 + $0xa0] sm:$0xf0] }
 0x4a6   :  { %1961 = vadd.xlane.f32.xlu2 %v1960_v38  ;;  %v5566_v38 = vld [vmem:[%s9530_s9 + $0x3a0] sm:$0xf0] }
 0x4c0   :  { %v1873_v50 = vpop.f32.mrf.mxu1 }
 0x4c5   :  { %v1854_v49 = vpop.f32.mrf.mxu0 }
 0x4c6   :  { %v1874_v0 = vadd.f32 %v1873_v50, %v1854_v49  ;;  %v1911_v9 = vpop.f32.mrf.mxu3  ;;  %v5569_v49 = vor.u32 %v6378_v36, %v5566_v38  ;;  %v5438_v36 = vld [vmem:[%s9530_s9 + $0x2a0] sm:$0xf0] }
 0x4c8   :  { %v1920_v30 = vmul.f32 %v1874_v0, %v114_v32  ;;  %v1875_v57 = vpop.f32.mrf.mxu1  ;;  %v5276_v0 = vld [vmem:[%s9530_s9 + $0x140] sm:$0xf]  ;;  %2926 = vmatpush.bf16.msra.mxu3 %v5569_v49  ;;  %v5441_v49 = vor.u32 %v6346_v29, %v5438_v36 }
 0x4c9   :  { %v6310_v32 = vld [vmem:[%s9530_s9 + $0x15c] sm:$0xf0] }
 0x4ca   :  { %v8136_v14 = vadd.f32 %v6650_v43, %v1920_v30  ;;  %v5277_v30 = vor.u32 %v6310_v32, %v5276_v0  ;;  %v5534_v43 = vld [vmem:[%s9530_s9 + $0x360] sm:$0xf0]  ;;  %v5148_v0 = vld [vmem:[%s9530_s9 + $0x40] sm:$0xf] }
 0x4cb   :  { %v1892_v33 = vpop.f32.mrf.mxu2  ;;  %v6278_v32 = vld [vmem:[%s9530_s9 + $0x5c] sm:$0xf0] }
 0x4cc   :  { %v1912_v28 = vadd.f32 %v1911_v9, %v1892_v33  ;;  %v1953_v44 = vmul.f32 %v8136_v14, %v8136_v14  ;;  %v5532_v9 = vld [vmem:[%s9530_s9 + $0x340] sm:$0xf]  ;;  %v6306_v33 = vld [vmem:[%s9530_s9 + $0x144] sm:$0xf]  ;;  %2870 = vmatpush.bf16.msra.mxu0 %v5277_v30  ;;  %v5149_v30 = vor.u32 %v6278_v32, %v5148_v0 }
 0x4cd   :  { %v1856_v41 = vpop.f32.mrf.mxu0 }
 0x4ce   :  { %v1921_v3 = vmul.f32 %v1912_v28, %v115_v8  ;;  %v1876_v6 = vadd.f32 %v1875_v57, %v1856_v41  ;;  %v1913_v62 = vpop.f32.mrf.mxu3  ;;  %v6374_v8 = vld [vmem:[%s9530_s9 + $0x35c] sm:$0xf0]  ;;  %v5278_v28 = vld [vmem:[%s9530_s9 + $0x160] sm:$0xf0] }
 0x4cf   :  { %v5533_v57 = vor.u32 %v6374_v8, %v5532_v9  ;;  %v6370_v41 = vld [vmem:[%s9530_s9 + $0x344] sm:$0xf]  ;;  %v5404_v9 = vld [vmem:[%s9530_s9 + $0x240] sm:$0xf] }
 0x4d0   :  { %v8144_v16 = vadd.f32 %v6651_v26, %v1921_v3  ;;  %v1922_v18 = vmul.f32 %v1876_v6, %v126_v5  ;;  %v5281_v3 = vor.u32 %v6306_v33, %v5278_v28  ;;  %v5537_v6 = vor.u32 %v6370_v41, %v5534_v43  ;;  %v5244_v26 = vld [vmem:[%s9530_s9 + $0x100] sm:$0xf]  ;;  %v6274_v33 = vld [vmem:[%s9530_s9 + $0x44] sm:$0xf] }
 0x4d1   :  { %2889 = vmatpush.bf16.msra.mxu1 %v5533_v57  ;;  %v6342_v8 = vld [vmem:[%s9530_s9 + $0x25c] sm:$0xf0]  ;;  %v5150_v28 = vld [vmem:[%s9530_s9 + $0x60] sm:$0xf0] }
 0x4d2   :  { %v1939_v21 = vadd.f32 %v8144_v16, %v8136_v14  ;;  %v1954_v7 = vmul.f32 %v8144_v16, %v8144_v16  ;;  %v8158_v45 = vadd.f32 %v6652_v17, %v1922_v18  ;;  %v6302_v18 = vld [vmem:[%s9530_s9 + $0x11c] sm:$0xf0]  ;;  %2908 = vmatpush.bf16.msra.mxu2 %v5281_v3  ;;  %2927 = vmatpush.bf16.msra.mxu3 %v5537_v6  ;;  %v6362_v17 = vld [vmem:[%s9530_s9 + $0x304] sm:$0xf] }
 0x4d3   :  { %v1894_v15 = vpop.f32.mrf.mxu2  ;;  %v5405_v57 = vor.u32 %v6342_v8, %v5404_v9  ;;  %v6338_v41 = vld [vmem:[%s9530_s9 + $0x244] sm:$0xf]  ;;  %v5153_v3 = vor.u32 %v6274_v33, %v5150_v28 }
 0x4d4   :  { %v1914_v4 = vadd.f32 %v1913_v62, %v1894_v15  ;;  %1940 = vadd.xlane.f32.xlu0 %v1939_v21  ;;  %v1963_v37 = vadd.f32 %v1954_v7, %v1953_v44  ;;  %v1955_v42 = vmul.f32 %v8158_v45, %v8158_v45  ;;  %v5500_v21 = vld [vmem:[%s9530_s9 + $0x300] sm:$0xf]  ;;  %v5245_v44 = vor.u32 %v6302_v18, %v5244_v26  ;;  %v6298_v62 = vld [vmem:[%s9530_s9 + $0x104] sm:$0xf] }
 0x4d5   :  { %v6366_v7 = vld [vmem:[%s9530_s9 + $0x31c] sm:$0xf0]  ;;  %v5406_v43 = vld [vmem:[%s9530_s9 + $0x260] sm:$0xf0] }
 0x4d6   :  { %v1923_v12 = vmul.f32 %v1914_v4, %v127_v2  ;;  %1964 = vadd.xlane.f32.xlu1 %v1963_v37  ;;  %v5246_v2 = vld [vmem:[%s9530_s9 + $0x120] sm:$0xf0]  ;;  %v5501_v15 = vor.u32 %v6366_v7, %v5500_v21  ;;  %2871 = vmatpush.bf16.msra.mxu0 %v5245_v44  ;;  %v5409_v6 = vor.u32 %v6338_v41, %v5406_v43  ;;  %v5116_v21 = vld [vmem:[%s9530_s9] sm:$0xf] }
 0x4d7   :  { %v5249_v4 = vor.u32 %v6298_v62, %v5246_v2  ;;  %v6270_v44 = vld [vmem:[%s9530_s9 + $0x1c] sm:$0xf0] }
 0x4d8   :  { %v8163_v20 = vadd.f32 %v6653_v61, %v1923_v12  ;;  %v5502_v12 = vld [vmem:[%s9530_s9 + $0x320] sm:$0xf0]  ;;  %2890 = vmatpush.bf16.msra.mxu1 %v5501_v15  ;;  %v5372_v7 = vld [vmem:[%s9530_s9 + $0x200] sm:$0xf]  ;;  %v5117_v2 = vor.u32 %v6270_v44, %v5116_v21 }
 0x4d9   :  { %2909 = vmatpush.bf16.msra.mxu2 %v5249_v4  ;;  %v6334_v15 = vld [vmem:[%s9530_s9 + $0x21c] sm:$0xf0]  ;;  %v6266_v4 = vld [vmem:[%s9530_s9 + $0x4] sm:$0xf] }
 0x4da   :  { %v1942_v53 = vadd.f32 %v8163_v20, %v8158_v45  ;;  %v1956_v35 = vmul.f32 %v8163_v20, %v8163_v20 }
 0x4dc   :  { %1943 = vadd.xlane.f32.xlu2 %v1942_v53  ;;  %v1966_v58 = vadd.f32 %v1956_v35, %v1955_v42  ;;  %v5505_v42 = vor.u32 %v6362_v17, %v5502_v12  ;;  %v5212_v35 = vld [vmem:[%s9530_s9 + $0xc0] sm:$0xf]  ;;  %2891 = vmatpush.bf16.msra.mxu1 %v5469_v39  ;;  %v5373_v17 = vor.u32 %v6334_v15, %v5372_v7  ;;  %v104_v7 = vld [vmem:[%s9521_s0 + $0x90] sm:$0xff] }
 0x4dd   :  { %2910 = vmatpush.bf16.msra.mxu2 %v5217_v11  ;;  %v1932_v11 = vld [vmem:[%s9529_s8] sm:$0x3] }
 0x4de   :  { %1967 = vadd.xlane.f32.xlu0 %v1966_v58  ;;  %v6294_v58 = vld [vmem:[%s9530_s9 + $0xdc] sm:$0xf0]  ;;  %2928 = vmatpush.bf16.msra.mxu3 %v5505_v42 }
 0x4df   :  { %v5213_v54 = vor.u32 %v6294_v58, %v5212_v35 }
 0x4e0   :  { %2892 = vmatpush.bf16.msra.mxu1 %v5437_v60  ;;  %v8395_v60 = vperm.slane %v1932_v11, 1 }
 0x4e1   :  { %2872 = vmatpush.bf16.msra.mxu0 %v5213_v54 }
 0x4e2   :  { %2929 = vmatpush.bf16.msra.mxu3 %v5473_v56 }
 0x4e4   :  { %2893 = vmatpush.bf16.msra.mxu1 %v5405_v57 }
 0x4e5   :  { %2873 = vmatpush.bf16.msra.mxu0 %v5181_v1 }
 0x4e6   :  { %2930 = vmatpush.bf16.msra.mxu3 %v5441_v49  ;;  %v107_v49 = vld [vmem:[%s9521_s0 + $0xa8] sm:$0xff] }
 0x4e7   :  { %v2057_v57 = vadd.f32 1.0, %v107_v49 }
 0x4e8   :  { %2894 = vmatpush.bf16.msra.mxu1 %v5373_v17 }
 0x4e9   :  { %2874 = vmatpush.bf16.msra.mxu0 %v5149_v30 }
 0x4ea   :  { %2931 = vmatpush.bf16.msra.mxu3 %v5409_v6 }
 0x4ed   :  { %2875 = vmatpush.bf16.msra.mxu0 %v5117_v2 }
 0x501   :  { %v1935_v50 = vpop.xlane.xlu2 %1934 }
 0x502   :  { %v8244_v5 = vmul.f32 %v1935_v50, %v7010_v34  ;;  %v5185_v50 = vor.u32 %v6282_v22, %v5182_v27  ;;  %v8393_v22 = vperm.slane %v1932_v11, 0 }
 0x504   :  { %v1973_v61 = vmul.f32 %v8244_v5, %v8244_v5  ;;  %2911 = vmatpush.bf16.msra.mxu2 %v5185_v50  ;;  %v1981_v46 = vsub.f32 %v8092_v51, %v8244_v5  ;;  %v1982_v1 = vsub.f32 %v8097_v59, %v8244_v5  ;;  %v106_v5 = vld [vmem:[%s9521_s0 + $0xa0] sm:$0xff] }
 0x505   :  { %v2056_v28 = vadd.f32 1.0, %v106_v5  ;;  %v5574_v5 = vld [vmem:[%s9530_s9 + $0x3a8] sm:$0xf0] }
 0x508   :  { %2912 = vmatpush.bf16.msra.mxu2 %v5153_v3  ;;  %v92_v3 = vld [vmem:[%s9521_s0 + $0x30] sm:$0xff] }
 0x509   :  { %v1959_v37 = vpop.xlane.xlu2 %1958 }
 0x50a   :  { %v1969_v53 = vmul.f32 %v1959_v37, %v7010_v34  ;;  %v5118_v37 = vld [vmem:[%s9530_s9 + $0x20] sm:$0xf0] }
 0x50b   :  { %v5121_v12 = vor.u32 %v6266_v4, %v5118_v37 }
 0x50c   :  { %v1977_v55 = vsub.f32 %v1969_v53, %v1973_v61  ;;  %v6330_v61 = vld [vmem:[%s9530_s9 + $0x204] sm:$0xf] }
 0x50d   :  { %v5374_v53 = vld [vmem:[%s9530_s9 + $0x220] sm:$0xf0]  ;;  %2913 = vmatpush.bf16.msra.mxu2 %v5121_v12 }
 0x50e   :  { %v8297_v63 = vadd.f32 1e-05, %v1977_v55  ;;  %v5377_v58 = vor.u32 %v6330_v61, %v5374_v53 }
 0x510   :  { %6574 = vrsqrt.f32 %v8297_v63  ;;  %2932 = vmatpush.bf16.msra.mxu3 %v5377_v58  ;;  %vm1999_vm15 = vweird.f32 %v8297_v63  ;;  %v5604_v58 = vld [vmem:[%s9530_s9 + $0x3c8] sm:$0xf] }
 0x511   :  { %v1938_v38 = vpop.xlane.xlu2 %1937 }
 0x512   :  { %v8349_v18 = vmul.f32 %v1938_v38, %v7010_v34  ;;  %v2054_v38 = vadd.f32 1.0, %v94_v19 }
 0x514   :  { %v1974_v54 = vmul.f32 %v8349_v18, %v8349_v18  ;;  %v1983_v30 = vsub.f32 %v8119_v31, %v8349_v18  ;;  %v1984_v8 = vsub.f32 %v8114_v24, %v8349_v18  ;;  %v93_v18 = vld [vmem:[%s9521_s0 + $0x38] sm:$0xff] }
 0x516   :  { %v6575_v26 = vpop.eup %6574 }
 0x517   :  { %v1994_v62 = vmul.f32 %v6575_v26, %v8297_v63  ;;  %vm2000_vm14 = vweird.f32 %v6575_v26  ;;  %v95_v63 = vld [vmem:[%s9521_s0 + $0x48] sm:$0xff] }
 0x518   :  { %vm2001_vm0 = vmor %vm1999_vm15, %vm2000_vm14  ;;  %v2055_v50 = vadd.f32 1.0, %v95_v63  ;;  %v6383_v63 = vld [vmem:[%s9530_s9 + $0x3a4] sm:$0xf0] }
 0x519   :  { %v1995_v42 = vmul.f32 %v6575_v26, %v1994_v62  ;;  %v1962_v35 = vpop.xlane.xlu2 %1961  ;;  %v105_v62 = vld [vmem:[%s9521_s0 + $0x98] sm:$0xff] }
 0x51a   :  { %v1970_v47 = vmul.f32 %v1962_v35, %v7010_v34  ;;  %v6327_v35 = vld [vmem:[%s9530_s9 + $0x1e4] sm:$0xf0] }
 0x51b   :  { %v1996_v48 = vmul.f32 0.5, %v1995_v42  ;;  %v5348_v42 = vld [vmem:[%s9530_s9 + $0x1c8] sm:$0xf] }
 0x51c   :  { %v1978_v13 = vsub.f32 %v1970_v47, %v1974_v54  ;;  %v5349_v54 = vor.u32 %v6327_v35, %v5348_v42  ;;  %v6391_v47 = vld [vmem:[%s9530_s9 + $0x3e4] sm:$0xf0]  ;;  %v5254_v42 = vld [vmem:[%s9530_s9 + $0x128] sm:$0xf0] }
 0x51d   :  { %v1997_v39 = vsub.f32 1.5, %v1996_v48  ;;  %v5350_v48 = vld [vmem:[%s9530_s9 + $0x1e8] sm:$0xf0] }
 0x51e   :  { %v1990_v55 = vadd.f32 1e-05, %v1978_v13  ;;  %v6323_v13 = vld [vmem:[%s9530_s9 + $0x1cc] sm:$0xf]  ;;  %2944 = vmatpush.bf16.msrb.mxu0 %v5349_v54 }
 0x51f   :  { %v1998_v25 = vmul.f32 %v6575_v26, %v1997_v39  ;;  %v5353_v39 = vor.u32 %v6323_v13, %v5350_v48  ;;  %v5510_v13 = vld [vmem:[%s9530_s9 + $0x328] sm:$0xf0] }
 0x520   :  { %6576 = vrsqrt.f32 %v1990_v55  ;;  %vm2009_vm2 = vweird.f32 %v1990_v55 }
 0x521   :  { %v2002_v56 = vsel %vm2001_vm0, %v6575_v26, %v1998_v25  ;;  %v6387_v25 = vld [vmem:[%s9530_s9 + $0x3cc] sm:$0xf]  ;;  %2982 = vmatpush.bf16.msrb.mxu2 %v5353_v39 }
 0x522   :  { %v2033_v27 = vmul.f32 %v2002_v56, %v1981_v46  ;;  %v2034_v29 = vmul.f32 %v2002_v56, %v1982_v1  ;;  %v5316_v56 = vld [vmem:[%s9530_s9 + $0x188] sm:$0xf] }
 0x524   :  { %v2046_v32 = vmul.f32 %v8393_v22, %v2033_v27  ;;  %v2047_v9 = vmul.f32 %v8395_v60, %v2034_v29  ;;  %v6315_v27 = vld [vmem:[%s9530_s9 + $0x18c] sm:$0xf] }
 0x526   :  { %v6577_v52 = vpop.eup %6576  ;;  %v2062_v6 = vmul.f32 %v2054_v38, %v2046_v32  ;;  %v2063_v26 = vmul.f32 %v2055_v50, %v2047_v9  ;;  %v5318_v38 = vld [vmem:[%s9530_s9 + $0x1a8] sm:$0xf0]  ;;  %v5284_v9 = vld [vmem:[%s9530_s9 + $0x148] sm:$0xf] }
 0x527   :  { %v2004_v40 = vmul.f32 %v6577_v52, %v1990_v55  ;;  %vm2010_vm1 = vweird.f32 %v6577_v52  ;;  %v5605_v55 = vor.u32 %v6391_v47, %v5604_v58  ;;  %v6379_v50 = vld [vmem:[%s9530_s9 + $0x38c] sm:$0xf] }
 0x528   :  { %vm2011_vm3 = vmor %vm2009_vm2, %vm2010_vm1  ;;  %v2070_v4 = vadd.f32 %v2062_v6, %v92_v3  ;;  %v2071_v37 = vadd.f32 %v2063_v26, %v93_v18  ;;  %v5577_v32 = vor.u32 %v6379_v50, %v5574_v5  ;;  %v5286_v3 = vld [vmem:[%s9530_s9 + $0x168] sm:$0xf0]  ;;  %v6287_v5 = vld [vmem:[%s9530_s9 + $0xa4] sm:$0xf0] }
 0x529   :  { %v2005_v10 = vmul.f32 %v6577_v52, %v2004_v40  ;;  %2963 = vmatpush.bf16.msrb.mxu1 %v5605_v55  ;;  %v6371_v6 = vld [vmem:[%s9530_s9 + $0x34c] sm:$0xf] }
 0x52a   :  { %v5542_v26 = vld [vmem:[%s9530_s9 + $0x368] sm:$0xf0] }
 0x52b   :  { %v2006_v23 = vmul.f32 0.5, %v2005_v10  ;;  %v6319_v10 = vld [vmem:[%s9530_s9 + $0x1a4] sm:$0xf0]  ;;  %v5545_v18 = vor.u32 %v6371_v6, %v5542_v26  ;;  %v6363_v47 = vld [vmem:[%s9530_s9 + $0x30c] sm:$0xf] }
 0x52c   :  { %v5317_v1 = vor.u32 %v6319_v10, %v5316_v56  ;;  %v5513_v39 = vor.u32 %v6363_v47, %v5510_v13  ;;  %v6359_v56 = vld [vmem:[%s9530_s9 + $0x2e4] sm:$0xf0]  ;;  %v6291_v10 = vld [vmem:[%s9530_s9 + $0xcc] sm:$0xf] }
 0x52d   :  { %v2007_v36 = vsub.f32 1.5, %v2006_v23  ;;  %v5572_v23 = vld [vmem:[%s9530_s9 + $0x388] sm:$0xf] }
 0x52e   :  { %2945 = vmatpush.bf16.msrb.mxu0 %v5317_v1  ;;  %v5573_v49 = vor.u32 %v6383_v63, %v5572_v23  ;;  %v5222_v1 = vld [vmem:[%s9530_s9 + $0xe8] sm:$0xf0]  ;;  %v6279_v6 = vld [vmem:[%s9530_s9 + $0x64] sm:$0xf0] }
 0x52f   :  { %v2008_v0 = vmul.f32 %v6577_v52, %v2007_v36  ;;  %v6355_v63 = vld [vmem:[%s9530_s9 + $0x2cc] sm:$0xf]  ;;  %v5412_v26 = vld [vmem:[%s9530_s9 + $0x248] sm:$0xf] }
 0x530   :  { %2964 = vmatpush.bf16.msrb.mxu1 %v5573_v49  ;;  %v5444_v49 = vld [vmem:[%s9530_s9 + $0x288] sm:$0xf] }
 0x531   :  { %v2012_v33 = vsel %vm2011_vm3, %v6577_v52, %v2008_v0  ;;  %v5606_v52 = vld [vmem:[%s9530_s9 + $0x3e8] sm:$0xf0]  ;;  %v5321_v0 = vor.u32 %v6315_v27, %v5318_v38  ;;  %v5380_v47 = vld [vmem:[%s9530_s9 + $0x208] sm:$0xf] }
 0x532   :  { %v2035_v41 = vmul.f32 %v2012_v33, %v1983_v30  ;;  %v2036_v43 = vmul.f32 %v2012_v33, %v1984_v8  ;;  %v5609_v40 = vor.u32 %v6387_v25, %v5606_v52  ;;  %v6311_v30 = vld [vmem:[%s9530_s9 + $0x164] sm:$0xf0]  ;;  %v5478_v27 = vld [vmem:[%s9530_s9 + $0x2e8] sm:$0xf0] }
 0x533   :  { %v5285_v33 = vor.u32 %v6311_v30, %v5284_v9  ;;  %2983 = vmatpush.bf16.msrb.mxu2 %v5321_v0  ;;  %v5220_v25 = vld [vmem:[%s9530_s9 + $0xc8] sm:$0xf]  ;;  %v5481_v50 = vor.u32 %v6355_v63, %v5478_v27  ;;  %v6283_v30 = vld [vmem:[%s9530_s9 + $0x8c] sm:$0xf] }
 0x534   :  { %v2048_v21 = vmul.f32 %v8393_v22, %v2035_v41  ;;  %v2049_v44 = vmul.f32 %v8395_v60, %v2036_v43  ;;  %3001 = vmatpush.bf16.msrb.mxu3 %v5609_v40  ;;  %v6307_v41 = vld [vmem:[%s9530_s9 + $0x14c] sm:$0xf]  ;;  %v6295_v52 = vld [vmem:[%s9530_s9 + $0xe4] sm:$0xf0] }
 0x535   :  { %2946 = vmatpush.bf16.msrb.mxu0 %v5285_v33  ;;  %v5476_v40 = vld [vmem:[%s9530_s9 + $0x2c8] sm:$0xf]  ;;  %v6347_v33 = vld [vmem:[%s9530_s9 + $0x28c] sm:$0xf] }
 0x536   :  { %v2064_v2 = vmul.f32 %v2056_v28, %v2048_v21  ;;  %v2065_v15 = vmul.f32 %v2057_v57, %v2049_v44  ;;  %v5540_v28 = vld [vmem:[%s9530_s9 + $0x348] sm:$0xf]  ;;  %v5289_v44 = vor.u32 %v6307_v41, %v5286_v3  ;;  %v5477_v23 = vor.u32 %v6359_v56, %v5476_v40 }
 0x537   :  { %v6375_v57 = vld [vmem:[%s9530_s9 + $0x364] sm:$0xf0] }
 0x538   :  { %v2072_v17 = vadd.f32 %v2064_v2, %v104_v7  ;;  %v2073_v12 = vadd.f32 %v2065_v15, %v105_v62  ;;  %v5541_v43 = vor.u32 %v6375_v57, %v5540_v28  ;;  %3002 = vmatpush.bf16.msrb.mxu3 %v5577_v32  ;;  %v5252_v62 = vld [vmem:[%s9530_s9 + $0x108] sm:$0xf]  ;;  %2984 = vmatpush.bf16.msrb.mxu2 %v5289_v44  ;;  %v5446_v28 = vld [vmem:[%s9530_s9 + $0x2a8] sm:$0xf0] }
 0x539   :  { %v6303_v2 = vld [vmem:[%s9530_s9 + $0x124] sm:$0xf0]  ;;  %v5449_v44 = vor.u32 %v6347_v33, %v5446_v28 }
 0x53a   :  { %v8423_v61 = vpack.c.bf16 %v2072_v17, %v2070_v4  ;;  %v8425_v53 = vpack.c.bf16 %v2073_v12, %v2071_v37  ;;  %v5508_v15 = vld [vmem:[%s9530_s9 + $0x308] sm:$0xf]  ;;  %v5253_v37 = vor.u32 %v6303_v2, %v5252_v62  ;;  %v6299_v12 = vld [vmem:[%s9530_s9 + $0x10c] sm:$0xf]  ;;  %2965 = vmatpush.bf16.msrb.mxu1 %v5541_v43 }
 0x53b   :  { %v6367_v17 = vld [vmem:[%s9530_s9 + $0x324] sm:$0xf0]  ;;  %v5257_v54 = vor.u32 %v6299_v12, %v5254_v42  ;;  %v5158_v62 = vld [vmem:[%s9530_s9 + $0x68] sm:$0xf0] }
 0x53c   :  { %2876 = vmatmul.bf16.vlgmr.msra.gmra.mxu0 %v8423_v61  ;;  %2895 = vmatmul.bf16.vlgmr.msra.gmra.mxu1 %v8425_v53  ;;  %v5509_v58 = vor.u32 %v6367_v17, %v5508_v15  ;;  %v6351_v9 = vld [vmem:[%s9530_s9 + $0x2a4] sm:$0xf0]  ;;  %v5414_v17 = vld [vmem:[%s9530_s9 + $0x268] sm:$0xf0] }
 0x53d   :  { %2914 = vmatmul.bf16.vlgmr.msra.gmra.mxu2 %v8423_v61  ;;  %2933 = vmatmul.bf16.vlgmr.msra.gmra.mxu3 %v8425_v53  ;;  %v5445_v41 = vor.u32 %v6351_v9, %v5444_v49  ;;  %v5156_v3 = vld [vmem:[%s9530_s9 + $0x48] sm:$0xf] }
 0x53e   :  { %3003 = vmatpush.bf16.msrb.mxu3 %v5545_v18  ;;  %2947 = vmatpush.bf16.msrb.mxu0 %v5253_v37  ;;  %v6343_v18 = vld [vmem:[%s9530_s9 + $0x264] sm:$0xf0]  ;;  %v5157_v15 = vor.u32 %v6279_v6, %v5156_v3  ;;  %v6339_v37 = vld [vmem:[%s9530_s9 + $0x24c] sm:$0xf] }
 0x53f   :  { %2966 = vmatpush.bf16.msrb.mxu1 %v5509_v58  ;;  %2985 = vmatpush.bf16.msrb.mxu2 %v5257_v54  ;;  %v5124_v12 = vld [vmem:[%s9530_s9 + $0x8] sm:$0xf]  ;;  %v5413_v58 = vor.u32 %v6343_v18, %v5412_v26  ;;  %v6388_v18 = vld [vmem:[%s9530_s9 + $0x3d4] sm:$0xf] }
 0x540   :  { %v6271_v42 = vld [vmem:[%s9530_s9 + $0x24] sm:$0xf0] }
 0x541   :  { %v6335_v13 = vld [vmem:[%s9530_s9 + $0x224] sm:$0xf0]  ;;  %v5125_v56 = vor.u32 %v6271_v42, %v5124_v12 }
 0x542   :  { %3004 = vmatpush.bf16.msrb.mxu3 %v5513_v39  ;;  %v5417_v39 = vor.u32 %v6339_v37, %v5414_v17  ;;  %v119_v40 = vld [vmem:[%s9521_s0 + $0x108] sm:$0xff] }
 0x543   :  { %2967 = vmatpush.bf16.msrb.mxu1 %v5477_v23  ;;  %v8672_v49 = vadd.f32 1.0, %v119_v40  ;;  %v5582_v40 = vld [vmem:[%s9530_s9 + $0x3b0] sm:$0xf0] }
 0x546   :  { %3005 = vmatpush.bf16.msrb.mxu3 %v5481_v50 }
 0x547   :  { %v1941_v11 = vpop.xlane.xlu0 %1940  ;;  %2968 = vmatpush.bf16.msrb.mxu1 %v5445_v41  ;;  %v6392_v41 = vld [vmem:[%s9530_s9 + $0x3ec] sm:$0xf0] }
 0x548   :  { %v8462_v46 = vmul.f32 %v1941_v11, %v7010_v34 }
 0x549   :  { %v1965_v19 = vpop.xlane.xlu1 %1964 }
 0x54a   :  { %v1971_v29 = vmul.f32 %v1965_v19, %v7010_v34  ;;  %v1975_v36 = vmul.f32 %v8462_v46, %v8462_v46  ;;  %v5225_v19 = vor.u32 %v6291_v10, %v5222_v1  ;;  %3006 = vmatpush.bf16.msrb.mxu3 %v5449_v44  ;;  %v6331_v10 = vld [vmem:[%s9530_s9 + $0x20c] sm:$0xf]  ;;  %v1985_v23 = vsub.f32 %v8136_v14, %v8462_v46  ;;  %v5358_v44 = vld [vmem:[%s9530_s9 + $0x1f0] sm:$0xf0] }
 0x54b   :  { %v5382_v1 = vld [vmem:[%s9530_s9 + $0x228] sm:$0xf0]  ;;  %2969 = vmatpush.bf16.msrb.mxu1 %v5413_v58  ;;  %v6384_v58 = vld [vmem:[%s9530_s9 + $0x3ac] sm:$0xf0] }
 0x54c   :  { %v1979_v8 = vsub.f32 %v1971_v29, %v1975_v36  ;;  %v5188_v29 = vld [vmem:[%s9530_s9 + $0x88] sm:$0xf]  ;;  %2986 = vmatpush.bf16.msrb.mxu2 %v5225_v19  ;;  %v5381_v19 = vor.u32 %v6335_v13, %v5380_v47 }
 0x54d   :  { %v5189_v32 = vor.u32 %v6287_v5, %v5188_v29  ;;  %v1986_v5 = vsub.f32 %v8144_v16, %v8462_v46  ;;  %v6328_v46 = vld [vmem:[%s9530_s9 + $0x1ec] sm:$0xf0] }
 0x54e   :  { %v8509_v21 = vadd.f32 1e-05, %v1979_v8  ;;  %v5190_v8 = vld [vmem:[%s9530_s9 + $0xa8] sm:$0xf0]  ;;  %3007 = vmatpush.bf16.msrb.mxu3 %v5417_v39 }
 0x54f   :  { %v1944_v7 = vpop.xlane.xlu2 %1943  ;;  %v5193_v43 = vor.u32 %v6283_v30, %v5190_v8  ;;  %v5356_v8 = vld [vmem:[%s9530_s9 + $0x1d0] sm:$0xf]  ;;  %2970 = vmatpush.bf16.msrb.mxu1 %v5381_v19 }
 0x550   :  { %6578 = vrsqrt.f32 %v8509_v21  ;;  %v8522_v4 = vmul.f32 %v1944_v7, %v7010_v34  ;;  %v6275_v7 = vld [vmem:[%s9530_s9 + $0x4c] sm:$0xf]  ;;  %vm2019_vm5 = vweird.f32 %v8509_v21  ;;  %v5357_v28 = vor.u32 %v6328_v46, %v5356_v8 }
 0x551   :  { %v1968_v35 = vpop.xlane.xlu0 %1967  ;;  %2987 = vmatpush.bf16.msrb.mxu2 %v5193_v43  ;;  %v5161_v54 = vor.u32 %v6275_v7, %v5158_v62  ;;  %v6324_v43 = vld [vmem:[%s9530_s9 + $0x1d4] sm:$0xf] }
 0x552   :  { %v1972_v48 = vmul.f32 %v1968_v35, %v7010_v34  ;;  %v1976_v55 = vmul.f32 %v8522_v4, %v8522_v4  ;;  %v5221_v34 = vor.u32 %v6295_v52, %v5220_v25  ;;  %v6267_v25 = vld [vmem:[%s9530_s9 + $0xc] sm:$0xf]  ;;  %v5361_v7 = vor.u32 %v6324_v43, %v5358_v44  ;;  %v5614_v62 = vld [vmem:[%s9530_s9 + $0x3f0] sm:$0xf0] }
 0x553   :  { %v5126_v52 = vld [vmem:[%s9530_s9 + $0x28] sm:$0xf0]  ;;  %v5617_v12 = vor.u32 %v6388_v18, %v5614_v62  ;;  %v1987_v13 = vsub.f32 %v8158_v45, %v8522_v4  ;;  %v6300_v44 = vld [vmem:[%s9530_s9 + $0x114] sm:$0xf] }
 0x554   :  { %v1980_v11 = vsub.f32 %v1972_v48, %v1976_v55  ;;  %2948 = vmatpush.bf16.msrb.mxu0 %v5221_v34  ;;  %v118_v55 = vld [vmem:[%s9521_s0 + $0x100] sm:$0xff]  ;;  %v5129_v50 = vor.u32 %v6267_v25, %v5126_v52  ;;  %v5326_v25 = vld [vmem:[%s9530_s9 + $0x1b0] sm:$0xf0] }
 0x555   :  { %v8666_v63 = vadd.f32 1.0, %v118_v55  ;;  %2988 = vmatpush.bf16.msrb.mxu2 %v5161_v54  ;;  %v6316_v54 = vld [vmem:[%s9530_s9 + $0x194] sm:$0xf]  ;;  %v1988_v55 = vsub.f32 %v8163_v20, %v8522_v4 }
 0x556   :  { %v8569_v36 = vpop.eup %6578  ;;  %v8571_v38 = vadd.f32 1e-05, %v1980_v11  ;;  %v6380_v52 = vld [vmem:[%s9530_s9 + $0x394] sm:$0xf]  ;;  %v5329_v4 = vor.u32 %v6316_v54, %v5326_v25  ;;  %v6296_v54 = vld [vmem:[%s9530_s9 + $0xec] sm:$0xf0] }
 0x557   :  { %v2014_v0 = vmul.f32 %v8569_v36, %v8509_v21  ;;  %vm2020_vm4 = vweird.f32 %v8569_v36  ;;  %v130_v21 = vld [vmem:[%s9521_s0 + $0x160] sm:$0xff]  ;;  %v6364_v62 = vld [vmem:[%s9530_s9 + $0x314] sm:$0xf] }
 0x558   :  { %6580 = vrsqrt.f32 %v8571_v38  ;;  %2949 = vmatpush.bf16.msrb.mxu0 %v5189_v32  ;;  %vm2021_vm6 = vmor %vm2019_vm5, %vm2020_vm4  ;;  %v5385_v32 = vor.u32 %v6331_v10, %v5382_v1  ;;  %vm2029_vm8 = vweird.f32 %v8571_v38  ;;  %v6312_v10 = vld [vmem:[%s9530_s9 + $0x16c] sm:$0xf0]  ;;  %v5230_v25 = vld [vmem:[%s9530_s9 + $0xf0] sm:$0xf0] }
 0x559   :  { %v2015_v57 = vmul.f32 %v8569_v36, %v2014_v0  ;;  %v131_v0 = vld [vmem:[%s9521_s0 + $0x168] sm:$0xff]  ;;  %2989 = vmatpush.bf16.msrb.mxu2 %v5129_v50  ;;  %v5548_v1 = vld [vmem:[%s9530_s9 + $0x350] sm:$0xf] }
 0x55a   :  { %v8696_v3 = vadd.f32 1.0, %v131_v0  ;;  %3008 = vmatpush.bf16.msrb.mxu3 %v5385_v32  ;;  %v116_v50 = vld [vmem:[%s9521_s0 + $0xf0] sm:$0xff] }
 0x55b   :  { %v2016_v2 = vmul.f32 0.5, %v2015_v57  ;;  %v5612_v57 = vld [vmem:[%s9530_s9 + $0x3d0] sm:$0xf]  ;;  %v6372_v32 = vld [vmem:[%s9530_s9 + $0x354] sm:$0xf] }
 0x55c   :  { %2950 = vmatpush.bf16.msrb.mxu0 %v5157_v15  ;;  %v5613_v26 = vor.u32 %v6392_v41, %v5612_v57  ;;  %v6320_v15 = vld [vmem:[%s9530_s9 + $0x1ac] sm:$0xf0] }
 0x55d   :  { %v2017_v35 = vsub.f32 1.5, %v2016_v2  ;;  %v5324_v2 = vld [vmem:[%s9530_s9 + $0x190] sm:$0xf]  ;;  %3058 = vmatpush.bf16.msra.mxu2 %v5361_v7  ;;  %v5262_v7 = vld [vmem:[%s9530_s9 + $0x130] sm:$0xf0] }
 0x55e   :  { %v8635_v48 = vpop.eup %6580  ;;  %3039 = vmatpush.bf16.msra.mxu1 %v5613_v26  ;;  %v5325_v42 = vor.u32 %v6320_v15, %v5324_v2  ;;  %3077 = vmatpush.bf16.msra.mxu3 %v5617_v12  ;;  %v5516_v57 = vld [vmem:[%s9530_s9 + $0x310] sm:$0xf] }
 0x55f   :  { %v2018_v11 = vmul.f32 %v8569_v36, %v2017_v35  ;;  %v2024_v34 = vmul.f32 %v8635_v48, %v8571_v38  ;;  %vm2030_vm7 = vweird.f32 %v8635_v48  ;;  %v5580_v35 = vld [vmem:[%s9530_s9 + $0x390] sm:$0xf] }
 0x560   :  { %2951 = vmatpush.bf16.msrb.mxu0 %v5125_v56  ;;  %vm8700_vm9 = vmor %vm2029_vm8, %vm2030_vm7  ;;  %v5581_v39 = vor.u32 %v6384_v58, %v5580_v35  ;;  %v5292_v56 = vld [vmem:[%s9530_s9 + $0x150] sm:$0xf] }
 0x561   :  { %v2022_v27 = vsel %vm2021_vm6, %v8569_v36, %v2018_v11  ;;  %v2025_v29 = vmul.f32 %v8635_v48, %v2024_v34  ;;  %v8678_v36 = vadd.f32 1.0, %v130_v21  ;;  %v5585_v34 = vor.u32 %v6380_v52, %v5582_v40  ;;  %3059 = vmatpush.bf16.msra.mxu2 %v5329_v4  ;;  %v6368_v41 = vld [vmem:[%s9530_s9 + $0x32c] sm:$0xf0]  ;;  %v6356_v40 = vld [vmem:[%s9530_s9 + $0x2d4] sm:$0xf] }
 0x562   :  { %v2037_v9 = vmul.f32 %v2022_v27, %v1985_v23  ;;  %v2038_v33 = vmul.f32 %v2022_v27, %v1986_v5  ;;  %v5293_v19 = vor.u32 %v6312_v10, %v5292_v56  ;;  %v6308_v27 = vld [vmem:[%s9530_s9 + $0x154] sm:$0xf]  ;;  %3040 = vmatpush.bf16.msra.mxu1 %v5581_v39  ;;  %v5517_v18 = vor.u32 %v6368_v41, %v5516_v57  ;;  %v5228_v58 = vld [vmem:[%s9530_s9 + $0xd0] sm:$0xf] }
 0x563   :  { %v2026_v30 = vmul.f32 0.5, %v2025_v29  ;;  %v5294_v29 = vld [vmem:[%s9530_s9 + $0x170] sm:$0xf0]  ;;  %3078 = vmatpush.bf16.msra.mxu3 %v5585_v34  ;;  %v5196_v4 = vld [vmem:[%s9530_s9 + $0x90] sm:$0xf] }
 0x564   :  { %3020 = vmatpush.bf16.msra.mxu0 %v5357_v28  ;;  %v2050_v37 = vmul.f32 %v8393_v22, %v2037_v9  ;;  %v2051_v47 = vmul.f32 %v8395_v60, %v2038_v33  ;;  %v5550_v9 = vld [vmem:[%s9530_s9 + $0x370] sm:$0xf0]  ;;  %v5297_v33 = vor.u32 %v6308_v27, %v5294_v29  ;;  %v6304_v28 = vld [vmem:[%s9530_s9 + $0x12c] sm:$0xf0] }
 0x565   :  { %v2027_v6 = vsub.f32 1.5, %v2026_v30  ;;  %v5260_v30 = vld [vmem:[%s9530_s9 + $0x110] sm:$0xf]  ;;  %v5553_v43 = vor.u32 %v6372_v32, %v5550_v9  ;;  %v6292_v39 = vld [vmem:[%s9530_s9 + $0xd4] sm:$0xf] }
 0x566   :  { %v2066_v5 = vmul.f32 %v8666_v63, %v2050_v37  ;;  %v2067_v8 = vmul.f32 %v8672_v49, %v2051_v47  ;;  %v129_v49 = vld [vmem:[%s9521_s0 + $0x158] sm:$0xff]  ;;  %v5261_v26 = vor.u32 %v6304_v28, %v5260_v30  ;;  %3060 = vmatpush.bf16.msra.mxu2 %v5297_v33  ;;  %v5484_v47 = vld [vmem:[%s9530_s9 + $0x2d0] sm:$0xf]  ;;  %v5233_v34 = vor.u32 %v6292_v39, %v5230_v25  ;;  %v5198_v27 = vld [vmem:[%s9530_s9 + $0xb0] sm:$0xf0] }
 0x567   :  { %v2028_v17 = vmul.f32 %v8635_v48, %v2027_v6  ;;  %3079 = vmatpush.bf16.msra.mxu3 %v5553_v43  ;;  %v6288_v10 = vld [vmem:[%s9530_s9 + $0xac] sm:$0xf0]  ;;  %v6348_v29 = vld [vmem:[%s9530_s9 + $0x294] sm:$0xf]  ;;  %v6389_v39 = vld [vmem:[%s9530_s9 + $0x3dc] sm:$0xf] }
 0x568   :  { %3021 = vmatpush.bf16.msra.mxu0 %v5325_v42  ;;  %v5265_v42 = vor.u32 %v6300_v44, %v5262_v7  ;;  %v5420_v32 = vld [vmem:[%s9530_s9 + $0x250] sm:$0xf]  ;;  %v6340_v57 = vld [vmem:[%s9530_s9 + $0x254] sm:$0xf]  ;;  %v5622_v25 = vld [vmem:[%s9530_s9 + $0x3f8] sm:$0xf0] }
 0x569   :  { %v2032_v11 = vsel %vm8700_vm9, %v8635_v48, %v2028_v17  ;;  %v6376_v48 = vld [vmem:[%s9530_s9 + $0x36c] sm:$0xf0]  ;;  %v5422_v41 = vld [vmem:[%s9530_s9 + $0x270] sm:$0xf0] }
 0x56a   :  { %v2039_v23 = vmul.f32 %v2032_v11, %v1987_v13  ;;  %v2040_v21 = vmul.f32 %v2032_v11, %v1988_v55  ;;  %v5549_v0 = vor.u32 %v6376_v48, %v5548_v1  ;;  %v5229_v13 = vor.u32 %v6296_v54, %v5228_v58  ;;  %v6360_v55 = vld [vmem:[%s9530_s9 + $0x2ec] sm:$0xf0]  ;;  %v5486_v11 = vld [vmem:[%s9530_s9 + $0x2f0] sm:$0xf0]  ;;  %3061 = vmatpush.bf16.msra.mxu2 %v5265_v42  ;;  %v5620_v42 = vld [vmem:[%s9530_s9 + $0x3d8] sm:$0xf] }
 0x56b   :  { %v5485_v52 = vor.u32 %v6360_v55, %v5484_v47  ;;  %v5489_v56 = vor.u32 %v6356_v40, %v5486_v11  ;;  %v5452_v1 = vld [vmem:[%s9530_s9 + $0x290] sm:$0xf]  ;;  %v6284_v48 = vld [vmem:[%s9530_s9 + $0x94] sm:$0xf]  ;;  %v6393_v58 = vld [vmem:[%s9530_s9 + $0x3f4] sm:$0xf0]  ;;  %v5625_v40 = vor.u32 %v6389_v39, %v5622_v25 }
 0x56c   :  { %v2052_v46 = vmul.f32 %v8393_v22, %v2039_v23  ;;  %v2053_v63 = vmul.f32 %v8395_v60, %v2040_v21  ;;  %v117_v22 = vld [vmem:[%s9521_s0 + $0xf8] sm:$0xff]  ;;  %v128_v60 = vld [vmem:[%s9521_s0 + $0x150] sm:$0xff]  ;;  %3022 = vmatpush.bf16.msra.mxu0 %v5293_v19  ;;  %3041 = vmatpush.bf16.msra.mxu1 %v5549_v0  ;;  %v5197_v21 = vor.u32 %v6288_v10, %v5196_v4 }
 0x56d   :  { %v2075_v2 = vadd.f32 %v2067_v8, %v117_v22  ;;  %v6352_v23 = vld [vmem:[%s9530_s9 + $0x2ac] sm:$0xf0]  ;;  %v5201_v30 = vor.u32 %v6284_v48, %v5198_v27  ;;  %v5134_v7 = vld [vmem:[%s9530_s9 + $0x30] sm:$0xf0]  ;;  %v6325_v54 = vld [vmem:[%s9530_s9 + $0x1dc] sm:$0xf] }
 0x56e   :  { %v2068_v6 = vmul.f32 %v8678_v36, %v2052_v46  ;;  %v2069_v38 = vmul.f32 %v8696_v3, %v2053_v63  ;;  %v5518_v36 = vld [vmem:[%s9530_s9 + $0x330] sm:$0xf0]  ;;  %v2074_v3 = vadd.f32 %v2066_v5, %v116_v50  ;;  %v5453_v19 = vor.u32 %v6352_v23, %v5452_v1  ;;  %v5164_v5 = vld [vmem:[%s9530_s9 + $0x50] sm:$0xf]  ;;  %3062 = vmatpush.bf16.msra.mxu2 %v5233_v34  ;;  %v5366_v47 = vld [vmem:[%s9530_s9 + $0x1f8] sm:$0xf0] }
 0x56f   :  { %v5521_v35 = vor.u32 %v6364_v62, %v5518_v36  ;;  %v5454_v50 = vld [vmem:[%s9530_s9 + $0x2b0] sm:$0xf0]  ;;  %v6280_v0 = vld [vmem:[%s9530_s9 + $0x6c] sm:$0xf0]  ;;  %v5369_v55 = vor.u32 %v6325_v54, %v5366_v47  ;;  %v6321_v11 = vld [vmem:[%s9530_s9 + $0x1b4] sm:$0xf0] }
 0x570   :  { %v2076_v15 = vadd.f32 %v2068_v6, %v128_v60  ;;  %v2077_v37 = vadd.f32 %v2069_v38, %v129_v49  ;;  %3023 = vmatpush.bf16.msra.mxu0 %v5261_v26  ;;  %3042 = vmatpush.bf16.msra.mxu1 %v5517_v18  ;;  %v6344_v9 = vld [vmem:[%s9530_s9 + $0x26c] sm:$0xf0]  ;;  %v5457_v8 = vor.u32 %v6348_v29, %v5454_v50  ;;  %v6276_v46 = vld [vmem:[%s9530_s9 + $0x54] sm:$0xf]  ;;  %v5588_v4 = vld [vmem:[%s9530_s9 + $0x398] sm:$0xf] }
 0x571   :  { %3080 = vmatpush.bf16.msra.mxu3 %v5521_v35  ;;  %v5166_v63 = vld [vmem:[%s9530_s9 + $0x70] sm:$0xf0]  ;;  %v5165_v33 = vor.u32 %v6280_v0, %v5164_v5  ;;  %v5421_v28 = vor.u32 %v6344_v9, %v5420_v32  ;;  %v5132_v22 = vld [vmem:[%s9530_s9 + $0x10] sm:$0xf]  ;;  %v5425_v38 = vor.u32 %v6340_v57, %v5422_v41  ;;  %v6385_v34 = vld [vmem:[%s9530_s9 + $0x3b4] sm:$0xf0] }
 0x572   :  { %v8813_v17 = vpack.c.bf16 %v2076_v15, %v2074_v3  ;;  %v8815_v12 = vpack.c.bf16 %v2077_v37, %v2075_v2  ;;  %v6272_v60 = vld [vmem:[%s9530_s9 + $0x2c] sm:$0xf0]  ;;  %3063 = vmatpush.bf16.msra.mxu2 %v5201_v30  ;;  %v5169_v6 = vor.u32 %v6276_v46, %v5166_v63  ;;  %v6268_v26 = vld [vmem:[%s9530_s9 + $0x14] sm:$0xf]  ;;  %v5364_v15 = vld [vmem:[%s9530_s9 + $0x1d8] sm:$0xf]  ;;  %v5589_v10 = vor.u32 %v6385_v34, %v5588_v4 }
 0x573   :  { %v5388_v49 = vld [vmem:[%s9530_s9 + $0x210] sm:$0xf]  ;;  %v5133_v44 = vor.u32 %v6272_v60, %v5132_v22  ;;  %v6332_v62 = vld [vmem:[%s9530_s9 + $0x214] sm:$0xf]  ;;  %v5137_v3 = vor.u32 %v6268_v26, %v5134_v7  ;;  %v6329_v37 = vld [vmem:[%s9530_s9 + $0x1f4] sm:$0xf0] }
 0x574   :  { %2881 = vmatmul.bf16.gmra.mxu0 %v8813_v17  ;;  %2900 = vmatmul.bf16.gmra.mxu1 %v8815_v12  ;;  %v6336_v43 = vld [vmem:[%s9530_s9 + $0x22c] sm:$0xf0]  ;;  %v5390_v36 = vld [vmem:[%s9530_s9 + $0x230] sm:$0xf0]  ;;  %v5365_v35 = vor.u32 %v6329_v37, %v5364_v15  ;;  %v6317_v1 = vld [vmem:[%s9530_s9 + $0x19c] sm:$0xf] }
 0x575   :  { %2919 = vmatmul.bf16.gmra.mxu2 %v8813_v17  ;;  %2938 = vmatmul.bf16.gmra.mxu3 %v8815_v12  ;;  %v5389_v18 = vor.u32 %v6336_v43, %v5388_v49  ;;  %v5393_v2 = vor.u32 %v6332_v62, %v5390_v36  ;;  %v5334_v23 = vld [vmem:[%s9530_s9 + $0x1b8] sm:$0xf0]  ;;  %v5300_v27 = vld [vmem:[%s9530_s9 + $0x158] sm:$0xf] }
 0x576   :  { %3024 = vmatpush.bf16.msra.mxu0 %v5229_v13  ;;  %3043 = vmatpush.bf16.msra.mxu1 %v5485_v52  ;;  %v5621_v13 = vor.u32 %v6393_v58, %v5620_v42  ;;  %v5332_v52 = vld [vmem:[%s9530_s9 + $0x198] sm:$0xf]  ;;  %v5590_v48 = vld [vmem:[%s9530_s9 + $0x3b8] sm:$0xf0] }
 0x577   :  { %3081 = vmatpush.bf16.msra.mxu3 %v5489_v56  ;;  %3064 = vmatpush.bf16.msra.mxu2 %v5169_v6  ;;  %v5333_v56 = vor.u32 %v6321_v11, %v5332_v52  ;;  %v6313_v29 = vld [vmem:[%s9530_s9 + $0x174] sm:$0xf0]  ;;  %v6309_v32 = vld [vmem:[%s9530_s9 + $0x15c] sm:$0xf] }
 0x578   :  { %v5556_v5 = vld [vmem:[%s9530_s9 + $0x358] sm:$0xf]  ;;  %v5302_v9 = vld [vmem:[%s9530_s9 + $0x178] sm:$0xf0]  ;;  %v5301_v46 = vor.u32 %v6313_v29, %v5300_v27 }
 0x579   :  { %v6377_v0 = vld [vmem:[%s9530_s9 + $0x374] sm:$0xf0]  ;;  %v6373_v30 = vld [vmem:[%s9530_s9 + $0x35c] sm:$0xf] }
 0x57a   :  { %3025 = vmatpush.bf16.msra.mxu0 %v5197_v21  ;;  %3044 = vmatpush.bf16.msra.mxu1 %v5453_v19  ;;  %v6381_v21 = vld [vmem:[%s9530_s9 + $0x39c] sm:$0xf]  ;;  %v5337_v19 = vor.u32 %v6317_v1, %v5334_v23  ;;  %v5557_v63 = vor.u32 %v6377_v0, %v5556_v5  ;;  %v6305_v41 = vld [vmem:[%s9530_s9 + $0x134] sm:$0xf0] }
 0x57b   :  { %3082 = vmatpush.bf16.msra.mxu3 %v5457_v8  ;;  %3065 = vmatpush.bf16.msra.mxu2 %v5137_v3  ;;  %v5593_v50 = vor.u32 %v6381_v21, %v5590_v48  ;;  %v5558_v8 = vld [vmem:[%s9530_s9 + $0x378] sm:$0xf0]  ;;  %v5524_v22 = vld [vmem:[%s9530_s9 + $0x318] sm:$0xf] }
 0x57c   :  { %v5561_v57 = vor.u32 %v6373_v30, %v5558_v8  ;;  %v6369_v60 = vld [vmem:[%s9530_s9 + $0x334] sm:$0xf0]  ;;  %v6301_v49 = vld [vmem:[%s9530_s9 + $0x11c] sm:$0xf] }
 0x57d   :  { %v5525_v6 = vor.u32 %v6369_v60, %v5524_v22  ;;  %v6365_v26 = vld [vmem:[%s9530_s9 + $0x31c] sm:$0xf]  ;;  %v5236_v62 = vld [vmem:[%s9530_s9 + $0xd8] sm:$0xf] }
 0x57e   :  { %3026 = vmatpush.bf16.msra.mxu0 %v5165_v33  ;;  %3045 = vmatpush.bf16.msra.mxu1 %v5421_v28  ;;  %v5268_v33 = vld [vmem:[%s9530_s9 + $0x118] sm:$0xf]  ;;  %v5305_v28 = vor.u32 %v6309_v32, %v5302_v9  ;;  %v6293_v37 = vld [vmem:[%s9530_s9 + $0xdc] sm:$0xf] }
 0x57f   :  { %3083 = vmatpush.bf16.msra.mxu3 %v5425_v38  ;;  %v5269_v43 = vor.u32 %v6305_v41, %v5268_v33  ;;  %v5270_v38 = vld [vmem:[%s9530_s9 + $0x138] sm:$0xf0]  ;;  %v6297_v36 = vld [vmem:[%s9530_s9 + $0xf4] sm:$0xf0] }
 0x580   :  { %v5492_v3 = vld [vmem:[%s9530_s9 + $0x2d8] sm:$0xf]  ;;  %v5238_v42 = vld [vmem:[%s9530_s9 + $0xf8] sm:$0xf0] }
 0x581   :  { %v6361_v15 = vld [vmem:[%s9530_s9 + $0x2f4] sm:$0xf0]  ;;  %v6357_v58 = vld [vmem:[%s9530_s9 + $0x2dc] sm:$0xf]  ;;  %v5241_v47 = vor.u32 %v6293_v37, %v5238_v42  ;;  %v6423_v42 = vld [vmem:[#allocation5 + $0xe4] sm:$0xf0] }
 0x582   :  { %3027 = vmatpush.bf16.msra.mxu0 %v5133_v44  ;;  %3046 = vmatpush.bf16.msra.mxu1 %v5389_v18  ;;  %v5526_v44 = vld [vmem:[%s9530_s9 + $0x338] sm:$0xf0]  ;;  %v5273_v18 = vor.u32 %v6301_v49, %v5270_v38  ;;  %v6289_v39 = vld [vmem:[%s9530_s9 + $0xb4] sm:$0xf0] }
 0x583   :  { %3084 = vmatpush.bf16.msra.mxu3 %v5393_v2  ;;  %v5529_v7 = vor.u32 %v6365_v26, %v5526_v44  ;;  %v5237_v2 = vor.u32 %v6297_v36, %v5236_v62  ;;  %v5494_v54 = vld [vmem:[%s9530_s9 + $0x2f8] sm:$0xf0]  ;;  %v5460_v25 = vld [vmem:[%s9530_s9 + $0x298] sm:$0xf]  ;;  %v5684_v26 = vld [vmem:[#allocation5 + $0x70] sm:$0xf] }
 0x584   :  { %2952 = vmatmul.bf16.vlgmr.msrb.gmra.mxu0 %v8423_v61  ;;  %2971 = vmatmul.bf16.vlgmr.msrb.gmra.mxu1 %v8425_v53  ;;  %v6285_v11 = vld [vmem:[%s9530_s9 + $0x9c] sm:$0xf]  ;;  %v5172_v21 = vld [vmem:[%s9530_s9 + $0x58] sm:$0xf] }
 0x585   :  { %2990 = vmatmul.bf16.vlgmr.msrb.gmra.mxu2 %v8423_v61  ;;  %3009 = vmatmul.bf16.vlgmr.msrb.gmra.mxu3 %v8425_v53  ;;  %v5206_v4 = vld [vmem:[%s9530_s9 + $0xb8] sm:$0xf0]  ;;  %v5428_v48 = vld [vmem:[%s9530_s9 + $0x258] sm:$0xf] }
 0x586   :  { %3096 = vmatpush.bf16.msrb.mxu0 %v5365_v35  ;;  %3115 = vmatpush.bf16.msrb.mxu1 %v5621_v13  ;;  %v5493_v35 = vor.u32 %v6361_v15, %v5492_v3  ;;  %v5497_v13 = vor.u32 %v6357_v58, %v5494_v54  ;;  %v5209_v1 = vor.u32 %v6285_v11, %v5206_v4  ;;  %v6345_v29 = vld [vmem:[%s9530_s9 + $0x274] sm:$0xf0]  ;;  %v5174_v5 = vld [vmem:[%s9530_s9 + $0x78] sm:$0xf0]  ;;  %v5676_v3 = vld [vmem:[#allocation5 + $0x60] sm:$0xf] }
 0x587   :  { %3134 = vmatpush.bf16.msrb.mxu2 %v5369_v55  ;;  %3153 = vmatpush.bf16.msrb.mxu3 %v5625_v40  ;;  %v5204_v55 = vld [vmem:[%s9530_s9 + $0x98] sm:$0xf]  ;;  %v5429_v0 = vor.u32 %v6345_v29, %v5428_v48  ;;  %v6341_v32 = vld [vmem:[%s9530_s9 + $0x25c] sm:$0xf]  ;;  %v5740_v15 = vld [vmem:[#allocation5 + $0xe0] sm:$0xf] }
 0x588   :  { %v5205_v52 = vor.u32 %v6289_v39, %v5204_v55  ;;  %v6353_v40 = vld [vmem:[%s9530_s9 + $0x2b4] sm:$0xf0]  ;;  %v5430_v9 = vld [vmem:[%s9530_s9 + $0x278] sm:$0xf0]  ;;  %v5668_v58 = vld [vmem:[#allocation5 + $0x50] sm:$0xf] }
 0x589   :  { %v5461_v34 = vor.u32 %v6353_v40, %v5460_v25  ;;  %v5433_v8 = vor.u32 %v6341_v32, %v5430_v9  ;;  %v6269_v41 = vld [vmem:[%s9530_s9 + $0x1c] sm:$0xf]  ;;  %v6409_v44 = vld [vmem:[#allocation5 + $0x74] sm:$0xf0]  ;;  %v5660_v25 = vld [vmem:[#allocation5 + $0x40] sm:$0xf] }
 0x58a   :  { %3097 = vmatpush.bf16.msrb.mxu0 %v5333_v56  ;;  %3116 = vmatpush.bf16.msrb.mxu1 %v5589_v10  ;;  %v6349_v56 = vld [vmem:[%s9530_s9 + $0x29c] sm:$0xf]  ;;  %v6425_v62 = vld [vmem:[#allocation5 + $0xf4] sm:$0xf0]  ;;  %v5724_v40 = vld [vmem:[#allocation5 + $0xc0] sm:$0xf] }
 0x58b   :  { %3135 = vmatpush.bf16.msrb.mxu2 %v5337_v19  ;;  %3154 = vmatpush.bf16.msrb.mxu3 %v5593_v50  ;;  %v5462_v10 = vld [vmem:[%s9530_s9 + $0x2b8] sm:$0xf0]  ;;  %v6281_v19 = vld [vmem:[%s9530_s9 + $0x74] sm:$0xf0]  ;;  %v6419_v4 = vld [vmem:[#allocation5 + $0xc4] sm:$0xf0] }
 0x58c   :  { %v5465_v23 = vor.u32 %v6349_v56, %v5462_v10  ;;  %v5173_v27 = vor.u32 %v6281_v19, %v5172_v21  ;;  %v6277_v50 = vld [vmem:[%s9530_s9 + $0x5c] sm:$0xf]  ;;  %v6405_v54 = vld [vmem:[#allocation5 + $0x54] sm:$0xf0]  ;;  %v9124_v56 = vld [vmem:[%s9531_s10] sm:$0xff] }
 0x58d   :  { %v5177_v30 = vor.u32 %v6277_v50, %v5174_v5  ;;  %v5142_v60 = vld [vmem:[%s9530_s9 + $0x38] sm:$0xf0]  ;;  %v6421_v55 = vld [vmem:[#allocation5 + $0xd4] sm:$0xf0]  ;;  %v5652_v10 = vld [vmem:[#allocation5 + $0x30] sm:$0xf] }
 0x58e   :  { %3098 = vmatpush.bf16.msrb.mxu0 %v5301_v46  ;;  %3117 = vmatpush.bf16.msrb.mxu1 %v5557_v63  ;;  %v5140_v46 = vld [vmem:[%s9530_s9 + $0x18] sm:$0xf]  ;;  %v6333_v49 = vld [vmem:[%s9530_s9 + $0x21c] sm:$0xf]  ;;  %v5644_v29 = vld [vmem:[#allocation5 + $0x20] sm:$0xf] }
 0x58f   :  { %3136 = vmatpush.bf16.msrb.mxu2 %v5305_v28  ;;  %3155 = vmatpush.bf16.msrb.mxu3 %v5561_v57  ;;  %v6273_v63 = vld [vmem:[%s9530_s9 + $0x34] sm:$0xf0]  ;;  %v6399_v50 = vld [vmem:[#allocation5 + $0x24] sm:$0xf0]  ;;  %v5708_v5 = vld [vmem:[#allocation5 + $0xa0] sm:$0xf] }
 0x590   :  { %v5141_v33 = vor.u32 %v6273_v63, %v5140_v46  ;;  %v5396_v28 = vld [vmem:[%s9530_s9 + $0x218] sm:$0xf]  ;;  %v6415_v32 = vld [vmem:[#allocation5 + $0xa4] sm:$0xf0]  ;;  %v5636_v9 = vld [vmem:[#allocation5 + $0x10] sm:$0xf] }
 0x591   :  { %v6337_v57 = vld [vmem:[%s9530_s9 + $0x234] sm:$0xf0]  ;;  %v5709_v63 = vor.u32 %v6415_v32, %v5708_v5 }
 0x592   :  { %3099 = vmatpush.bf16.msrb.mxu0 %v5269_v43  ;;  %3118 = vmatpush.bf16.msrb.mxu1 %v5525_v6  ;;  %v5397_v22 = vor.u32 %v6337_v57, %v5396_v28  ;;  %v5398_v43 = vld [vmem:[%s9530_s9 + $0x238] sm:$0xf0]  ;;  %v5145_v6 = vor.u32 %v6269_v41, %v5142_v60  ;;  %v6417_v19 = vld [vmem:[#allocation5 + $0xb4] sm:$0xf0]  ;;  %v5628_v60 = vld [vmem:[#allocation5] sm:$0xf] }
 0x593   :  { %3137 = vmatpush.bf16.msrb.mxu2 %v5273_v18  ;;  %3156 = vmatpush.bf16.msrb.mxu3 %v5529_v7  ;;  %v5401_v38 = vor.u32 %v6333_v49, %v5398_v43  ;;  %v5748_v18 = vld [vmem:[#allocation5 + $0xf0] sm:$0xf]  ;;  %v5685_v7 = vor.u32 %v6409_v44, %v5684_v26  ;;  %v6413_v28 = vld [vmem:[#allocation5 + $0x94] sm:$0xf0]  ;;  %v6395_v43 = vld [vmem:[#allocation5 + $0x4] sm:$0xf0] }
 0x594   :  { %2957 = vmatmul.bf16.gmra.mxu0 %v8813_v17  ;;  %2976 = vmatmul.bf16.gmra.mxu1 %v8815_v12  ;;  %v5749_v36 = vor.u32 %v6425_v62, %v5748_v18  ;;  %v9135_v26 = vperm.slane %v9124_v56, 1  ;;  %v5629_v18 = vor.u32 %v6395_v43, %v5628_v60 }
 0x595   :  { %2995 = vmatmul.bf16.gmra.mxu2 %v8813_v17  ;;  %3014 = vmatmul.bf16.gmra.mxu3 %v8815_v12 }
 0x596   :  { %3100 = vmatpush.bf16.msrb.mxu0 %v5237_v2  ;;  %3119 = vmatpush.bf16.msrb.mxu1 %v5493_v35  ;;  %v6407_v2 = vld [vmem:[#allocation5 + $0x64] sm:$0xf0]  ;;  %v5741_v35 = vor.u32 %v6423_v42, %v5740_v15 }
 0x597   :  { %3138 = vmatpush.bf16.msrb.mxu2 %v5241_v47  ;;  %3157 = vmatpush.bf16.msrb.mxu3 %v5497_v13  ;;  %v5677_v37 = vor.u32 %v6407_v2, %v5676_v3  ;;  %v5732_v47 = vld [vmem:[#allocation5 + $0xd0] sm:$0xf]  ;;  %v5669_v13 = vor.u32 %v6405_v54, %v5668_v58 }
 0x598   :  { %v5733_v39 = vor.u32 %v6421_v55, %v5732_v47 }
 0x59a   :  { %3101 = vmatpush.bf16.msrb.mxu0 %v5205_v52  ;;  %3120 = vmatpush.bf16.msrb.mxu1 %v5461_v34  ;;  %v6403_v52 = vld [vmem:[#allocation5 + $0x44] sm:$0xf0]  ;;  %v5725_v34 = vor.u32 %v6419_v4, %v5724_v40 }
 0x59b   :  { %3139 = vmatpush.bf16.msrb.mxu2 %v5209_v1  ;;  %3158 = vmatpush.bf16.msrb.mxu3 %v5465_v23  ;;  %v5661_v11 = vor.u32 %v6403_v52, %v5660_v25  ;;  %v6401_v1 = vld [vmem:[#allocation5 + $0x34] sm:$0xf0]  ;;  %v5716_v23 = vld [vmem:[#allocation5 + $0xb0] sm:$0xf] }
 0x59c   :  { %v5653_v21 = vor.u32 %v6401_v1, %v5652_v10  ;;  %v5717_v48 = vor.u32 %v6417_v19, %v5716_v23 }
 0x59e   :  { %3102 = vmatpush.bf16.msrb.mxu0 %v5173_v27  ;;  %3121 = vmatpush.bf16.msrb.mxu1 %v5429_v0  ;;  %v9131_v27 = vperm.slane %v9124_v56, 0  ;;  %v5645_v0 = vor.u32 %v6399_v50, %v5644_v29 }
 0x59f   :  { %3140 = vmatpush.bf16.msrb.mxu2 %v5177_v30  ;;  %3159 = vmatpush.bf16.msrb.mxu3 %v5433_v8  ;;  %v6397_v30 = vld [vmem:[#allocation5 + $0x14] sm:$0xf0] }
 0x5a0   :  { %v5637_v41 = vor.u32 %v6397_v30, %v5636_v9 }
 0x5a2   :  { %3103 = vmatpush.bf16.msrb.mxu0 %v5141_v33  ;;  %3122 = vmatpush.bf16.msrb.mxu1 %v5397_v22  ;;  %v5700_v33 = vld [vmem:[#allocation5 + $0x90] sm:$0xf] }
 0x5a3   :  { %3141 = vmatpush.bf16.msrb.mxu2 %v5145_v6  ;;  %3160 = vmatpush.bf16.msrb.mxu3 %v5401_v38  ;;  %v5701_v22 = vor.u32 %v6413_v28, %v5700_v33  ;;  %v5692_v6 = vld [vmem:[#allocation5 + $0x80] sm:$0xf]  ;;  %v6411_v38 = vld [vmem:[#allocation5 + $0x84] sm:$0xf0] }
 0x5a4   :  { %3028 = vmatmul.bf16.vlgmr.msra.gmra.mxu0 %v8423_v61  ;;  %3047 = vmatmul.bf16.vlgmr.msra.gmra.mxu1 %v8425_v53 }
 0x5a5   :  { %3066 = vmatmul.bf16.vlgmr.msra.gmra.mxu2 %v8423_v61  ;;  %3085 = vmatmul.bf16.vlgmr.msra.gmra.mxu3 %v8425_v53 }
 0x5a6   :  { %4250 = vmatpush.bf16.msra.mxu0 %v5685_v7  ;;  %4269 = vmatpush.bf16.msra.mxu1 %v5749_v36  ;;  %v5693_v7 = vor.u32 %v6411_v38, %v5692_v6 }
 0x5aa   :  { %4251 = vmatpush.bf16.msra.mxu0 %v5677_v37  ;;  %4270 = vmatpush.bf16.msra.mxu1 %v5741_v35 }
 0x5ae   :  { %4252 = vmatpush.bf16.msra.mxu0 %v5669_v13  ;;  %4271 = vmatpush.bf16.msra.mxu1 %v5733_v39 }
 0x5b2   :  { %4253 = vmatpush.bf16.msra.mxu0 %v5661_v11  ;;  %4272 = vmatpush.bf16.msra.mxu1 %v5725_v34 }
 0x5b4   :  { %3033 = vmatmul.bf16.gmra.mxu0 %v8813_v17  ;;  %3052 = vmatmul.bf16.gmra.mxu1 %v8815_v12 }
 0x5b5   :  { %3071 = vmatmul.bf16.gmra.mxu2 %v8813_v17  ;;  %3090 = vmatmul.bf16.gmra.mxu3 %v8815_v12 }
 0x5b6   :  { %4254 = vmatpush.bf16.msra.mxu0 %v5653_v21  ;;  %4273 = vmatpush.bf16.msra.mxu1 %v5717_v48 }
 0x5b9   :  { %v2877_v8 = vpop.f32.mrf.mxu0  ;;  %v2896_v46 = vpop.f32.mrf.mxu1 }
 0x5ba   :  { %v2878_v57 = vadd.f32 %v2877_v8, %v9131_v27  ;;  %4255 = vmatpush.bf16.msra.mxu0 %v5645_v0  ;;  %4274 = vmatpush.bf16.msra.mxu1 %v5709_v63 }
 0x5bc   :  { %v2897_v49 = vadd.f32 %v2896_v46, %v2878_v57 }
 0x5be   :  { %v3204_v44 = vmul.f32 0.044715, %v2897_v49  ;;  %4256 = vmatpush.bf16.msra.mxu0 %v5637_v41  ;;  %4275 = vmatpush.bf16.msra.mxu1 %v5701_v22  ;;  %v3172_v28 = vmul.f32 0.5, %v2897_v49 }
 0x5c0   :  { %v2915_v62 = vpop.f32.mrf.mxu2  ;;  %v2934_v36 = vpop.f32.mrf.mxu3  ;;  %v3236_v15 = vmul.f32 %v3204_v44, %v2897_v49  ;;  %v5812_v44 = vld [vmem:[#allocation5 + $0x170] sm:$0xf] }
 0x5c1   :  { %v2916_v3 = vadd.f32 %v2915_v62, %v9135_v26  ;;  %v2879_v2 = vpop.f32.mrf.mxu0  ;;  %v2898_v35 = vpop.f32.mrf.mxu1  ;;  %v6439_v62 = vld [vmem:[#allocation5 + $0x164] sm:$0xf0] }
 0x5c2   :  { %v2880_v37 = vadd.f32 %v2879_v2, %v9131_v27  ;;  %4257 = vmatpush.bf16.msra.mxu0 %v5629_v18  ;;  %4276 = vmatpush.bf16.msra.mxu1 %v5693_v7  ;;  %v3268_v47 = vmul.f32 %v3236_v15, %v2897_v49  ;;  %v6441_v18 = vld [vmem:[#allocation5 + $0x174] sm:$0xf0] }
 0x5c3   :  { %v2935_v42 = vadd.f32 %v2934_v36, %v2916_v3  ;;  %v5813_v7 = vor.u32 %v6441_v18, %v5812_v44  ;;  %v5876_v3 = vld [vmem:[#allocation5 + $0x1f0] sm:$0xf]  ;;  %v6457_v2 = vld [vmem:[#allocation5 + $0x1f4] sm:$0xf0] }
 0x5c4   :  { %v2899_v58 = vadd.f32 %v2898_v35, %v2880_v37  ;;  %3104 = vmatmul.bf16.vlgmr.msrb.gmra.mxu0 %v8423_v61  ;;  %3123 = vmatmul.bf16.vlgmr.msrb.gmra.mxu1 %v8425_v53  ;;  %v3300_v11 = vadd.f32 %v3268_v47, %v2897_v49  ;;  %v5804_v49 = vld [vmem:[#allocation5 + $0x160] sm:$0xf]  ;;  %v5877_v15 = vor.u32 %v6457_v2, %v5876_v3  ;;  %v5796_v37 = vld [vmem:[#allocation5 + $0x150] sm:$0xf]  ;;  %v6447_v3 = vld [vmem:[#allocation5 + $0x1a4] sm:$0xf0] }
 0x5c5   :  { %v3205_v54 = vmul.f32 0.044715, %v2935_v42  ;;  %3142 = vmatmul.bf16.vlgmr.msrb.gmra.mxu2 %v8423_v61  ;;  %3161 = vmatmul.bf16.vlgmr.msrb.gmra.mxu3 %v8425_v53  ;;  %v3173_v57 = vmul.f32 0.5, %v2935_v42  ;;  %v5805_v36 = vor.u32 %v6439_v62, %v5804_v49 }
 0x5c6   :  { %v3212_v13 = vmul.f32 0.044715, %v2899_v58  ;;  %v3332_v19 = vmul.f32 0.7978846, %v3300_v11  ;;  %v3180_v63 = vmul.f32 0.5, %v2899_v58  ;;  %4288 = vmatpush.bf16.msra.mxu2 %v5813_v7  ;;  %4307 = vmatpush.bf16.msra.mxu3 %v5877_v15  ;;  %v9170_v7 = vperm.slane %v9124_v56, 2 }
 0x5c7   :  { %v3237_v55 = vmul.f32 %v3205_v54, %v2935_v42  ;;  %v6455_v54 = vld [vmem:[#allocation5 + $0x1e4] sm:$0xf0]  ;;  %v5860_v11 = vld [vmem:[#allocation5 + $0x1d0] sm:$0xf] }
 0x5c8   :  { %v3244_v39 = vmul.f32 %v3212_v13, %v2899_v58  ;;  %v2917_v25 = vpop.f32.mrf.mxu2  ;;  %v2936_v34 = vpop.f32.mrf.mxu3  ;;  %v5788_v13 = vld [vmem:[#allocation5 + $0x140] sm:$0xf] }
 0x5c9   :  { %v3269_v52 = vmul.f32 %v3237_v55, %v2935_v42  ;;  %v2918_v40 = vadd.f32 %v2917_v25, %v9135_v26  ;;  %v6435_v55 = vld [vmem:[#allocation5 + $0x144] sm:$0xf0] }
 0x5ca   :  { %v3276_v4 = vmul.f32 %v3244_v39, %v2899_v58  ;;  %4289 = vmatpush.bf16.msra.mxu2 %v5805_v36  ;;  %v5836_v36 = vld [vmem:[#allocation5 + $0x1a0] sm:$0xf] }
 0x5cb   :  { %v3301_v10 = vadd.f32 %v3269_v52, %v2935_v42  ;;  %v2937_v1 = vadd.f32 %v2936_v34, %v2918_v40  ;;  %v6437_v42 = vld [vmem:[#allocation5 + $0x154] sm:$0xf0]  ;;  %v5789_v52 = vor.u32 %v6435_v55, %v5788_v13 }
 0x5cc   :  { %v3308_v23 = vadd.f32 %v3276_v4, %v2899_v58  ;;  %v5797_v35 = vor.u32 %v6437_v42, %v5796_v37  ;;  %v5868_v58 = vld [vmem:[#allocation5 + $0x1e0] sm:$0xf]  ;;  %v6453_v4 = vld [vmem:[#allocation5 + $0x1d4] sm:$0xf0]  ;;  %v5837_v42 = vor.u32 %v6447_v3, %v5836_v36 }
 0x5cd   :  { %v3213_v21 = vmul.f32 0.044715, %v2937_v1  ;;  %v3333_v61 = vmul.f32 0.7978846, %v3301_v10  ;;  %v3181_v41 = vmul.f32 0.5, %v2937_v1  ;;  %v5869_v47 = vor.u32 %v6455_v54, %v5868_v58 }
 0x5ce   :  { %v3340_v48 = vmul.f32 0.7978846, %v3308_v23  ;;  %4290 = vmatpush.bf16.msra.mxu2 %v5797_v35  ;;  %v5861_v34 = vor.u32 %v6453_v4, %v5860_v11  ;;  %v6433_v23 = vld [vmem:[#allocation5 + $0x134] sm:$0xf0]  ;;  %v5756_v35 = vld [vmem:[#allocation5 + $0x100] sm:$0xf] }
 0x5cf   :  { %v3245_v29 = vmul.f32 %v3213_v21, %v2937_v1  ;;  %4308 = vmatpush.bf16.msra.mxu3 %v5869_v47  ;;  %v6427_v58 = vld [vmem:[#allocation5 + $0x104] sm:$0xf0]  ;;  %v6445_v11 = vld [vmem:[#allocation5 + $0x194] sm:$0xf0] }
 0x5d0   :  { %6582 = vtanh.f32 %v3340_v48  ;;  %v5852_v48 = vld [vmem:[#allocation5 + $0x1c0] sm:$0xf] }
 0x5d1   :  { %v3277_v53 = vmul.f32 %v3245_v29, %v2937_v1  ;;  %6584 = vtanh.f32 %v3332_v19 }
 0x5d2   :  { %6586 = vtanh.f32 %v3333_v61  ;;  %4291 = vmatpush.bf16.msra.mxu2 %v5789_v52  ;;  %v6451_v61 = vld [vmem:[#allocation5 + $0x1c4] sm:$0xf0] }
 0x5d3   :  { %v3309_v50 = vadd.f32 %v3277_v53, %v2937_v1  ;;  %v5780_v1 = vld [vmem:[#allocation5 + $0x130] sm:$0xf]  ;;  %4309 = vmatpush.bf16.msra.mxu3 %v5861_v34 }
 0x5d4   :  { %3109 = vmatmul.bf16.gmra.mxu0 %v8813_v17  ;;  %3128 = vmatmul.bf16.gmra.mxu1 %v8815_v12  ;;  %v5781_v21 = vor.u32 %v6433_v23, %v5780_v1 }
 0x5d5   :  { %v3341_v5 = vmul.f32 0.7978846, %v3309_v50  ;;  %3147 = vmatmul.bf16.gmra.mxu2 %v8813_v17  ;;  %3166 = vmatmul.bf16.gmra.mxu3 %v8815_v12 }
 0x5d6   :  { %v6583_v0 = vpop.eup %6582  ;;  %4292 = vmatpush.bf16.msra.mxu2 %v5781_v21  ;;  %v5940_v21 = vld [vmem:[#allocation5 + $0x270] sm:$0xf] }
 0x5d7   :  { %6588 = vtanh.f32 %v3341_v5  ;;  %v6585_v32 = vpop.eup %6584  ;;  %v3404_v30 = vadd.f32 1.0, %v6583_v0  ;;  %v5853_v5 = vor.u32 %v6451_v61, %v5852_v48  ;;  %v5772_v0 = vld [vmem:[#allocation5 + $0x120] sm:$0xf]  ;;  %v9186_v61 = vperm.slane %v9124_v56, 3 }
 0x5d8   :  { %v6587_v9 = vpop.eup %6586  ;;  %v3396_v8 = vadd.f32 1.0, %v6585_v32  ;;  %v6431_v32 = vld [vmem:[#allocation5 + $0x124] sm:$0xf0] }
 0x5d9   :  { %v3397_v46 = vadd.f32 1.0, %v6587_v9  ;;  %v3436_v22 = vmul.f32 %v3404_v30, %v3180_v63  ;;  %4310 = vmatpush.bf16.msra.mxu3 %v5853_v5 }
 0x5da   :  { %v3428_v43 = vmul.f32 %v3396_v8, %v3172_v28  ;;  %v5844_v28 = vld [vmem:[#allocation5 + $0x1b0] sm:$0xf] }
 0x5db   :  { %v3429_v6 = vmul.f32 %v3397_v46, %v3173_v57  ;;  %v5773_v46 = vor.u32 %v6431_v32, %v5772_v0  ;;  %v6449_v57 = vld [vmem:[#allocation5 + $0x1b4] sm:$0xf0]  ;;  %v5820_v32 = vld [vmem:[#allocation5 + $0x180] sm:$0xf] }
 0x5dc   :  { %v9148_v17 = vpack.c.bf16 %v3436_v22, %v3428_v43  ;;  %v5845_v22 = vor.u32 %v6449_v57, %v5844_v28  ;;  %v6471_v28 = vld [vmem:[#allocation5 + $0x264] sm:$0xf0] }
 0x5dd   :  { %v6589_v33 = vpop.eup %6588  ;;  %4293 = vmatpush.bf16.msra.mxu2 %v5773_v46 }
 0x5de   :  { %v3405_v60 = vadd.f32 1.0, %v6589_v33  ;;  %4311 = vmatpush.bf16.msra.mxu3 %v5845_v22 }
 0x5e0   :  { %v3437_v38 = vmul.f32 %v3405_v60, %v3181_v41 }
 0x5e2   :  { %v9150_v12 = vpack.c.bf16 %v3437_v38, %v3429_v6  ;;  %v5764_v6 = vld [vmem:[#allocation5 + $0x110] sm:$0xf]  ;;  %v6429_v38 = vld [vmem:[#allocation5 + $0x114] sm:$0xf0]  ;;  %4312 = vmatpush.bf16.msra.mxu3 %v5837_v42 }
 0x5e3   :  { %v5765_v18 = vor.u32 %v6429_v38, %v5764_v6 }
 0x5e4   :  { %4258 = vmatmul.bf16.vlgmr.msra.gmra.mxu0 %v9148_v17  ;;  %4277 = vmatmul.bf16.vlgmr.msra.gmra.mxu1 %v9150_v12 }
 0x5e5   :  { %4294 = vmatpush.bf16.msra.mxu2 %v5765_v18 }
 0x5f1   :  { %v2882_v39 = vpop.f32.mrf.mxu0  ;;  %v2901_v25 = vpop.f32.mrf.mxu1 }
 0x5f2   :  { %v2883_v40 = vadd.f32 %v2882_v39, %v9131_v27  ;;  %v5757_v39 = vor.u32 %v6427_v58, %v5756_v35  ;;  %v5924_v35 = vld [vmem:[#allocation5 + $0x250] sm:$0xf]  ;;  %v6469_v58 = vld [vmem:[#allocation5 + $0x254] sm:$0xf0] }
 0x5f4   :  { %v9155_v10 = vadd.f32 %v2901_v25, %v2883_v40  ;;  %v5828_v40 = vld [vmem:[#allocation5 + $0x190] sm:$0xf]  ;;  %4295 = vmatpush.bf16.msra.mxu2 %v5757_v39 }
 0x5f5   :  { %v5829_v1 = vor.u32 %v6445_v11, %v5828_v40 }
 0x5f6   :  { %v3220_v19 = vmul.f32 0.044715, %v9155_v10 }
 0x5f7   :  { %4313 = vmatpush.bf16.msra.mxu3 %v5829_v1 }
 0x5f8   :  { %v3252_v29 = vmul.f32 %v3220_v19, %v9155_v10  ;;  %v2920_v53 = vpop.f32.mrf.mxu2  ;;  %v2939_v50 = vpop.f32.mrf.mxu3  ;;  %v6473_v19 = vld [vmem:[#allocation5 + $0x274] sm:$0xf0] }
 0x5f9   :  { %v2921_v9 = vadd.f32 %v2920_v53, %v9135_v26  ;;  %v2884_v30 = vpop.f32.mrf.mxu0  ;;  %v2903_v8 = vpop.f32.mrf.mxu1  ;;  %v5941_v53 = vor.u32 %v6473_v19, %v5940_v21  ;;  %v6487_v21 = vld [vmem:[#allocation5 + $0x2e4] sm:$0xf0] }
 0x5fa   :  { %v2885_v63 = vadd.f32 %v2884_v30, %v9131_v27  ;;  %v3284_v33 = vmul.f32 %v3252_v29, %v9155_v10 }
 0x5fb   :  { %v9162_v41 = vadd.f32 %v2939_v50, %v2921_v9  ;;  %4326 = vmatpush.bf16.msrb.mxu0 %v5941_v53  ;;  %v6443_v9 = vld [vmem:[#allocation5 + $0x184] sm:$0xf0] }
 0x5fc   :  { %v9164_v60 = vadd.f32 %v2903_v8, %v2885_v63  ;;  %v3316_v43 = vadd.f32 %v3284_v33, %v9155_v10  ;;  %v5821_v63 = vor.u32 %v6443_v9, %v5820_v32  ;;  %v5932_v33 = vld [vmem:[#allocation5 + $0x260] sm:$0xf] }
 0x5fd   :  { %v3221_v44 = vmul.f32 0.044715, %v9162_v41 }
 0x5fe   :  { %v3228_v27 = vmul.f32 0.044715, %v9164_v60  ;;  %v3348_v62 = vmul.f32 0.7978846, %v3316_v43  ;;  %4314 = vmatpush.bf16.msra.mxu3 %v5821_v63 }
 0x5ff   :  { %v3253_v49 = vmul.f32 %v3221_v44, %v9162_v41  ;;  %v5933_v44 = vor.u32 %v6471_v28, %v5932_v33  ;;  %v5988_v28 = vld [vmem:[#allocation5 + $0x2d0] sm:$0xf] }
 0x600   :  { %v3260_v2 = vmul.f32 %v3228_v27, %v9164_v60  ;;  %v2922_v15 = vpop.f32.mrf.mxu2  ;;  %v2941_v37 = vpop.f32.mrf.mxu3  ;;  %6590 = vtanh.f32 %v3348_v62  ;;  %v6489_v62 = vld [vmem:[#allocation5 + $0x2f4] sm:$0xf0] }
 0x601   :  { %v2923_v54 = vadd.f32 %v2922_v15, %v9135_v26  ;;  %v2953_v47 = vpop.f32.mrf.mxu0  ;;  %v2972_v13 = vpop.f32.mrf.mxu1  ;;  %v3285_v55 = vmul.f32 %v3253_v49, %v9162_v41  ;;  %v6004_v49 = vld [vmem:[#allocation5 + $0x2f0] sm:$0xf]  ;;  %4327 = vmatpush.bf16.msrb.mxu0 %v5933_v44 }
 0x602   :  { %v2954_v25 = vadd.f32 %v2953_v47, %v9170_v7  ;;  %v3292_v52 = vmul.f32 %v3260_v2, %v9164_v60  ;;  %v6005_v2 = vor.u32 %v6489_v62, %v6004_v49  ;;  %v6465_v49 = vld [vmem:[#allocation5 + $0x234] sm:$0xf0] }
 0x603   :  { %v9178_v4 = vadd.f32 %v2941_v37, %v2923_v54  ;;  %v3317_v34 = vadd.f32 %v3285_v55, %v9162_v41 }
 0x604   :  { %v9181_v26 = vadd.f32 %v2972_v13, %v2954_v25  ;;  %v3324_v23 = vadd.f32 %v3292_v52, %v9164_v60  ;;  %4345 = vmatpush.bf16.msrb.mxu1 %v6005_v2  ;;  %v5925_v13 = vor.u32 %v6469_v58, %v5924_v35  ;;  %v3188_v52 = vmul.f32 0.5, %v9155_v10 }
 0x605   :  { %v3229_v48 = vmul.f32 0.044715, %v9178_v4  ;;  %v3349_v29 = vmul.f32 0.7978846, %v3317_v34  ;;  %v3196_v34 = vmul.f32 0.5, %v9164_v60 }
 0x606   :  { %v3206_v50 = vmul.f32 0.044715, %v9181_v26  ;;  %v3356_v5 = vmul.f32 0.7978846, %v3324_v23  ;;  %v6591_v57 = vpop.eup %6590  ;;  %4328 = vmatpush.bf16.msrb.mxu0 %v5925_v13  ;;  %v5996_v23 = vld [vmem:[#allocation5 + $0x2e0] sm:$0xf] }
 0x607   :  { %v3261_v0 = vmul.f32 %v3229_v48, %v9178_v4  ;;  %v3412_v42 = vadd.f32 1.0, %v6591_v57  ;;  %v6485_v57 = vld [vmem:[#allocation5 + $0x2d4] sm:$0xf0] }
 0x608   :  { %v3238_v30 = vmul.f32 %v3206_v50, %v9181_v26  ;;  %v2991_v8 = vpop.f32.mrf.mxu2  ;;  %v3010_v46 = vpop.f32.mrf.mxu3  ;;  %6592 = vtanh.f32 %v3356_v5  ;;  %v5997_v50 = vor.u32 %v6487_v21, %v5996_v23  ;;  %v5916_v5 = vld [vmem:[#allocation5 + $0x240] sm:$0xf]  ;;  %v6463_v21 = vld [vmem:[#allocation5 + $0x224] sm:$0xf0] }
 0x609   :  { %v2992_v22 = vadd.f32 %v2991_v8, %v9186_v61  ;;  %v2955_v43 = vpop.f32.mrf.mxu0  ;;  %v2974_v6 = vpop.f32.mrf.mxu1  ;;  %v3293_v38 = vmul.f32 %v3261_v0, %v9178_v4  ;;  %6594 = vtanh.f32 %v3349_v29  ;;  %v3444_v53 = vmul.f32 %v3412_v42, %v3188_v52  ;;  %v6467_v0 = vld [vmem:[#allocation5 + $0x244] sm:$0xf0]  ;;  %v5900_v23 = vld [vmem:[#allocation5 + $0x220] sm:$0xf] }
 0x60a   :  { %v3270_v18 = vmul.f32 %v3238_v30, %v9181_v26  ;;  %v2956_v27 = vadd.f32 %v2955_v43, %v9170_v7  ;;  %v5917_v8 = vor.u32 %v6467_v0, %v5916_v5  ;;  %4346 = vmatpush.bf16.msrb.mxu1 %v5997_v50 }
 0x60b   :  { %v9195_v36 = vadd.f32 %v3010_v46, %v2992_v22  ;;  %v3325_v3 = vadd.f32 %v3293_v38, %v9178_v4  ;;  %v5989_v38 = vor.u32 %v6485_v57, %v5988_v28 }
 0x60c   :  { %v3302_v15 = vadd.f32 %v3270_v18, %v9181_v26  ;;  %v9199_v37 = vadd.f32 %v2974_v6, %v2956_v27  ;;  %4329 = vmatpush.bf16.msrb.mxu0 %v5917_v8  ;;  %v5908_v27 = vld [vmem:[#allocation5 + $0x230] sm:$0xf] }
 0x60d   :  { %v3207_v54 = vmul.f32 0.044715, %v9195_v36  ;;  %v3357_v47 = vmul.f32 0.7978846, %v3325_v3  ;;  %v5909_v42 = vor.u32 %v6465_v49, %v5908_v27  ;;  %v3174_v27 = vmul.f32 0.5, %v9181_v26 }
 0x60e   :  { %v6593_v55 = vpop.eup %6592  ;;  %v3334_v39 = vmul.f32 0.7978846, %v3302_v15  ;;  %v3214_v25 = vmul.f32 0.044715, %v9199_v37  ;;  %v3189_v15 = vmul.f32 0.5, %v9162_v41  ;;  %4347 = vmatpush.bf16.msrb.mxu1 %v5989_v38 }
 0x60f   :  { %v6595_v40 = vpop.eup %6594  ;;  %v3239_v11 = vmul.f32 %v3207_v54, %v9195_v36  ;;  %v3420_v1 = vadd.f32 1.0, %v6593_v55  ;;  %6596 = vtanh.f32 %v3357_v47  ;;  %v3197_v54 = vmul.f32 0.5, %v9178_v4 }
 0x610   :  { %v3246_v19 = vmul.f32 %v3214_v25, %v9199_v37  ;;  %v2993_v48 = vpop.f32.mrf.mxu2  ;;  %v3012_v29 = vpop.f32.mrf.mxu3  ;;  %6598 = vtanh.f32 %v3334_v39  ;;  %v3413_v33 = vadd.f32 1.0, %v6595_v40  ;;  %4330 = vmatpush.bf16.msrb.mxu0 %v5909_v42  ;;  %v5980_v39 = vld [vmem:[#allocation5 + $0x2c0] sm:$0xf]  ;;  %v6483_v25 = vld [vmem:[#allocation5 + $0x2c4] sm:$0xf0] }
 0x611   :  { %v3271_v10 = vmul.f32 %v3239_v11, %v9195_v36  ;;  %v2994_v32 = vadd.f32 %v2993_v48, %v9186_v61  ;;  %v2958_v9 = vpop.f32.mrf.mxu0  ;;  %v2977_v30 = vpop.f32.mrf.mxu1  ;;  %v3452_v60 = vmul.f32 %v3420_v1, %v3196_v34  ;;  %v5981_v1 = vor.u32 %v6483_v25, %v5980_v39  ;;  %v5884_v25 = vld [vmem:[#allocation5 + $0x200] sm:$0xf] }
 0x612   :  { %v3278_v46 = vmul.f32 %v3246_v19, %v9199_v37  ;;  %v2959_v63 = vadd.f32 %v2958_v9, %v9170_v7  ;;  %v3445_v55 = vmul.f32 %v3413_v33, %v3189_v15  ;;  %v6461_v33 = vld [vmem:[#allocation5 + $0x214] sm:$0xf0] }
 0x613   :  { %v3303_v22 = vadd.f32 %v3271_v10, %v9195_v36  ;;  %v9212_v43 = vadd.f32 %v3012_v29, %v2994_v32  ;;  %v9214_v6 = vpack.c.bf16 %v3452_v60, %v3444_v53  ;;  %v5901_v53 = vor.u32 %v6463_v21, %v5900_v23  ;;  %4348 = vmatpush.bf16.msrb.mxu1 %v5981_v1  ;;  %v5972_v10 = vld [vmem:[#allocation5 + $0x2b0] sm:$0xf]  ;;  %v6481_v32 = vld [vmem:[#allocation5 + $0x2b4] sm:$0xf0] }
 0x614   :  { %v3310_v44 = vadd.f32 %v3278_v46, %v9199_v37  ;;  %v9217_v18 = vadd.f32 %v2977_v30, %v2959_v63  ;;  %v5973_v60 = vor.u32 %v6481_v32, %v5972_v10  ;;  %v5892_v63 = vld [vmem:[#allocation5 + $0x210] sm:$0xf] }
 0x615   :  { %v6597_v62 = vpop.eup %6596  ;;  %v3335_v3 = vmul.f32 0.7978846, %v3303_v22  ;;  %v3215_v2 = vmul.f32 0.044715, %v9212_v43  ;;  %4263 = vmatmul.bf16.gmra.mxu0 %v9214_v6  ;;  %v5893_v38 = vor.u32 %v6461_v33, %v5892_v63  ;;  %v3183_v10 = vmul.f32 0.5, %v9212_v43 }
 0x616   :  { %v3342_v35 = vmul.f32 0.7978846, %v3310_v44  ;;  %v3222_v58 = vmul.f32 0.044715, %v9217_v18  ;;  %v3421_v47 = vadd.f32 1.0, %v6597_v62  ;;  %v6599_v52 = vpop.eup %6598  ;;  %4331 = vmatpush.bf16.msrb.mxu0 %v5901_v53  ;;  %v9243_v62 = vperm.slane %v9124_v56, 4 }
 0x617   :  { %6600 = vtanh.f32 %v3335_v3  ;;  %v3247_v13 = vmul.f32 %v3215_v2, %v9212_v43  ;;  %v3398_v8 = vadd.f32 1.0, %v6599_v52  ;;  %4349 = vmatpush.bf16.msrb.mxu1 %v5973_v60  ;;  %v3182_v2 = vmul.f32 0.5, %v9199_v37  ;;  %v6459_v52 = vld [vmem:[#allocation5 + $0x204] sm:$0xf0]  ;;  %v6068_v60 = vld [vmem:[#allocation5 + $0x370] sm:$0xf] }
 0x618   :  { %6602 = vtanh.f32 %v3342_v35  ;;  %v3254_v40 = vmul.f32 %v3222_v58, %v9217_v18  ;;  %v2996_v41 = vpop.f32.mrf.mxu2  ;;  %v3015_v11 = vpop.f32.mrf.mxu3  ;;  %v3453_v34 = vmul.f32 %v3421_v47, %v3197_v54  ;;  %v5964_v35 = vld [vmem:[#allocation5 + $0x2a0] sm:$0xf]  ;;  %v6479_v58 = vld [vmem:[#allocation5 + $0x2a4] sm:$0xf0] }
 0x619   :  { %v3279_v4 = vmul.f32 %v3247_v13, %v9212_v43  ;;  %v2997_v19 = vadd.f32 %v2996_v41, %v9186_v61  ;;  %v2960_v48 = vpop.f32.mrf.mxu0  ;;  %v2979_v29 = vpop.f32.mrf.mxu1  ;;  %v3430_v13 = vmul.f32 %v3398_v8, %v3174_v27  ;;  %v5965_v39 = vor.u32 %v6479_v58, %v5964_v35  ;;  %v6505_v8 = vld [vmem:[#allocation5 + $0x374] sm:$0xf0] }
 0x61a   :  { %v2961_v50 = vadd.f32 %v2960_v48, %v9170_v7  ;;  %v9229_v5 = vpack.c.bf16 %v3453_v34, %v3445_v55  ;;  %v3286_v0 = vmul.f32 %v3254_v40, %v9217_v18  ;;  %4332 = vmatpush.bf16.msrb.mxu0 %v5893_v38  ;;  %v9249_v55 = vperm.slane %v9124_v56, 5  ;;  %v6477_v48 = vld [vmem:[#allocation5 + $0x294] sm:$0xf0] }
 0x61b   :  { %v3311_v9 = vadd.f32 %v3279_v4, %v9212_v43  ;;  %v9233_v30 = vadd.f32 %v3015_v11, %v2997_v19  ;;  %4350 = vmatpush.bf16.msrb.mxu1 %v5965_v39  ;;  %v5885_v4 = vor.u32 %v6459_v52, %v5884_v25  ;;  %v5956_v19 = vld [vmem:[#allocation5 + $0x290] sm:$0xf]  ;;  %v9269_v43 = vmul.f32 0.5, %v9217_v18 }
 0x61c   :  { %v9235_v46 = vadd.f32 %v2979_v29, %v2961_v50  ;;  %4282 = vmatmul.bf16.gmra.mxu1 %v9229_v5  ;;  %v3318_v7 = vadd.f32 %v3286_v0, %v9217_v18  ;;  %v5957_v50 = vor.u32 %v6477_v48, %v5956_v19  ;;  %v3175_v0 = vmul.f32 0.5, %v9195_v36  ;;  %v6521_v19 = vld [vmem:[#allocation5 + $0x3f4] sm:$0xf0]  ;;  %v6424_v48 = vld [vmem:[#allocation5 + $0xf4] sm:$0xf] }
 0x61d   :  { %v6601_v28 = vpop.eup %6600  ;;  %v3343_v57 = vmul.f32 0.7978846, %v3311_v9  ;;  %v3223_v22 = vmul.f32 0.044715, %v9233_v30 }
 0x61e   :  { %v6603_v44 = vpop.eup %6602  ;;  %v3230_v49 = vmul.f32 0.044715, %v9235_v46  ;;  %v3350_v3 = vmul.f32 0.7978846, %v3318_v7  ;;  %v3399_v40 = vadd.f32 1.0, %v6601_v28  ;;  %4333 = vmatpush.bf16.msrb.mxu0 %v5885_v4  ;;  %v6069_v28 = vor.u32 %v6505_v8, %v6068_v60 }
 0x61f   :  { %6604 = vtanh.f32 %v3343_v57  ;;  %v3255_v15 = vmul.f32 %v3223_v22, %v9233_v30  ;;  %v3406_v42 = vadd.f32 1.0, %v6603_v44  ;;  %v6408_v57 = vld [vmem:[#allocation5 + $0x74] sm:$0xf]  ;;  %4351 = vmatpush.bf16.msrb.mxu1 %v5957_v50  ;;  %v3198_v52 = vmul.f32 0.5, %v9235_v46  ;;  %v6132_v4 = vld [vmem:[#allocation5 + $0x3f0] sm:$0xf] }
 0x620   :  { %v3262_v54 = vmul.f32 %v3230_v49, %v9235_v46  ;;  %v2998_v47 = vpop.f32.mrf.mxu2  ;;  %v3017_v26 = vpop.f32.mrf.mxu3  ;;  %6606 = vtanh.f32 %v3350_v3  ;;  %v3431_v27 = vmul.f32 %v3399_v40, %v3175_v0  ;;  %v9273_v49 = vmul.f32 0.5, %v9233_v30  ;;  %4364 = vmatpush.bf16.msrb.mxu2 %v6069_v28  ;;  %v5686_v3 = vld [vmem:[#allocation5 + $0x78] sm:$0xf0] }
 0x621   :  { %v2999_v37 = vadd.f32 %v2998_v47, %v9186_v61  ;;  %v3029_v41 = vpop.f32.mrf.mxu0  ;;  %v3048_v11 = vpop.f32.mrf.mxu1  ;;  %v3438_v34 = vmul.f32 %v3406_v42, %v3182_v2  ;;  %v3287_v1 = vmul.f32 %v3255_v15, %v9233_v30  ;;  %v5948_v2 = vld [vmem:[#allocation5 + $0x280] sm:$0xf]  ;;  %v5689_v18 = vor.u32 %v6408_v57, %v5686_v3  ;;  %v6475_v47 = vld [vmem:[#allocation5 + $0x284] sm:$0xf0] }
 0x622   :  { %v3030_v23 = vadd.f32 %v3029_v41, %v9243_v62  ;;  %v3294_v21 = vmul.f32 %v3262_v54, %v9235_v46  ;;  %v6406_v41 = vld [vmem:[#allocation5 + $0x64] sm:$0xf]  ;;  %v6133_v0 = vor.u32 %v6521_v19, %v6132_v4  ;;  %v6499_v4 = vld [vmem:[#allocation5 + $0x344] sm:$0xf0] }
 0x623   :  { %v9255_v29 = vadd.f32 %v3017_v26, %v2999_v37  ;;  %v9257_v53 = vpack.c.bf16 %v3438_v34, %v3430_v13  ;;  %v3319_v61 = vadd.f32 %v3287_v1, %v9233_v30  ;;  %v6060_v26 = vld [vmem:[#allocation5 + $0x360] sm:$0xf]  ;;  %v6503_v13 = vld [vmem:[#allocation5 + $0x364] sm:$0xf0]  ;;  %v5949_v37 = vor.u32 %v6475_v47, %v5948_v2  ;;  %4402 = vmatpush.bf16.msra.mxu0 %v5689_v18  ;;  %v6402_v19 = vld [vmem:[#allocation5 + $0x44] sm:$0xf] }
 0x624   :  { %v9262_v32 = vadd.f32 %v3048_v11, %v3030_v23  ;;  %v3326_v9 = vadd.f32 %v3294_v21, %v9235_v46  ;;  %v5678_v11 = vld [vmem:[#allocation5 + $0x68] sm:$0xf0]  ;;  %v6061_v21 = vor.u32 %v6503_v13, %v6060_v26  ;;  %4383 = vmatpush.bf16.msrb.mxu3 %v6133_v0  ;;  %v6124_v18 = vld [vmem:[#allocation5 + $0x3e0] sm:$0xf] }
 0x625   :  { %v6605_v7 = vpop.eup %6604  ;;  %v3231_v63 = vmul.f32 0.044715, %v9255_v29  ;;  %4296 = vmatmul.bf16.vlgmr.msra.gmra.mxu2 %v9257_v53  ;;  %v3351_v33 = vmul.f32 0.7978846, %v3319_v61  ;;  %4352 = vmatpush.bf16.msrb.mxu1 %v5949_v37  ;;  %v5681_v50 = vor.u32 %v6406_v41, %v5678_v11  ;;  %v9293_v2 = vmul.f32 0.5, %v9255_v29 }
 0x626   :  { %v3208_v22 = vmul.f32 0.044715, %v9262_v32  ;;  %v3407_v36 = vadd.f32 1.0, %v6605_v7  ;;  %v3358_v38 = vmul.f32 0.7978846, %v3326_v9  ;;  %v6607_v15 = vpop.eup %6606  ;;  %4365 = vmatpush.bf16.msrb.mxu2 %v6061_v21 }
 0x627   :  { %v3263_v44 = vmul.f32 %v3231_v63, %v9255_v29  ;;  %6608 = vtanh.f32 %v3351_v33  ;;  %v3414_v8 = vadd.f32 1.0, %v6607_v15  ;;  %v6052_v63 = vld [vmem:[#allocation5 + $0x350] sm:$0xf]  ;;  %v6501_v33 = vld [vmem:[#allocation5 + $0x354] sm:$0xf0]  ;;  %v9296_v15 = vperm.slane %v9124_v56, 6  ;;  %4403 = vmatpush.bf16.msra.mxu0 %v5681_v50 }
 0x628   :  { %v3240_v42 = vmul.f32 %v3208_v22, %v9262_v32  ;;  %v3067_v35 = vpop.f32.mrf.mxu2  ;;  %v3086_v58 = vpop.f32.mrf.mxu3  ;;  %v3439_v54 = vmul.f32 %v3407_v36, %v3183_v10  ;;  %6610 = vtanh.f32 %v3358_v38  ;;  %v5750_v10 = vld [vmem:[#allocation5 + $0xf8] sm:$0xf0]  ;;  %v6053_v36 = vor.u32 %v6501_v33, %v6052_v63  ;;  %v6404_v38 = vld [vmem:[#allocation5 + $0x54] sm:$0xf]  ;;  %v6519_v56 = vld [vmem:[#allocation5 + $0x3e4] sm:$0xf0] }
 0x629   :  { %v3068_v39 = vadd.f32 %v3067_v35, %v9249_v55  ;;  %v3031_v25 = vpop.f32.mrf.mxu0  ;;  %v3050_v30 = vpop.f32.mrf.mxu1  ;;  %v3295_v40 = vmul.f32 %v3263_v44, %v9255_v29  ;;  %v5753_v7 = vor.u32 %v6424_v48, %v5750_v10  ;;  %v6044_v21 = vld [vmem:[#allocation5 + $0x340] sm:$0xf]  ;;  %v5662_v0 = vld [vmem:[#allocation5 + $0x48] sm:$0xf0]  ;;  %v6116_v10 = vld [vmem:[#allocation5 + $0x3d0] sm:$0xf] }
 0x62a   :  { %v3272_v34 = vmul.f32 %v3240_v42, %v9262_v32  ;;  %v3032_v1 = vadd.f32 %v3031_v25, %v9243_v62  ;;  %v9281_v23 = vpack.c.bf16 %v3439_v54, %v3431_v27  ;;  %v5670_v54 = vld [vmem:[#allocation5 + $0x58] sm:$0xf0]  ;;  %4366 = vmatpush.bf16.msrb.mxu2 %v6053_v36  ;;  %v6422_v25 = vld [vmem:[#allocation5 + $0xe4] sm:$0xf]  ;;  %v6045_v50 = vor.u32 %v6499_v4, %v6044_v21  ;;  %v6420_v33 = vld [vmem:[#allocation5 + $0xd4] sm:$0xf] }
 0x62b   :  { %v9283_v61 = vadd.f32 %v3086_v58, %v3068_v39  ;;  %v3327_v46 = vadd.f32 %v3295_v40, %v9255_v29  ;;  %4421 = vmatpush.bf16.msra.mxu1 %v5753_v7  ;;  %v3446_v29 = vmul.f32 %v3414_v8, %v9269_v43  ;;  %v5673_v39 = vor.u32 %v6404_v38, %v5670_v54 }
 0x62c   :  { %v3304_v9 = vadd.f32 %v3272_v34, %v9262_v32  ;;  %v9287_v60 = vadd.f32 %v3050_v30, %v3032_v1  ;;  %4315 = vmatmul.bf16.vlgmr.msra.gmra.mxu3 %v9281_v23  ;;  %v5742_v30 = vld [vmem:[#allocation5 + $0xe8] sm:$0xf0]  ;;  %v6125_v1 = vor.u32 %v6519_v56, %v6124_v18  ;;  %v6400_v18 = vld [vmem:[#allocation5 + $0x34] sm:$0xf] }
 0x62d   :  { %v6609_v28 = vpop.eup %6608  ;;  %v3209_v57 = vmul.f32 0.044715, %v9283_v61  ;;  %v3359_v22 = vmul.f32 0.7978846, %v3327_v46  ;;  %4404 = vmatpush.bf16.msra.mxu0 %v5673_v39  ;;  %v5745_v46 = vor.u32 %v6422_v25, %v5742_v30  ;;  %v9325_v56 = vmul.f32 0.5, %v9283_v61 }
 0x62e   :  { %v6611_v44 = vpop.eup %6610  ;;  %v3336_v27 = vmul.f32 0.7978846, %v3304_v9  ;;  %v3216_v3 = vmul.f32 0.044715, %v9287_v60  ;;  %v3415_v58 = vadd.f32 1.0, %v6609_v28  ;;  %4384 = vmatpush.bf16.msrb.mxu3 %v6125_v1  ;;  %4367 = vmatpush.bf16.msrb.mxu2 %v6045_v50 }
 0x62f   :  { %v3241_v42 = vmul.f32 %v3209_v57, %v9283_v61  ;;  %v3422_v35 = vadd.f32 1.0, %v6611_v44  ;;  %6612 = vtanh.f32 %v3359_v22  ;;  %v6517_v9 = vld [vmem:[#allocation5 + $0x3d4] sm:$0xf0]  ;;  %v5734_v28 = vld [vmem:[#allocation5 + $0xd8] sm:$0xf0]  ;;  %v9311_v57 = vmul.f32 0.5, %v9262_v32  ;;  %4422 = vmatpush.bf16.msra.mxu1 %v5745_v46 }
 0x630   :  { %6614 = vtanh.f32 %v3336_v27  ;;  %v3248_v47 = vmul.f32 %v3216_v3, %v9287_v60  ;;  %v3069_v26 = vpop.f32.mrf.mxu2  ;;  %v3088_v13 = vpop.f32.mrf.mxu3  ;;  %v6117_v38 = vor.u32 %v6517_v9, %v6116_v10  ;;  %v6036_v44 = vld [vmem:[#allocation5 + $0x330] sm:$0xf]  ;;  %v6497_v27 = vld [vmem:[#allocation5 + $0x334] sm:$0xf0]  ;;  %v5737_v54 = vor.u32 %v6420_v33, %v5734_v28  ;;  %v6495_v10 = vld [vmem:[#allocation5 + $0x324] sm:$0xf0] }
 0x631   :  { %v3273_v40 = vmul.f32 %v3241_v42, %v9283_v61  ;;  %v3070_v37 = vadd.f32 %v3069_v26, %v9249_v55  ;;  %v3034_v41 = vpop.f32.mrf.mxu0  ;;  %v3053_v11 = vpop.f32.mrf.mxu1  ;;  %v3454_v34 = vmul.f32 %v3422_v35, %v3198_v52  ;;  %v5665_v52 = vor.u32 %v6402_v19, %v5662_v0  ;;  %v6515_v19 = vld [vmem:[#allocation5 + $0x3c4] sm:$0xf0]  ;;  %v6028_v0 = vld [vmem:[#allocation5 + $0x320] sm:$0xf]  ;;  %v6398_v9 = vld [vmem:[#allocation5 + $0x24] sm:$0xf] }
 0x632   :  { %v3280_v48 = vmul.f32 %v3248_v47, %v9287_v60  ;;  %v3035_v43 = vadd.f32 %v3034_v41, %v9243_v62  ;;  %v3447_v30 = vmul.f32 %v3415_v58, %v9273_v49  ;;  %4385 = vmatpush.bf16.msrb.mxu3 %v6117_v38  ;;  %v6108_v41 = vld [vmem:[#allocation5 + $0x3c0] sm:$0xf]  ;;  %v5646_v28 = vld [vmem:[#allocation5 + $0x28] sm:$0xf0]  ;;  %v6513_v38 = vld [vmem:[#allocation5 + $0x3b4] sm:$0xf0] }
 0x633   :  { %v3305_v8 = vadd.f32 %v3273_v40, %v9283_v61  ;;  %v9306_v7 = vadd.f32 %v3088_v13, %v3070_v37  ;;  %v9308_v63 = vpack.c.bf16 %v3454_v34, %v3446_v29  ;;  %v6654_v29 = vld [vmem:[%s9531_s10] sm:$0xff]  ;;  %4405 = vmatpush.bf16.msra.mxu0 %v5665_v52  ;;  %v6037_v40 = vor.u32 %v6497_v27, %v6036_v44  ;;  %v5654_v37 = vld [vmem:[#allocation5 + $0x38] sm:$0xf0] }
 0x634   :  { %v3312_v22 = vadd.f32 %v3280_v48, %v9287_v60  ;;  %v9314_v36 = vadd.f32 %v3053_v11, %v3035_v43  ;;  %v9322_v39 = vperm.slane %v6654_v29, 7  ;;  %4423 = vmatpush.bf16.msra.mxu1 %v5737_v54  ;;  %v5657_v4 = vor.u32 %v6400_v18, %v5654_v37  ;;  %v6418_v61 = vld [vmem:[#allocation5 + $0xc4] sm:$0xf]  ;;  %v5726_v48 = vld [vmem:[#allocation5 + $0xc8] sm:$0xf0] }
 0x635   :  { %v6613_v3 = vpop.eup %6612  ;;  %v3337_v42 = vmul.f32 0.7978846, %v3305_v8  ;;  %v3217_v35 = vmul.f32 0.044715, %v9306_v7  ;;  %4301 = vmatmul.bf16.gmra.mxu2 %v9308_v63  ;;  %v6109_v50 = vor.u32 %v6515_v19, %v6108_v41  ;;  %v5729_v33 = vor.u32 %v6418_v61, %v5726_v48  ;;  %v5718_v54 = vld [vmem:[#allocation5 + $0xb8] sm:$0xf0] }
 0x636   :  { %v6615_v47 = vpop.eup %6614  ;;  %v3344_v32 = vmul.f32 0.7978846, %v3312_v22  ;;  %v3224_v26 = vmul.f32 0.044715, %v9314_v36  ;;  %v3423_v13 = vadd.f32 1.0, %v6613_v3  ;;  %4368 = vmatpush.bf16.msrb.mxu2 %v6037_v40  ;;  %v6029_v3 = vor.u32 %v6495_v10, %v6028_v0 }
 0x637   :  { %v3249_v25 = vmul.f32 %v3217_v35, %v9306_v7  ;;  %4406 = vmatpush.bf16.msra.mxu0 %v5657_v4  ;;  %v6100_v22 = vld [vmem:[#allocation5 + $0x3b0] sm:$0xf]  ;;  %4386 = vmatpush.bf16.msrb.mxu3 %v6109_v50  ;;  %v6416_v35 = vld [vmem:[#allocation5 + $0xb4] sm:$0xf]  ;;  %v3400_v18 = vadd.f32 1.0, %v6615_v47  ;;  %v9347_v47 = vmul.f32 0.5, %v9306_v7 }
 0x638   :  { %6616 = vtanh.f32 %v3344_v32  ;;  %v3256_v11 = vmul.f32 %v3224_v26, %v9314_v36  ;;  %v3072_v34 = vpop.f32.mrf.mxu2  ;;  %v3091_v1 = vpop.f32.mrf.mxu3  ;;  %v3455_v21 = vmul.f32 %v3423_v13, %v9293_v2  ;;  %4424 = vmatpush.bf16.msra.mxu1 %v5729_v33  ;;  %v6101_v26 = vor.u32 %v6513_v38, %v6100_v22  ;;  %v6020_v13 = vld [vmem:[#allocation5 + $0x310] sm:$0xf]  ;;  %v6493_v29 = vld [vmem:[#allocation5 + $0x314] sm:$0xf0]  ;;  %v6396_v37 = vld [vmem:[#allocation5 + $0x14] sm:$0xf] }
 0x639   :  { %6618 = vtanh.f32 %v3337_v42  ;;  %v3281_v43 = vmul.f32 %v3249_v25, %v9306_v7  ;;  %v3073_v49 = vadd.f32 %v3072_v34, %v9249_v55  ;;  %v3036_v58 = vpop.f32.mrf.mxu0  ;;  %v3055_v46 = vpop.f32.mrf.mxu1  ;;  %v5649_v42 = vor.u32 %v6398_v9, %v5646_v28  ;;  %v5638_v48 = vld [vmem:[#allocation5 + $0x18] sm:$0xf0]  ;;  %v6511_v50 = vld [vmem:[#allocation5 + $0x3a4] sm:$0xf0]  ;;  %v6414_v0 = vld [vmem:[#allocation5 + $0xa4] sm:$0xf] }
 0x63a   :  { %v3037_v8 = vadd.f32 %v3036_v58, %v9243_v62  ;;  %v9334_v2 = vpack.c.bf16 %v3455_v21, %v3447_v30  ;;  %v3288_v52 = vmul.f32 %v3256_v11, %v9314_v36  ;;  %4369 = vmatpush.bf16.msrb.mxu2 %v6029_v3  ;;  %v5721_v40 = vor.u32 %v6416_v35, %v5718_v54  ;;  %v5710_v10 = vld [vmem:[#allocation5 + $0xa8] sm:$0xf0]  ;;  %v6012_v38 = vld [vmem:[#allocation5 + $0x300] sm:$0xf]  ;;  %v6394_v54 = vld [vmem:[#allocation5 + $0x4] sm:$0xf] }
 0x63b   :  { %v3313_v44 = vadd.f32 %v3281_v43, %v9306_v7  ;;  %v9338_v27 = vadd.f32 %v3091_v1, %v3073_v49  ;;  %v3184_v11 = vmul.f32 0.5, %v9287_v60  ;;  %4407 = vmatpush.bf16.msra.mxu0 %v5649_v42  ;;  %4387 = vmatpush.bf16.msrb.mxu3 %v6101_v26  ;;  %v6021_v61 = vor.u32 %v6493_v29, %v6020_v13  ;;  %v6092_v43 = vld [vmem:[#allocation5 + $0x3a0] sm:$0xf]  ;;  %v6084_v29 = vld [vmem:[#allocation5 + $0x390] sm:$0xf] }
 0x63c   :  { %v9340_v62 = vadd.f32 %v3055_v46, %v3037_v8  ;;  %4320 = vmatmul.bf16.gmra.mxu3 %v9334_v2  ;;  %v3320_v32 = vadd.f32 %v3288_v52, %v9314_v36  ;;  %v3432_v7 = vmul.f32 %v3400_v18, %v9311_v57  ;;  %4425 = vmatpush.bf16.msra.mxu1 %v5721_v40  ;;  %v5630_v18 = vld [vmem:[#allocation5 + $0x8] sm:$0xf0] }
 0x63d   :  { %v3345_v25 = vmul.f32 0.7978846, %v3313_v44  ;;  %v3225_v30 = vmul.f32 0.044715, %v9338_v27  ;;  %v5641_v46 = vor.u32 %v6396_v37, %v5638_v48  ;;  %v6093_v22 = vor.u32 %v6511_v50, %v6092_v43  ;;  %v6491_v44 = vld [vmem:[#allocation5 + $0x304] sm:$0xf0] }
 0x63e   :  { %v6617_v41 = vpop.eup %6616  ;;  %v3232_v34 = vmul.f32 0.044715, %v9340_v62  ;;  %v3352_v1 = vmul.f32 0.7978846, %v3320_v32  ;;  %4370 = vmatpush.bf16.msrb.mxu2 %v6021_v61  ;;  %v5713_v35 = vor.u32 %v6414_v0, %v5710_v10  ;;  %v6013_v13 = vor.u32 %v6491_v44, %v6012_v38  ;;  %v6507_v38 = vld [vmem:[#allocation5 + $0x384] sm:$0xf0] }
 0x63f   :  { %v6619_v21 = vpop.eup %6618  ;;  %v3408_v4 = vadd.f32 1.0, %v6617_v41  ;;  %6620 = vtanh.f32 %v3345_v25  ;;  %v3257_v19 = vmul.f32 %v3225_v30, %v9338_v27  ;;  %4408 = vmatpush.bf16.msra.mxu0 %v5641_v46  ;;  %4388 = vmatpush.bf16.msrb.mxu3 %v6093_v22  ;;  %v6509_v25 = vld [vmem:[#allocation5 + $0x394] sm:$0xf0]  ;;  %v6412_v30 = vld [vmem:[#allocation5 + $0x94] sm:$0xf]  ;;  %v5633_v41 = vor.u32 %v6394_v54, %v5630_v18 }
 0x640   :  { %v3264_v49 = vmul.f32 %v3232_v34, %v9340_v62  ;;  %v3074_v58 = vpop.f32.mrf.mxu2  ;;  %v3093_v60 = vpop.f32.mrf.mxu3  ;;  %6622 = vtanh.f32 %v3352_v1  ;;  %v3401_v3 = vadd.f32 1.0, %v6619_v21  ;;  %4426 = vmatpush.bf16.msra.mxu1 %v5713_v35  ;;  %v5702_v34 = vld [vmem:[#allocation5 + $0x98] sm:$0xf0]  ;;  %v6440_v1 = vld [vmem:[#allocation5 + $0x174] sm:$0xf]  ;;  %v9368_v61 = vmul.f32 0.5, %v9314_v36 }
 0x641   :  { %v3075_v9 = vadd.f32 %v3074_v58, %v9249_v55  ;;  %v3105_v8 = vpop.f32.mrf.mxu0  ;;  %v3124_v52 = vpop.f32.mrf.mxu1  ;;  %v3440_v33 = vmul.f32 %v3408_v4, %v3184_v11  ;;  %v3289_v28 = vmul.f32 %v3257_v19, %v9338_v27  ;;  %v6085_v11 = vor.u32 %v6509_v25, %v6084_v29  ;;  %v5814_v21 = vld [vmem:[#allocation5 + $0x178] sm:$0xf0]  ;;  %v6472_v36 = vld [vmem:[#allocation5 + $0x274] sm:$0xf]  ;;  %v6076_v22 = vld [vmem:[#allocation5 + $0x380] sm:$0xf] }
 0x642   :  { %v3106_v57 = vadd.f32 %v3105_v8, %v9296_v15  ;;  %v3296_v42 = vmul.f32 %v3264_v49, %v9340_v62  ;;  %4371 = vmatpush.bf16.msrb.mxu2 %v6013_v13  ;;  %v5705_v43 = vor.u32 %v6412_v30, %v5702_v34  ;;  %v5817_v10 = vor.u32 %v6440_v1, %v5814_v21  ;;  %v6410_v44 = vld [vmem:[#allocation5 + $0x84] sm:$0xf]  ;;  %v5694_v18 = vld [vmem:[#allocation5 + $0x88] sm:$0xf0] }
 0x643   :  { %v9357_v32 = vadd.f32 %v3093_v60, %v3075_v9  ;;  %v9359_v55 = vpack.c.bf16 %v3440_v33, %v3432_v7  ;;  %v3321_v26 = vadd.f32 %v3289_v28, %v9338_v27  ;;  %v3433_v7 = vmul.f32 %v3401_v3, %v9325_v56  ;;  %4409 = vmatpush.bf16.msra.mxu0 %v5633_v41  ;;  %v5942_v9 = vld [vmem:[#allocation5 + $0x278] sm:$0xf0]  ;;  %v5806_v13 = vld [vmem:[#allocation5 + $0x168] sm:$0xf0] }
 0x644   :  { %v9362_v40 = vadd.f32 %v3124_v52, %v3106_v57  ;;  %v3328_v37 = vadd.f32 %v3296_v42, %v9340_v62  ;;  %4389 = vmatpush.bf16.msrb.mxu3 %v6085_v11  ;;  %4427 = vmatpush.bf16.msra.mxu1 %v5705_v43  ;;  %v5945_v56 = vor.u32 %v6472_v36, %v5942_v9  ;;  %v5934_v41 = vld [vmem:[#allocation5 + $0x268] sm:$0xf0]  ;;  %v6456_v11 = vld [vmem:[#allocation5 + $0x1f4] sm:$0xf]  ;;  %v6006_v43 = vld [vmem:[#allocation5 + $0x2f8] sm:$0xf0] }
 0x645   :  { %v6621_v4 = vpop.eup %6620  ;;  %v3233_v19 = vmul.f32 0.044715, %v9357_v32  ;;  %4334 = vmatmul.bf16.vlgmr.msrb.gmra.mxu0 %v9359_v55  ;;  %v3353_v48 = vmul.f32 0.7978846, %v3321_v26  ;;  %v6077_v54 = vor.u32 %v6507_v38, %v6076_v22  ;;  %v6438_v26 = vld [vmem:[#allocation5 + $0x164] sm:$0xf]  ;;  %v5697_v30 = vor.u32 %v6410_v44, %v5694_v18 }
 0x646   :  { %v6623_v49 = vpop.eup %6622  ;;  %v3409_v58 = vadd.f32 1.0, %v6621_v4  ;;  %v3210_v60 = vmul.f32 0.044715, %v9362_v40  ;;  %v3360_v46 = vmul.f32 0.7978846, %v3328_v37  ;;  %4440 = vmatpush.bf16.msra.mxu2 %v5817_v10  ;;  %v5809_v21 = vor.u32 %v6438_v26, %v5806_v13 }
 0x647   :  { %v3265_v50 = vmul.f32 %v3233_v19, %v9357_v32  ;;  %v9373_v0 = vadd.f32 1.0, %v6623_v49  ;;  %6624 = vtanh.f32 %v3353_v48  ;;  %4478 = vmatpush.bf16.msrb.mxu0 %v5945_v56  ;;  %v6470_v37 = vld [vmem:[#allocation5 + $0x264] sm:$0xf]  ;;  %v5878_v19 = vld [vmem:[#allocation5 + $0x1f8] sm:$0xf0]  ;;  %v3200_v22 = vmul.f32 0.5, %v9340_v62 }
 0x648   :  { %v3242_v8 = vmul.f32 %v3210_v60, %v9362_v40  ;;  %v3143_v52 = vpop.f32.mrf.mxu2  ;;  %v3162_v33 = vpop.f32.mrf.mxu3  ;;  %v3441_v28 = vmul.f32 %v3409_v58, %v9347_v47  ;;  %6626 = vtanh.f32 %v3360_v46  ;;  %4390 = vmatpush.bf16.msrb.mxu3 %v6077_v54  ;;  %v5937_v4 = vor.u32 %v6470_v37, %v5934_v41  ;;  %v6488_v48 = vld [vmem:[#allocation5 + $0x2f4] sm:$0xf]  ;;  %4428 = vmatpush.bf16.msra.mxu1 %v5697_v30  ;;  %v5870_v13 = vld [vmem:[#allocation5 + $0x1e8] sm:$0xf0] }
 0x649   :  { %v3144_v3 = vadd.f32 %v3143_v52, %v9322_v39  ;;  %v3107_v57 = vpop.f32.mrf.mxu0  ;;  %v3126_v42 = vpop.f32.mrf.mxu1  ;;  %v3297_v35 = vmul.f32 %v3265_v50, %v9357_v32  ;;  %v5881_v60 = vor.u32 %v6456_v11, %v5878_v19  ;;  %v6436_v46 = vld [vmem:[#allocation5 + $0x154] sm:$0xf]  ;;  %v5798_v50 = vld [vmem:[#allocation5 + $0x158] sm:$0xf0]  ;;  %v9394_v38 = vmul.f32 0.5, %v9338_v27 }
 0x64a   :  { %v3274_v29 = vmul.f32 %v3242_v8, %v9362_v40  ;;  %v3108_v47 = vadd.f32 %v3107_v57, %v9296_v15  ;;  %v9381_v25 = vpack.c.bf16 %v3441_v28, %v3433_v7  ;;  %v6009_v7 = vor.u32 %v6488_v48, %v6006_v43  ;;  %4441 = vmatpush.bf16.msra.mxu2 %v5809_v21  ;;  %v6468_v52 = vld [vmem:[#allocation5 + $0x254] sm:$0xf]  ;;  %v5790_v19 = vld [vmem:[#allocation5 + $0x148] sm:$0xf0]  ;;  %v6466_v48 = vld [vmem:[#allocation5 + $0x244] sm:$0xf] }
 0x64b   :  { %v9383_v34 = vadd.f32 %v3162_v33, %v3144_v3  ;;  %v3329_v1 = vadd.f32 %v3297_v35, %v9357_v32  ;;  %v5801_v8 = vor.u32 %v6436_v46, %v5798_v50  ;;  %4479 = vmatpush.bf16.msrb.mxu0 %v5937_v4  ;;  %v6454_v35 = vld [vmem:[#allocation5 + $0x1e4] sm:$0xf]  ;;  %v3448_v62 = vmul.f32 %v9373_v0, %v9368_v61  ;;  %v5862_v46 = vld [vmem:[#allocation5 + $0x1d8] sm:$0xf0] }
 0x64c   :  { %v3306_v49 = vadd.f32 %v3274_v29, %v9362_v40  ;;  %v9387_v58 = vadd.f32 %v3126_v42, %v3108_v47  ;;  %4353 = vmatmul.bf16.vlgmr.msrb.gmra.mxu1 %v9381_v25  ;;  %4459 = vmatpush.bf16.msra.mxu3 %v5881_v60  ;;  %v5926_v42 = vld [vmem:[#allocation5 + $0x258] sm:$0xf0]  ;;  %v6486_v29 = vld [vmem:[#allocation5 + $0x2e4] sm:$0xf]  ;;  %v5998_v47 = vld [vmem:[#allocation5 + $0x2e8] sm:$0xf0]  ;;  %v5873_v21 = vor.u32 %v6454_v35, %v5870_v13 }
 0x64d   :  { %v6625_v10 = vpop.eup %6624  ;;  %v3211_v36 = vmul.f32 0.044715, %v9383_v34  ;;  %v3361_v9 = vmul.f32 0.7978846, %v3329_v1  ;;  %4497 = vmatpush.bf16.msrb.mxu1 %v6009_v7  ;;  %v5929_v27 = vor.u32 %v6468_v52, %v5926_v42  ;;  %v6434_v4 = vld [vmem:[#allocation5 + $0x144] sm:$0xf]  ;;  %v6001_v0 = vor.u32 %v6486_v29, %v5998_v47 }
 0x64e   :  { %v6627_v33 = vpop.eup %6626  ;;  %v3338_v28 = vmul.f32 0.7978846, %v3306_v49  ;;  %v3218_v56 = vmul.f32 0.044715, %v9387_v58  ;;  %v3417_v57 = vadd.f32 1.0, %v6625_v10  ;;  %4442 = vmatpush.bf16.msra.mxu2 %v5801_v8  ;;  %v5793_v49 = vor.u32 %v6434_v4, %v5790_v19 }
 0x64f   :  { %v3243_v44 = vmul.f32 %v3211_v36, %v9383_v34  ;;  %v3424_v3 = vadd.f32 1.0, %v6627_v33  ;;  %6628 = vtanh.f32 %v3361_v9  ;;  %4480 = vmatpush.bf16.msrb.mxu0 %v5929_v27  ;;  %v5918_v60 = vld [vmem:[#allocation5 + $0x248] sm:$0xf0]  ;;  %v6452_v7 = vld [vmem:[#allocation5 + $0x1d4] sm:$0xf]  ;;  %v3201_v29 = vmul.f32 0.5, %v9357_v32 }
 0x650   :  { %6630 = vtanh.f32 %v3338_v28  ;;  %v3250_v54 = vmul.f32 %v3218_v56, %v9387_v58  ;;  %v3145_v18 = vpop.f32.mrf.mxu2  ;;  %v3164_v26 = vpop.f32.mrf.mxu3  ;;  %4460 = vmatpush.bf16.msra.mxu3 %v5873_v21  ;;  %v5921_v9 = vor.u32 %v6466_v48, %v5918_v60  ;;  %v6484_v8 = vld [vmem:[#allocation5 + $0x2d4] sm:$0xf]  ;;  %v5990_v52 = vld [vmem:[#allocation5 + $0x2d8] sm:$0xf0]  ;;  %v5865_v56 = vor.u32 %v6452_v7, %v5862_v46  ;;  %v6482_v32 = vld [vmem:[#allocation5 + $0x2c4] sm:$0xf] }
 0x651   :  { %v3275_v30 = vmul.f32 %v3243_v44, %v9383_v34  ;;  %v3146_v37 = vadd.f32 %v3145_v18, %v9322_v39  ;;  %v3110_v41 = vpop.f32.mrf.mxu0  ;;  %v3129_v11 = vpop.f32.mrf.mxu1  ;;  %v3456_v1 = vmul.f32 %v3424_v3, %v3200_v22  ;;  %4498 = vmatpush.bf16.msrb.mxu1 %v6001_v0  ;;  %v5993_v22 = vor.u32 %v6484_v8, %v5990_v52  ;;  %v6432_v44 = vld [vmem:[#allocation5 + $0x134] sm:$0xf]  ;;  %v5782_v3 = vld [vmem:[#allocation5 + $0x138] sm:$0xf0]  ;;  %v5774_v7 = vld [vmem:[#allocation5 + $0x128] sm:$0xf0] }
 0x652   :  { %v3282_v43 = vmul.f32 %v3250_v54, %v9387_v58  ;;  %v3111_v61 = vadd.f32 %v3110_v41, %v9296_v15  ;;  %4443 = vmatpush.bf16.msra.mxu2 %v5793_v49  ;;  %v5785_v18 = vor.u32 %v6432_v44, %v5782_v3  ;;  %v5910_v41 = vld [vmem:[#allocation5 + $0x238] sm:$0xf0]  ;;  %v6462_v46 = vld [vmem:[#allocation5 + $0x224] sm:$0xf] }
 0x653   :  { %v3307_v50 = vadd.f32 %v3275_v30, %v9383_v34  ;;  %v9405_v10 = vadd.f32 %v3164_v26, %v3146_v37  ;;  %v9407_v36 = vpack.c.bf16 %v3456_v1, %v3448_v62  ;;  %v6464_v26 = vld [vmem:[#allocation5 + $0x234] sm:$0xf]  ;;  %4481 = vmatpush.bf16.msrb.mxu0 %v5921_v9  ;;  %v3449_v37 = vmul.f32 %v3417_v57, %v9394_v38  ;;  %v6430_v57 = vld [vmem:[#allocation5 + $0x124] sm:$0xf] }
 0x654   :  { %v3314_v33 = vadd.f32 %v3282_v43, %v9387_v58  ;;  %v9410_v28 = vadd.f32 %v3129_v11, %v3111_v61  ;;  %4461 = vmatpush.bf16.msra.mxu3 %v5865_v56  ;;  %v6450_v11 = vld [vmem:[#allocation5 + $0x1c4] sm:$0xf]  ;;  %v5913_v48 = vor.u32 %v6464_v26, %v5910_v41  ;;  %v5854_v43 = vld [vmem:[#allocation5 + $0x1c8] sm:$0xf0]  ;;  %v6448_v56 = vld [vmem:[#allocation5 + $0x1b4] sm:$0xf] }
 0x655   :  { %v6629_v42 = vpop.eup %6628  ;;  %v3339_v35 = vmul.f32 0.7978846, %v3307_v50  ;;  %v3219_v54 = vmul.f32 0.044715, %v9405_v10  ;;  %4339 = vmatmul.bf16.gmra.mxu0 %v9407_v36  ;;  %4499 = vmatpush.bf16.msrb.mxu1 %v5993_v22  ;;  %v5982_v61 = vld [vmem:[#allocation5 + $0x2c8] sm:$0xf0]  ;;  %v5857_v38 = vor.u32 %v6450_v11, %v5854_v43 }
 0x656   :  { %v6631_v62 = vpop.eup %6630  ;;  %v3346_v27 = vmul.f32 0.7978846, %v3314_v33  ;;  %v3226_v13 = vmul.f32 0.044715, %v9410_v28  ;;  %v3425_v47 = vadd.f32 1.0, %v6629_v42  ;;  %4444 = vmatpush.bf16.msra.mxu2 %v5785_v18  ;;  %v5985_v52 = vor.u32 %v6482_v32, %v5982_v61 }
 0x657   :  { %6632 = vtanh.f32 %v3339_v35  ;;  %v3251_v30 = vmul.f32 %v3219_v54, %v9405_v10  ;;  %4482 = vmatpush.bf16.msrb.mxu0 %v5913_v48  ;;  %v5902_v33 = vld [vmem:[#allocation5 + $0x228] sm:$0xf0]  ;;  %v5846_v22 = vld [vmem:[#allocation5 + $0x1b8] sm:$0xf0]  ;;  %v5777_v35 = vor.u32 %v6430_v57, %v5774_v7  ;;  %v6480_v18 = vld [vmem:[#allocation5 + $0x2b4] sm:$0xf] }
 0x658   :  { %6634 = vtanh.f32 %v3346_v27  ;;  %v3258_v1 = vmul.f32 %v3226_v13, %v9410_v28  ;;  %v3148_v21 = vpop.f32.mrf.mxu2  ;;  %v3167_v4 = vpop.f32.mrf.mxu3  ;;  %v3457_v19 = vmul.f32 %v3425_v47, %v3201_v29  ;;  %4462 = vmatpush.bf16.msra.mxu3 %v5857_v38  ;;  %v5905_v54 = vor.u32 %v6462_v46, %v5902_v33  ;;  %v5974_v26 = vld [vmem:[#allocation5 + $0x2b8] sm:$0xf0]  ;;  %v6428_v47 = vld [vmem:[#allocation5 + $0x114] sm:$0xf]  ;;  %v6446_v38 = vld [vmem:[#allocation5 + $0x1a4] sm:$0xf] }
 0x659   :  { %v3283_v0 = vmul.f32 %v3251_v30, %v9405_v10  ;;  %v3149_v49 = vadd.f32 %v3148_v21, %v9322_v39  ;;  %v3112_v60 = vpop.f32.mrf.mxu0  ;;  %v3131_v42 = vpop.f32.mrf.mxu1  ;;  %v5849_v29 = vor.u32 %v6448_v56, %v5846_v22  ;;  %v5766_v30 = vld [vmem:[#allocation5 + $0x118] sm:$0xf0]  ;;  %4500 = vmatpush.bf16.msrb.mxu1 %v5985_v52  ;;  %v3186_v48 = vmul.f32 0.5, %v9387_v58  ;;  %v5966_v58 = vld [vmem:[#allocation5 + $0x2a8] sm:$0xf0] }
 0x65a   :  { %v3113_v50 = vadd.f32 %v3112_v60, %v9296_v15  ;;  %v9422_v9 = vpack.c.bf16 %v3457_v19, %v3449_v37  ;;  %v3290_v8 = vmul.f32 %v3258_v1, %v9410_v28  ;;  %v3402_v15 = vadd.f32 1.0, %v6631_v62  ;;  %4445 = vmatpush.bf16.msra.mxu2 %v5777_v35  ;;  %v5894_v60 = vld [vmem:[#allocation5 + $0x218] sm:$0xf0]  ;;  %v6426_v22 = vld [vmem:[#allocation5 + $0x104] sm:$0xf] }
 0x65b   :  { %v3315_v44 = vadd.f32 %v3283_v0, %v9405_v10  ;;  %v9426_v3 = vadd.f32 %v3167_v4, %v3149_v49  ;;  %v5977_v1 = vor.u32 %v6480_v18, %v5974_v26  ;;  %v5769_v21 = vor.u32 %v6428_v47, %v5766_v30  ;;  %v6460_v4 = vld [vmem:[#allocation5 + $0x214] sm:$0xf]  ;;  %4483 = vmatpush.bf16.msrb.mxu0 %v5905_v54 }
 0x65c   :  { %v9428_v27 = vadd.f32 %v3131_v42, %v3113_v50  ;;  %4358 = vmatmul.bf16.gmra.mxu1 %v9422_v9  ;;  %v3322_v13 = vadd.f32 %v3290_v8, %v9410_v28  ;;  %v3178_v62 = vmul.f32 0.5, %v9362_v40  ;;  %4463 = vmatpush.bf16.msra.mxu3 %v5849_v29  ;;  %v5897_v50 = vor.u32 %v6460_v4, %v5894_v60  ;;  %v5838_v40 = vld [vmem:[#allocation5 + $0x1a8] sm:$0xf0]  ;;  %v6478_v8 = vld [vmem:[#allocation5 + $0x2a4] sm:$0xf] }
 0x65d   :  { %v6633_v37 = vpop.eup %6632  ;;  %v3347_v41 = vmul.f32 0.7978846, %v3315_v44  ;;  %v3227_v11 = vmul.f32 0.044715, %v9426_v3  ;;  %4501 = vmatpush.bf16.msrb.mxu1 %v5977_v1  ;;  %v5758_v44 = vld [vmem:[#allocation5 + $0x108] sm:$0xf0]  ;;  %v5841_v18 = vor.u32 %v6446_v38, %v5838_v40  ;;  %v5969_v26 = vor.u32 %v6478_v8, %v5966_v58 }
 0x65e   :  { %v6635_v19 = vpop.eup %6634  ;;  %v3234_v43 = vmul.f32 0.044715, %v9428_v27  ;;  %v3354_v32 = vmul.f32 0.7978846, %v3322_v13  ;;  %v3403_v61 = vadd.f32 1.0, %v6633_v37  ;;  %v3434_v46 = vmul.f32 %v3402_v15, %v3178_v62  ;;  %4446 = vmatpush.bf16.msra.mxu2 %v5769_v21 }
 0x65f   :  { %v3410_v0 = vadd.f32 1.0, %v6635_v19  ;;  %6636 = vtanh.f32 %v3347_v41  ;;  %v3259_v49 = vmul.f32 %v3227_v11, %v9426_v3  ;;  %v6458_v42 = vld [vmem:[#allocation5 + $0x204] sm:$0xf]  ;;  %4484 = vmatpush.bf16.msrb.mxu0 %v5897_v50  ;;  %v5886_v15 = vld [vmem:[#allocation5 + $0x208] sm:$0xf0]  ;;  %v5761_v37 = vor.u32 %v6426_v22, %v5758_v44 }
 0x660   :  { %v3266_v57 = vmul.f32 %v3234_v43, %v9428_v27  ;;  %v3150_v7 = vpop.f32.mrf.mxu2  ;;  %v3169_v35 = vpop.f32.mrf.mxu3  ;;  %v6444_v13 = vld [vmem:[#allocation5 + $0x194] sm:$0xf]  ;;  %v5830_v29 = vld [vmem:[#allocation5 + $0x198] sm:$0xf0]  ;;  %6638 = vtanh.f32 %v3354_v32  ;;  %4464 = vmatpush.bf16.msra.mxu3 %v5841_v18  ;;  %v5889_v21 = vor.u32 %v6458_v42, %v5886_v15  ;;  %v3179_v43 = vmul.f32 0.5, %v9383_v34 }
 0x661   :  { %v3151_v52 = vadd.f32 %v3150_v7, %v9322_v39  ;;  %v3442_v33 = vmul.f32 %v3410_v0, %v3186_v48  ;;  %v3291_v56 = vmul.f32 %v3259_v49, %v9426_v3  ;;  %v6476_v41 = vld [vmem:[#allocation5 + $0x294] sm:$0xf]  ;;  %v5958_v11 = vld [vmem:[#allocation5 + $0x298] sm:$0xf0]  ;;  %v5833_v4 = vor.u32 %v6444_v13, %v5830_v29  ;;  %4502 = vmatpush.bf16.msrb.mxu1 %v5969_v26  ;;  %v6442_v7 = vld [vmem:[#allocation5 + $0x184] sm:$0xf] }
 0x662   :  { %v3298_v54 = vmul.f32 %v3266_v57, %v9428_v27  ;;  %v6504_v19 = vld [vmem:[#allocation5 + $0x374] sm:$0xf]  ;;  %v6070_v62 = vld [vmem:[#allocation5 + $0x378] sm:$0xf0]  ;;  %v3187_v0 = vmul.f32 0.5, %v9405_v10  ;;  %4447 = vmatpush.bf16.msra.mxu2 %v5761_v37  ;;  %v5961_v32 = vor.u32 %v6476_v41, %v5958_v11  ;;  %v3435_v10 = vmul.f32 %v3403_v61, %v3179_v43 }
 0x663   :  { %v9441_v47 = vadd.f32 %v3169_v35, %v3151_v52  ;;  %v9443_v39 = vpack.c.bf16 %v3442_v33, %v3434_v46  ;;  %v3323_v30 = vadd.f32 %v3291_v56, %v9426_v3  ;;  %v6073_v57 = vor.u32 %v6504_v19, %v6070_v62  ;;  %4485 = vmatpush.bf16.msrb.mxu0 %v5889_v21  ;;  %v5822_v34 = vld [vmem:[#allocation5 + $0x188] sm:$0xf0]  ;;  %v6474_v40 = vld [vmem:[#allocation5 + $0x284] sm:$0xf]  ;;  %v6134_v18 = vld [vmem:[#allocation5 + $0x3f8] sm:$0xf0] }
 0x664   :  { %v3330_v1 = vadd.f32 %v3298_v54, %v9428_v27  ;;  %4465 = vmatpush.bf16.msra.mxu3 %v5833_v4  ;;  %v5950_v58 = vld [vmem:[#allocation5 + $0x288] sm:$0xf0]  ;;  %v5825_v56 = vor.u32 %v6442_v7, %v5822_v34  ;;  %v6520_v54 = vld [vmem:[#allocation5 + $0x3f4] sm:$0xf]  ;;  %v6054_v13 = vld [vmem:[#allocation5 + $0x358] sm:$0xf0] }
 0x665   :  { %v6637_v48 = vpop.eup %6636  ;;  %v3235_v49 = vmul.f32 0.044715, %v9441_v47  ;;  %4372 = vmatmul.bf16.vlgmr.msrb.gmra.mxu2 %v9443_v39  ;;  %4410 = vmatmul.bf16.vlgmr.msra.gmra.mxu0 %v9148_v17  ;;  %v3355_v50 = vmul.f32 0.7978846, %v3323_v30  ;;  %v6502_v17 = vld [vmem:[#allocation5 + $0x364] sm:$0xf]  ;;  %v5953_v35 = vor.u32 %v6474_v40, %v5950_v58  ;;  %v6137_v26 = vor.u32 %v6520_v54, %v6134_v18 }
 0x666   :  { %v3411_v60 = vadd.f32 1.0, %v6637_v48  ;;  %v3362_v38 = vmul.f32 0.7978846, %v3330_v1  ;;  %4516 = vmatpush.bf16.msrb.mxu2 %v6073_v57  ;;  %v6062_v52 = vld [vmem:[#allocation5 + $0x368] sm:$0xf0]  ;;  %v6639_v44 = vpop.eup %6638  ;;  %4503 = vmatpush.bf16.msrb.mxu1 %v5961_v32  ;;  %v3194_v4 = vmul.f32 0.5, %v9410_v28 }
 0x667   :  { %v3267_v46 = vmul.f32 %v3235_v49, %v9441_v47  ;;  %v6065_v22 = vor.u32 %v6502_v17, %v6062_v52  ;;  %v6500_v15 = vld [vmem:[#allocation5 + $0x354] sm:$0xf]  ;;  %v6518_v29 = vld [vmem:[#allocation5 + $0x3e4] sm:$0xf]  ;;  %v3418_v30 = vadd.f32 1.0, %v6639_v44  ;;  %v3202_v19 = vmul.f32 0.5, %v9428_v27 }
 0x668   :  { %v3443_v8 = vmul.f32 %v3411_v60, %v3187_v0  ;;  %6640 = vtanh.f32 %v3362_v38  ;;  %4466 = vmatpush.bf16.msra.mxu3 %v5825_v56  ;;  %v6057_v41 = vor.u32 %v6500_v15, %v6054_v13  ;;  %v6126_v11 = vld [vmem:[#allocation5 + $0x3e8] sm:$0xf0]  ;;  %v6516_v38 = vld [vmem:[#allocation5 + $0x3d4] sm:$0xf]  ;;  %v6118_v32 = vld [vmem:[#allocation5 + $0x3d8] sm:$0xf0] }
 0x669   :  { %v3299_v33 = vmul.f32 %v3267_v46, %v9441_v47  ;;  %6642 = vtanh.f32 %v3355_v50  ;;  %v6129_v21 = vor.u32 %v6518_v29, %v6126_v11  ;;  %v6046_v48 = vld [vmem:[#allocation5 + $0x348] sm:$0xf0]  ;;  %v3450_v0 = vmul.f32 %v3418_v30, %v3194_v4  ;;  %v6496_v50 = vld [vmem:[#allocation5 + $0x334] sm:$0xf]  ;;  %v6038_v28 = vld [vmem:[#allocation5 + $0x338] sm:$0xf0] }
 0x66a   :  { %v9454_v42 = vpack.c.bf16 %v3443_v8, %v3435_v10  ;;  %4517 = vmatpush.bf16.msrb.mxu2 %v6065_v22  ;;  %4504 = vmatpush.bf16.msrb.mxu1 %v5953_v35  ;;  %v6121_v7 = vor.u32 %v6516_v38, %v6118_v32  ;;  %v3195_v27 = vmul.f32 0.5, %v9426_v3  ;;  %v3203_v40 = vmul.f32 0.5, %v9441_v47  ;;  %v6514_v58 = vld [vmem:[#allocation5 + $0x3c4] sm:$0xf]  ;;  %v6110_v17 = vld [vmem:[#allocation5 + $0x3c8] sm:$0xf0] }
 0x66b   :  { %v3331_v61 = vadd.f32 %v3299_v33, %v9441_v47  ;;  %v6041_v8 = vor.u32 %v6496_v50, %v6038_v28  ;;  %v6113_v52 = vor.u32 %v6514_v58, %v6110_v17  ;;  %v6494_v22 = vld [vmem:[#allocation5 + $0x324] sm:$0xf]  ;;  %v6030_v44 = vld [vmem:[#allocation5 + $0x328] sm:$0xf0]  ;;  %v6102_v18 = vld [vmem:[#allocation5 + $0x3b8] sm:$0xf0] }
 0x66c   :  { %4391 = vmatmul.bf16.vlgmr.msrb.gmra.mxu3 %v9454_v42  ;;  %4429 = vmatmul.bf16.vlgmr.msra.gmra.mxu1 %v9150_v12  ;;  %v6498_v12 = vld [vmem:[#allocation5 + $0x344] sm:$0xf]  ;;  %v6033_v54 = vor.u32 %v6494_v22, %v6030_v44  ;;  %v6492_v47 = vld [vmem:[#allocation5 + $0x314] sm:$0xf]  ;;  %v6094_v13 = vld [vmem:[#allocation5 + $0x3a8] sm:$0xf0] }
 0x66d   :  { %v3363_v37 = vmul.f32 0.7978846, %v3331_v61  ;;  %4535 = vmatpush.bf16.msrb.mxu3 %v6137_v26  ;;  %v6049_v60 = vor.u32 %v6498_v12, %v6046_v48  ;;  %v6022_v61 = vld [vmem:[#allocation5 + $0x318] sm:$0xf0]  ;;  %v6510_v15 = vld [vmem:[#allocation5 + $0x3a4] sm:$0xf] }
 0x66e   :  { %v6641_v1 = vpop.eup %6640  ;;  %4518 = vmatpush.bf16.msrb.mxu2 %v6057_v41  ;;  %v6025_v26 = vor.u32 %v6492_v47, %v6022_v61  ;;  %v6097_v29 = vor.u32 %v6510_v15, %v6094_v13  ;;  %v6490_v30 = vld [vmem:[#allocation5 + $0x304] sm:$0xf]  ;;  %v6508_v11 = vld [vmem:[#allocation5 + $0x394] sm:$0xf]  ;;  %v6078_v4 = vld [vmem:[#allocation5 + $0x388] sm:$0xf0] }
 0x66f   :  { %v3426_v62 = vadd.f32 1.0, %v6641_v1  ;;  %6644 = vtanh.f32 %v3363_v37  ;;  %v6643_v43 = vpop.eup %6642  ;;  %v6014_v37 = vld [vmem:[#allocation5 + $0x308] sm:$0xf0]  ;;  %v6086_v1 = vld [vmem:[#allocation5 + $0x398] sm:$0xf0] }
 0x670   :  { %v3419_v46 = vadd.f32 1.0, %v6643_v43  ;;  %v6017_v41 = vor.u32 %v6490_v30, %v6014_v37 }
 0x671   :  { %v3458_v49 = vmul.f32 %v3426_v62, %v3202_v19  ;;  %4536 = vmatpush.bf16.msrb.mxu3 %v6129_v21  ;;  %v6089_v21 = vor.u32 %v6508_v11, %v6086_v1  ;;  %v108_v11 = vld [vmem:[%s9521_s0 + $0xb0] sm:$0xff] }
 0x672   :  { %4519 = vmatpush.bf16.msrb.mxu2 %v6049_v60  ;;  %v3451_v33 = vmul.f32 %v3419_v46, %v3195_v27 }
 0x673   :  { %v9461_v57 = vpack.c.bf16 %v3458_v49, %v3450_v0 }
 0x675   :  { %v6645_v34 = vpop.eup %6644  ;;  %4377 = vmatmul.bf16.gmra.mxu2 %v9461_v57  ;;  %4415 = vmatmul.bf16.gmra.mxu0 %v9214_v6  ;;  %v6512_v6 = vld [vmem:[#allocation5 + $0x3b4] sm:$0xf] }
 0x676   :  { %v3427_v10 = vadd.f32 1.0, %v6645_v34  ;;  %4537 = vmatpush.bf16.msrb.mxu3 %v6121_v7  ;;  %4520 = vmatpush.bf16.msrb.mxu2 %v6041_v8  ;;  %v6105_v3 = vor.u32 %v6512_v6, %v6102_v18 }
 0x678   :  { %v3459_v56 = vmul.f32 %v3427_v10, %v3203_v40 }
 0x67a   :  { %v3603_v35 = vpack.c.bf16 %v3459_v56, %v3451_v33  ;;  %4538 = vmatpush.bf16.msrb.mxu3 %v6113_v52  ;;  %4521 = vmatpush.bf16.msrb.mxu2 %v6033_v54 }
 0x67c   :  { %4396 = vmatmul.bf16.gmra.mxu3 %v3603_v35  ;;  %4434 = vmatmul.bf16.gmra.mxu1 %v9229_v5  ;;  %v6506_v5 = vld [vmem:[#allocation5 + $0x384] sm:$0xf] }
 0x67d   :  { %v6081_v19 = vor.u32 %v6506_v5, %v6078_v4 }
 0x67e   :  { %4539 = vmatpush.bf16.msrb.mxu3 %v6105_v3  ;;  %4522 = vmatpush.bf16.msrb.mxu2 %v6025_v26 }
 0x682   :  { %4540 = vmatpush.bf16.msrb.mxu3 %v6097_v29  ;;  %4523 = vmatpush.bf16.msrb.mxu2 %v6017_v41 }
 0x685   :  { %4448 = vmatmul.bf16.vlgmr.msra.gmra.mxu2 %v9257_v53  ;;  %4486 = vmatmul.bf16.vlgmr.msrb.gmra.mxu0 %v9359_v55  ;;  %v4259_v53 = vpop.f32.mrf.mxu0  ;;  %v4278_v55 = vpop.f32.mrf.mxu1 }
 0x686   :  { %4541 = vmatpush.bf16.msrb.mxu3 %v6089_v21 }
 0x68a   :  { %4542 = vmatpush.bf16.msrb.mxu3 %v6081_v19 }
 0x68c   :  { %4467 = vmatmul.bf16.vlgmr.msra.gmra.mxu3 %v9281_v23  ;;  %4505 = vmatmul.bf16.vlgmr.msrb.gmra.mxu1 %v9381_v25 }
 0x68d   :  { %v4261_v62 = vpop.f32.mrf.mxu0  ;;  %v4280_v23 = vpop.f32.mrf.mxu1 }
 0x695   :  { %4453 = vmatmul.bf16.gmra.mxu2 %v9308_v63  ;;  %4491 = vmatmul.bf16.gmra.mxu0 %v9407_v36  ;;  %v4264_v25 = vpop.f32.mrf.mxu0 }
 0x699   :  { %v4283_v63 = vpop.f32.mrf.mxu1 }
 0x69c   :  { %4472 = vmatmul.bf16.gmra.mxu3 %v9334_v2  ;;  %4510 = vmatmul.bf16.gmra.mxu1 %v9422_v9 }
 0x69d   :  { %v4266_v48 = vpop.f32.mrf.mxu0 }
 0x6a1   :  { %v4285_v2 = vpop.f32.mrf.mxu1 }
 0x6a5   :  { %4524 = vmatmul.bf16.vlgmr.msrb.gmra.mxu2 %v9443_v39 }
 0x6a8   :  { %v4297_v12 = vpop.f32.mrf.mxu2 }
 0x6ac   :  { %4543 = vmatmul.bf16.vlgmr.msrb.gmra.mxu3 %v9454_v42  ;;  %v9482_v42 = vld [vmem:[%s9533_s12] sm:$0x3] }
 0x6ad   :  { %v3606_v38 = vperm.slane %v9482_v42, 0 }
 0x6af   :  { %v4316_v36 = vpop.f32.mrf.mxu3  ;;  %v4260_v7 = vadd.f32 %v4259_v53, %v3606_v38  ;;  %v4262_v40 = vadd.f32 %v4261_v62, %v3606_v38  ;;  %v4265_v47 = vadd.f32 %v4264_v25, %v3606_v38  ;;  %v4267_v53 = vadd.f32 %v4266_v48, %v3606_v38 }
 0x6b0   :  { %v4299_v43 = vpop.f32.mrf.mxu2 }
 0x6b1   :  { %v4279_v50 = vadd.f32 %v4278_v55, %v4260_v7  ;;  %v4281_v52 = vadd.f32 %v4280_v23, %v4262_v40  ;;  %v4284_v13 = vadd.f32 %v4283_v63, %v4265_v47  ;;  %v4286_v23 = vadd.f32 %v4285_v2, %v4267_v53  ;;  %v132_v7 = vld [vmem:[%s9521_s0 + $0x170] sm:$0xff] }
 0x6b3   :  { %v4298_v34 = vadd.f32 %v4297_v12, %v4279_v50  ;;  %v4300_v56 = vadd.f32 %v4299_v43, %v4281_v52  ;;  %v120_v43 = vld [vmem:[%s9521_s0 + $0x110] sm:$0xff] }
 0x6b5   :  { %4529 = vmatmul.bf16.gmra.mxu2 %v9461_v57  ;;  %v4317_v10 = vadd.f32 %v4316_v36, %v4298_v34 }
 0x6b7   :  { %v4318_v9 = vpop.f32.mrf.mxu3 }
 0x6b8   :  { %v4302_v39 = vpop.f32.mrf.mxu2  ;;  %v4319_v6 = vadd.f32 %v4318_v9, %v4300_v56 }
 0x6b9   :  { %v4303_v37 = vadd.f32 %v4302_v39, %v4284_v13 }
 0x6bc   :  { %4548 = vmatmul.bf16.gmra.mxu3 %v3603_v35  ;;  %v96_v35 = vld [vmem:[%s9521_s0 + $0x50] sm:$0xff] }
 0x6bf   :  { %v4321_v32 = vpop.f32.mrf.mxu3 }
 0x6c0   :  { %v4304_v46 = vpop.f32.mrf.mxu2  ;;  %v4322_v21 = vadd.f32 %v4321_v32, %v4303_v37 }
 0x6c1   :  { %v4305_v63 = vadd.f32 %v4304_v46, %v4286_v23 }
 0x6c2   :  { %v4335_v0 = vpop.f32.mrf.mxu0 }
 0x6c3   :  { %v4336_v17 = vadd.f32 %v4335_v0, %v4317_v10 }
 0x6c7   :  { %v4323_v27 = vpop.f32.mrf.mxu3 }
 0x6c8   :  { %v4324_v9 = vadd.f32 %v4323_v27, %v4305_v63 }
 0x6c9   :  { %v4354_v49 = vpop.f32.mrf.mxu1 }
 0x6ca   :  { %v4337_v60 = vpop.f32.mrf.mxu0  ;;  %v4355_v33 = vadd.f32 %v4354_v49, %v4336_v17 }
 0x6cb   :  { %v4338_v61 = vadd.f32 %v4337_v60, %v4319_v6 }
 0x6d1   :  { %v4356_v57 = vpop.f32.mrf.mxu1 }
 0x6d2   :  { %v4340_v28 = vpop.f32.mrf.mxu0  ;;  %v4357_v29 = vadd.f32 %v4356_v57, %v4338_v61 }
 0x6d3   :  { %v4341_v55 = vadd.f32 %v4340_v28, %v4322_v21  ;;  %v97_v21 = vld [vmem:[%s9521_s0 + $0x58] sm:$0xff] }
 0x6d9   :  { %v4359_v58 = vpop.f32.mrf.mxu1 }
 0x6da   :  { %v4342_v44 = vpop.f32.mrf.mxu0  ;;  %v4360_v25 = vadd.f32 %v4359_v58, %v4341_v55 }
 0x6db   :  { %v4343_v60 = vadd.f32 %v4342_v44, %v4324_v9 }
 0x6e1   :  { %v4361_v15 = vpop.f32.mrf.mxu1 }
 0x6e2   :  { %v4411_v19 = vpop.f32.mrf.mxu0  ;;  %v4362_v32 = vadd.f32 %v4361_v15, %v4343_v60 }
 0x6e8   :  { %v4373_v8 = vpop.f32.mrf.mxu2 }
 0x6e9   :  { %v4374_v22 = vadd.f32 %v4373_v8, %v4355_v33  ;;  %v3607_v33 = vperm.slane %v9482_v42, 1 }
 0x6ea   :  { %v4413_v38 = vpop.f32.mrf.mxu0 }
 0x6ef   :  { %v4392_v54 = vpop.f32.mrf.mxu3 }
 0x6f0   :  { %v4393_v18 = vadd.f32 %v4392_v54, %v4374_v22  ;;  %v4375_v3 = vpop.f32.mrf.mxu2  ;;  %v4412_v22 = vadd.f32 %v4411_v19, %v3607_v33 }
 0x6f1   :  { %v4376_v41 = vadd.f32 %v4375_v3, %v4357_v29 }
 0x6f2   :  { %v4554_v26 = vmul.f32 %v4393_v18, %v96_v35  ;;  %v4416_v40 = vpop.f32.mrf.mxu0 }
 0x6f4   :  { %v4562_v30 = vadd.f32 %v4554_v26, %v8092_v51  ;;  %v4430_v51 = vpop.f32.mrf.mxu1 }
 0x6f5   :  { %v4431_v35 = vadd.f32 %v4430_v51, %v4412_v22 }
 0x6f6   :  { %4570 = vst [vmem:[#allocation7] sm:$0xff] %v4562_v30 }
 0x6f7   :  { %v4394_v1 = vpop.f32.mrf.mxu3 }
 0x6f8   :  { %v4395_v5 = vadd.f32 %v4394_v1, %v4376_v41  ;;  %v4378_v4 = vpop.f32.mrf.mxu2 }
 0x6f9   :  { %v4379_v36 = vadd.f32 %v4378_v4, %v4360_v25 }
 0x6fa   :  { %v4556_v62 = vmul.f32 %v4395_v5, %v108_v11  ;;  %v4418_v17 = vpop.f32.mrf.mxu0  ;;  %v4417_v11 = vadd.f32 %v4416_v40, %v3607_v33 }
 0x6fc   :  { %v4564_v12 = vadd.f32 %v4556_v62, %v8119_v31  ;;  %v4432_v57 = vpop.f32.mrf.mxu1 }
 0x6fe   :  { %4572 = vst [vmem:[#allocation7 + $0x10] sm:$0xff] %v4564_v12 }
 0x6ff   :  { %v4397_v0 = vpop.f32.mrf.mxu3 }
 0x700   :  { %v4398_v49 = vadd.f32 %v4397_v0, %v4379_v36  ;;  %v4380_v39 = vpop.f32.mrf.mxu2  ;;  %v4419_v36 = vadd.f32 %v4418_v17, %v3607_v33  ;;  %v109_v0 = vld [vmem:[%s9521_s0 + $0xb8] sm:$0xff] }
 0x701   :  { %v4381_v31 = vadd.f32 %v4380_v39, %v4362_v32 }
 0x702   :  { %v4558_v48 = vmul.f32 %v4398_v49, %v120_v43  ;;  %v4487_v6 = vpop.f32.mrf.mxu0 }
 0x704   :  { %v4566_v2 = vadd.f32 %v4558_v48, %v8136_v14  ;;  %v4435_v58 = vpop.f32.mrf.mxu1 }
 0x705   :  { %v4436_v4 = vadd.f32 %v4435_v58, %v4417_v11 }
 0x706   :  { %4574 = vst [vmem:[#allocation7 + $0x20] sm:$0xff] %v4566_v2 }
 0x707   :  { %v4399_v46 = vpop.f32.mrf.mxu3 }
 0x708   :  { %v4400_v50 = vadd.f32 %v4399_v46, %v4381_v31  ;;  %v4449_v28 = vpop.f32.mrf.mxu2 }
 0x709   :  { %v4450_v18 = vadd.f32 %v4449_v28, %v4431_v35 }
 0x70a   :  { %v4560_v34 = vmul.f32 %v4400_v50, %v132_v7  ;;  %v4489_v30 = vpop.f32.mrf.mxu0  ;;  %v121_v50 = vld [vmem:[%s9521_s0 + $0x118] sm:$0xff] }
 0x70c   :  { %v4568_v27 = vadd.f32 %v4560_v34, %v8158_v45  ;;  %v4437_v56 = vpop.f32.mrf.mxu1  ;;  %v4414_v45 = vadd.f32 %v4413_v38, %v3607_v33 }
 0x70d   :  { %v4438_v49 = vadd.f32 %v4437_v56, %v4419_v36 }
 0x70e   :  { %4576 = vst [vmem:[#allocation7 + $0x30] sm:$0xff] %v4568_v27  ;;  %v4433_v26 = vadd.f32 %v4432_v57, %v4414_v45 }
 0x70f   :  { %v4468_v10 = vpop.f32.mrf.mxu3 }
 0x710   :  { %v4451_v8 = vpop.f32.mrf.mxu2  ;;  %v4469_v3 = vadd.f32 %v4468_v10, %v4450_v18 }
 0x711   :  { %v4452_v29 = vadd.f32 %v4451_v8, %v4433_v26 }
 0x712   :  { %v4488_v15 = vadd.f32 %v4487_v6, %v4469_v3  ;;  %v4492_v63 = vpop.f32.mrf.mxu0 }
 0x714   :  { %v4506_v47 = vpop.f32.mrf.mxu1 }
 0x715   :  { %v4507_v41 = vadd.f32 %v4506_v47, %v4488_v15 }
 0x717   :  { %v4470_v14 = vpop.f32.mrf.mxu3 }
 0x718   :  { %v4454_v52 = vpop.f32.mrf.mxu2  ;;  %v4471_v37 = vadd.f32 %v4470_v14, %v4452_v29 }
 0x719   :  { %v4455_v62 = vadd.f32 %v4454_v52, %v4436_v4 }
 0x71a   :  { %v4490_v19 = vadd.f32 %v4489_v30, %v4471_v37  ;;  %v4494_v46 = vpop.f32.mrf.mxu0 }
 0x71c   :  { %v4508_v1 = vpop.f32.mrf.mxu1 }
 0x71d   :  { %v4509_v51 = vadd.f32 %v4508_v1, %v4490_v19 }
 0x71f   :  { %v4473_v44 = vpop.f32.mrf.mxu3 }
 0x720   :  { %v4456_v54 = vpop.f32.mrf.mxu2  ;;  %v4474_v25 = vadd.f32 %v4473_v44, %v4455_v62 }
 0x721   :  { %v4457_v32 = vadd.f32 %v4456_v54, %v4438_v49 }
 0x722   :  { %v4493_v39 = vadd.f32 %v4492_v63, %v4474_v25 }
 0x724   :  { %v4511_v48 = vpop.f32.mrf.mxu1 }
 0x725   :  { %v4512_v57 = vadd.f32 %v4511_v48, %v4493_v39 }
 0x727   :  { %v4475_v61 = vpop.f32.mrf.mxu3 }
 0x728   :  { %v4525_v13 = vpop.f32.mrf.mxu2  ;;  %v4476_v31 = vadd.f32 %v4475_v61, %v4457_v32 }
 0x729   :  { %v4526_v42 = vadd.f32 %v4525_v13, %v4507_v41 }
 0x72a   :  { %v4495_v34 = vadd.f32 %v4494_v46, %v4476_v31 }
 0x72c   :  { %v4513_v10 = vpop.f32.mrf.mxu1 }
 0x72d   :  { %v4514_v17 = vadd.f32 %v4513_v10, %v4495_v34 }
 0x72f   :  { %v4544_v5 = vpop.f32.mrf.mxu3 }
 0x730   :  { %v4545_v53 = vadd.f32 %v4544_v5, %v4526_v42  ;;  %v4527_v55 = vpop.f32.mrf.mxu2 }
 0x731   :  { %v4528_v43 = vadd.f32 %v4527_v55, %v4509_v51 }
 0x732   :  { %v4555_v23 = vmul.f32 %v4545_v53, %v97_v21 }
 0x734   :  { %v4563_v12 = vadd.f32 %v4555_v23, %v8097_v59 }
 0x736   :  { %4571 = vst [vmem:[#allocation7 + $0x8] sm:$0xff] %v4563_v12 }
 0x737   :  { %v4546_v9 = vpop.f32.mrf.mxu3 }
 0x738   :  { %v4547_v60 = vadd.f32 %v4546_v9, %v4528_v43  ;;  %v4530_v38 = vpop.f32.mrf.mxu2 }
 0x739   :  { %v4531_v7 = vadd.f32 %v4530_v38, %v4512_v57 }
 0x73a   :  { %v4557_v2 = vmul.f32 %v4547_v60, %v109_v0 }
 0x73c   :  { %v4565_v59 = vadd.f32 %v4557_v2, %v8114_v24  ;;  %v133_v24 = vld [vmem:[%s9521_s0 + $0x178] sm:$0xff] }
 0x73e   :  { %4573 = vst [vmem:[#allocation7 + $0x18] sm:$0xff] %v4565_v59 }
 0x73f   :  { %v4549_v28 = vpop.f32.mrf.mxu3 }
 0x740   :  { %v4550_v27 = vadd.f32 %v4549_v28, %v4531_v7  ;;  %v4532_v8 = vpop.f32.mrf.mxu2 }
 0x741   :  { %v4533_v14 = vadd.f32 %v4532_v8, %v4514_v17 }
 0x742   :  { %v4559_v40 = vmul.f32 %v4550_v27, %v121_v50 }
 0x744   :  { %v4567_v58 = vadd.f32 %v4559_v40, %v8144_v16 }
 0x746   :  { %4575 = vst [vmem:[#allocation7 + $0x28] sm:$0xff] %v4567_v58 }
 0x747   :  { %v4551_v52 = vpop.f32.mrf.mxu3 }
 0x748   :  { %v4552_v33 = vadd.f32 %v4551_v52, %v4533_v14 }
 0x74a   :  { %v4561_v56 = vmul.f32 %v4552_v33, %v133_v24 }
 0x74c   :  { %v4569_v16 = vadd.f32 %v4561_v56, %v8163_v20 }
 0x74e   :  { %4577 = vst [vmem:[#allocation7 + $0x38] sm:$0xff] %v4569_v16 }
 0x74f   :  { %4590 = dma.vmem_to_hbm [thread:$0]  %s4583_s28, 1024, %s4585_s14, [#allocation4], %s6741_s1, %s6741_s1, %s6742_s5  }
 0x750   :  { %6731 = dma.done.wait [#allocation4], 1024  }
 0x751   :  { %6732 = vsyncadd [#allocation4], 4294966272 }
 0x752   :  { %4595 = vsyncpa [#allocation3], 1 }
 0x753   :  { %4596 = vsyncpa [#allocation6], 1 }
 0x754   :  { %4597 = vsyncpa [#allocation4], 1 }

</bundles_post_ra>
